<compile_context>
chip_gen: v7x
topology: tpu7x:2x2x1
jax: 0.10.0
libtpu: 0.0.40
codegen_flags: <defaults>
</compile_context>

<pallas_src>
import jax
import jax.numpy as jnp
from jax import lax
from jax.experimental import pallas as pl
from jax.experimental.pallas import tpu as pltpu


# ---------------------------------------------------------------------------
# helpers
# ---------------------------------------------------------------------------
def _round_up(n, m):
    return ((n + m - 1) // m) * m


def _pick_tile(n, cap, mult):
    """Largest divisor of n that is <= cap and (a multiple of `mult` or == n)."""
    cap = max(1, min(cap, n))
    for c in range(cap, 0, -1):
        if n % c == 0 and (c % mult == 0 or c == n):
            return c
    return n


# ---------------------------------------------------------------------------
# Fused bidirectional GRU recurrence kernel.
#   grid = (direction, batch-tile, time-chunk); dims: ("parallel","parallel",
#   "arbitrary").  The backward direction reads its gx chunk through a
#   reversed chunk index_map and walks the chunk back-to-front -- no flips.
#   Per grid step refs:
#     gx_ref : (Tc, 3, tb, H)  precomputed x@Wih + bih (gate-major) chunk
#     whh_ref: (3, H, H)       recurrent weights, this direction
#     bhh_ref: (3, 1, H)
#     out_ref: (tb, Tc, H)     batch-major streamed output chunk
#     h_ref  : (2, tb, H)      carried hidden state (indexed by direction)
# ---------------------------------------------------------------------------
def _bigru_chunk_kernel(gx_ref, whh_ref, bhh_ref, out_ref, h_ref):
    d = pl.program_id(0)
    c = pl.program_id(2)
    Tc = gx_ref.shape[0]

    @pl.when(c == 0)
    def _init():
        h_ref[d] = jnp.zeros(h_ref.shape[1:], h_ref.dtype)

    # hoist weight / bias loads out of the serial time loop
    wr, wz, wn = whh_ref[0], whh_ref[1], whh_ref[2]
    br, bz, bn = bhh_ref[0], bhh_ref[1], bhh_ref[2]

    def step(i, h):
        # forward walks the chunk 0..Tc-1, backward walks Tc-1..0
        li = i + d * (Tc - 1 - 2 * i)
        gx = gx_ref[li]                                          # (3, tb, H)
        gr = jnp.dot(h, wr, preferred_element_type=jnp.float32) + br
        gz = jnp.dot(h, wz, preferred_element_type=jnp.float32) + bz
        gn = jnp.dot(h, wn, preferred_element_type=jnp.float32) + bn
        r = jax.nn.sigmoid(gx[0] + gr)
        z = jax.nn.sigmoid(gx[1] + gz)
        n = jnp.tanh(gx[2] + r * gn)
        h_new = (1.0 - z) * n + z * h
        out_ref[:, pl.ds(li, 1), :] = h_new[:, None, :]
        return h_new

    h_ref[d] = lax.fori_loop(0, Tc, step, h_ref[d], unroll=Tc <= 8)


def bigru(x_btd, p, *, max_time_chunk=32, vmem_budget=16 * 1024 * 1024):
    """Bidirectional GRU over batch-major x (B, T, D) -> (h_fwd, h_bwd), each (B, T, H)."""
    B, T, D = x_btd.shape
    H = p["whh"].shape[-1]

    # pad batch to a sublane multiple (8); padded rows are sliced off afterwards
    Bp = _round_up(B, 8)
    if Bp != B:
        x_btd = jnp.pad(x_btd, ((0, Bp - B), (0, 0), (0, 0)))

    # Hoisted, time-parallel input projection (gate-major layout), XLA glue.
    # gx: (2, T, 3, Bp, H)
    gx = jnp.einsum("btd,zdgh->ztgbh", x_btd, p["wih"]) + p["bih"][:, None, :, None, :]

    Tc = _pick_tile(T, max_time_chunk, 8)          # Tc divides T; mult of 8 or == T
    C = T // Tc
    tb_cap = max(8, vmem_budget // max(1, 32 * Tc * H))
    tb = _pick_tile(Bp, tb_cap, 8)
    NB = Bp // tb

    def gx_map(d, b, c):
        return (d, c + d * (C - 1 - 2 * c), 0, b, 0)

    def out_map(d, b, c):
        return (d, b, c + d * (C - 1 - 2 * c), 0)

    # TODO(synk): optionally store gx / whh in bf16 for the recurrent dot to
    # halve the streamed bytes (small deviation from the f32 torch reference).
    out = pl.pallas_call(
        _bigru_chunk_kernel,
        out_shape=jax.ShapeDtypeStruct((2, Bp, T, H), jnp.float32),
        grid_spec=pltpu.PrefetchScalarGridSpec(
            num_scalar_prefetch=0,
            grid=(2, NB, C),
            in_specs=[
                pl.BlockSpec((pl.Squeezed(), Tc, 3, tb, H), gx_map),
                pl.BlockSpec((pl.Squeezed(), 3, H, H), lambda d, b, c: (d, 0, 0, 0)),
                pl.BlockSpec((pl.Squeezed(), 3, 1, H), lambda d, b, c: (d, 0, 0, 0)),
            ],
            out_specs=pl.BlockSpec((pl.Squeezed(), tb, Tc, H), out_map),
            scratch_shapes=[pltpu.VMEM((2, tb, H), jnp.float32)],
        ),
        compiler_params=pltpu.CompilerParams(
            dimension_semantics=("parallel", "parallel", "arbitrary"),
            vmem_limit_bytes=48 * 1024 * 1024,
        ),
    )(gx, p["whh"], p["bhh"])

    return out[0, :B], out[1, :B]


# ---------------------------------------------------------------------------
# Word-level additive attention pooling (operates on split fwd/bwd halves so
# the GRU output never needs a transpose or a big concat):
#   u      = tanh(h_f W_f + h_b W_b + b)          (2-D lane-dense matmuls)
#   scores = sum_k u * ctx                        (VPU multiply + lane reduce)
#   alpha  = softmax over words
#   pooled = [ sum_t alpha h_f , sum_t alpha h_b ]  (VPU + sublane reduce)
# ---------------------------------------------------------------------------
def _word_attn_kernel(hf_ref, hb_ref, wf_ref, wb_ref, b_ref, ctx_ref,
                      pooled_ref, alpha_ref):
    tb, T, H = hf_ref.shape
    K = wf_ref.shape[1]
    hf = hf_ref[...]
    hb = hb_ref[...]
    u = jnp.tanh(
        jnp.dot(hf.reshape(tb * T, H), wf_ref[...], preferred_element_type=jnp.float32)
        + jnp.dot(hb.reshape(tb * T, H), wb_ref[...], preferred_element_type=jnp.float32)
        + b_ref[...]
    ).reshape(tb, T, K)
    scores = jnp.sum(u * ctx_ref[...], axis=-1)                 # (tb, T)
    alpha = jax.nn.softmax(scores, axis=-1)
    aw = alpha[:, :, None]
    pooled_ref[:, 0, :] = jnp.sum(aw * hf, axis=1)              # no M=1 matmuls
    pooled_ref[:, 1, :] = jnp.sum(aw * hb, axis=1)
    alpha_ref[...] = alpha


def word_attention(h_f, h_b, w_f, w_b, b, ctx, *, vmem_budget=16 * 1024 * 1024):
    B, T, H = h_f.shape
    K = w_f.shape[1]
    per_row = 4 * T * (4 * H + 2 * K) + 4 * (T + 2 * H)         # approx VMEM per batch row
    tb = _pick_tile(B, max(1, vmem_budget // max(1, per_row)), 8)
    return pl.pallas_call(
        _word_attn_kernel,
        out_shape=(
            jax.ShapeDtypeStruct((B, 2, H), jnp.float32),
            jax.ShapeDtypeStruct((B, T), jnp.float32),
        ),
        grid_spec=pltpu.PrefetchScalarGridSpec(
            num_scalar_prefetch=0,
            grid=(B // tb,),
            in_specs=[
                pl.BlockSpec((tb, T, H), lambda i: (i, 0, 0)),
                pl.BlockSpec((tb, T, H), lambda i: (i, 0, 0)),
                pl.BlockSpec(w_f.shape, lambda i: (0, 0)),
                pl.BlockSpec(w_b.shape, lambda i: (0, 0)),
                pl.BlockSpec(b.shape, lambda i: (0, 0)),
                pl.BlockSpec(ctx.shape, lambda i: (0, 0)),
            ],
            out_specs=[
                pl.BlockSpec((tb, 2, H), lambda i: (i, 0, 0)),
                pl.BlockSpec((tb, T), lambda i: (i, 0)),
            ],
        ),
        compiler_params=pltpu.CompilerParams(
            dimension_semantics=("parallel",),
            vmem_limit_bytes=48 * 1024 * 1024,
        ),
    )(h_f, h_b, w_f, w_b, b, ctx)


# ---------------------------------------------------------------------------
# Document-level label-wise multi-head attention + per-class aggregation.
#   One fused (tn*Ts, H) @ (H, 2C) matmul per direction half against the
#   concatenated [w_att | w_out]; softmax over sentences; VPU reduce.
#   y[n,c] = sum_t alpha[n,t,c] * (S[n,t,:] . W_out[:,c]) + b[c]
# ---------------------------------------------------------------------------
def _doc_attn_kernel(sf_ref, sb_ref, wf_ref, wb_ref, bout_ref, y_ref, alpha_ref):
    tn, Ts, H = sf_ref.shape
    C2 = wf_ref.shape[1]
    C = C2 // 2
    sf = sf_ref[...]
    sb = sb_ref[...]
    z = (jnp.dot(sf.reshape(tn * Ts, H), wf_ref[...], preferred_element_type=jnp.float32)
         + jnp.dot(sb.reshape(tn * Ts, H), wb_ref[...], preferred_element_type=jnp.float32)
         ).reshape(tn, Ts, C2)
    scores = z[:, :, :C]
    proj = z[:, :, C:]
    alpha = jax.nn.softmax(scores, axis=1)                      # over sentences
    y_ref[...] = jnp.sum(alpha * proj, axis=1) + bout_ref[...]
    alpha_ref[...] = alpha


def doc_attention(s_f, s_b, w_f, w_b, b_out, *, vmem_budget=16 * 1024 * 1024):
    N, Ts, H = s_f.shape
    C = w_f.shape[1] // 2
    per_row = 4 * Ts * (4 * H + 6 * C) + 4 * C
    tn = _pick_tile(N, max(1, vmem_budget // max(1, per_row)), 8)
    return pl.pallas_call(
        _doc_attn_kernel,
        out_shape=(
            jax.ShapeDtypeStruct((N, C), jnp.float32),
            jax.ShapeDtypeStruct((N, Ts, C), jnp.float32),
        ),
        grid_spec=pltpu.PrefetchScalarGridSpec(
            num_scalar_prefetch=0,
            grid=(N // tn,),
            in_specs=[
                pl.BlockSpec((tn, Ts, H), lambda i: (i, 0, 0)),
                pl.BlockSpec((tn, Ts, H), lambda i: (i, 0, 0)),
                pl.BlockSpec(w_f.shape, lambda i: (0, 0)),
                pl.BlockSpec(w_b.shape, lambda i: (0, 0)),
                pl.BlockSpec(b_out.shape, lambda i: (0, 0)),
            ],
            out_specs=[
                pl.BlockSpec((tn, C), lambda i: (i, 0)),
                pl.BlockSpec((tn, Ts, C), lambda i: (i, 0, 0)),
            ],
        ),
        compiler_params=pltpu.CompilerParams(
            dimension_semantics=("parallel",),
            vmem_limit_bytes=48 * 1024 * 1024,
        ),
    )(s_f, s_b, w_f, w_b, b_out)


# ---------------------------------------------------------------------------
# Parameter construction (deterministic, synthetic).
# ---------------------------------------------------------------------------
def _uniform(key, shape, scale):
    return jax.random.uniform(key, shape, jnp.float32, -scale, scale)


def make_bigru_params(key, d_in, hidden):
    """Gate-major ([r, z, n] along a leading axis) weights; fwd/bwd stacked."""
    ks = jax.random.split(key, 4)
    s = 1.0 / float(hidden) ** 0.5
    return dict(
        wih=_uniform(ks[0], (2, d_in, 3, hidden), s),
        whh=_uniform(ks[1], (2, 3, hidden, hidden), s),
        bih=_uniform(ks[2], (2, 3, hidden), s),
        bhh=_uniform(ks[3], (2, 3, 1, hidden), s),
    )


def make_params(key, num_tokens, embed_size, word_hidden, sent_hidden, num_classes):
    ks = jax.random.split(key, 8)
    word_out = 2 * word_hidden          # bidirectional word encoder output
    doc_out = 2 * sent_hidden
    return dict(
        embed=jax.random.normal(ks[0], (num_tokens, embed_size), jnp.float32) * 0.1,
        word_gru=make_bigru_params(ks[1], embed_size, word_hidden),
        word_att_w=_uniform(ks[2], (word_out, word_out), 0.1),
        word_att_b=jnp.zeros((1, word_out), jnp.float32),
        word_att_ctx=_uniform(ks[3], (1, word_out), 0.1),
        sent_gru=make_bigru_params(ks[4], word_out, sent_hidden),
        doc_att_w=_uniform(ks[5], (doc_out, num_classes), 0.1),
        doc_out_w=_uniform(ks[6], (doc_out, num_classes), 0.1),
        doc_out_b=jnp.zeros((1, num_classes), jnp.float32),
    )


# ---------------------------------------------------------------------------
# Full HGRULWAN forward.
# ---------------------------------------------------------------------------
@jax.jit
def hgrulwan_forward(params, sents):
    n_doc, n_sents, sen_len = sents.shape
    flat = sents.reshape(-1, sen_len)                       # (B = n_doc*n_sents, L)

    # ---- word encoder (AttentionWordEncoder) ----
    emb = jnp.take(params["embed"], flat, axis=0)           # (B, L, E)   XLA gather
    hf, hb = bigru(emb, params["word_gru"])                 # (B, L, Hw) each
    Hw = params["word_gru"]["whh"].shape[-1]
    w = params["word_att_w"]
    pooled, word_attn = word_attention(
        hf, hb, w[:Hw], w[Hw:], params["word_att_b"], params["word_att_ctx"]
    )                                                       # (B, 2, Hw), (B, L)

    # ---- stack_and_pad_tensors: equal sentence counts -> plain reshape ----
    sen_enc = pooled.reshape(n_doc, n_sents, 2 * Hw)        # (n_doc, n_sents, 2Hw)

    # ---- doc encoder (GRUMultiHeadAtt, label-wise attention) ----
    sf, sb = bigru(sen_enc, params["sent_gru"])             # (n_doc, n_sents, Hs) each
    Hs = params["sent_gru"]["whh"].shape[-1]
    w_att, w_out = params["doc_att_w"], params["doc_out_w"]
    wcf = jnp.concatenate([w_att[:Hs], w_out[:Hs]], axis=1)  # (Hs, 2C)
    wcb = jnp.concatenate([w_att[Hs:], w_out[Hs:]], axis=1)  # (Hs, 2C)
    y_pred, sent_attn = doc_attention(sf, sb, wcf, wcb, params["doc_out_b"])
    return y_pred, word_attn, sent_attn, 0


if __name__ == "__main__":
    # small, forward-consistent shapes
    num_tokens = 50
    embed_size = 16
    word_hidden = 16
    sent_hidden = 16
    num_classes = 4
    n_doc, n_sents, sen_len = 2, 4, 8

    key = jax.random.PRNGKey(0)
    k_par, k_tok = jax.random.split(key)
    params = make_params(k_par, num_tokens, embed_size, word_hidden,
                         sent_hidden, num_classes)
    sents = jax.random.randint(k_tok, (n_doc, n_sents, sen_len), 0, num_tokens,
                               dtype=jnp.int32)

    y_pred, word_attn, sent_attn, _ = hgrulwan_forward(params, sents)
    jax.block_until_ready((y_pred, word_attn, sent_attn))

    assert y_pred.shape == (n_doc, num_classes)
    assert word_attn.shape == (n_doc * n_sents, sen_len)
    assert sent_attn.shape == (n_doc, n_sents, num_classes)
    assert bool(jnp.all(jnp.isfinite(y_pred)))
    assert bool(jnp.all(jnp.isfinite(word_attn)))
    assert bool(jnp.all(jnp.isfinite(sent_attn)))
    print("KERNEL_OK")
</pallas_src>

<mosaic_0001>
module attributes {stable_mosaic.version = 11 : i64} {
  func.func @_bigru_chunk_kernel(%arg0: i32, %arg1: i32, %arg2: i32, %arg3: memref<1x8x3x8x16xf32, #tpu.memory_space<vmem>>, %arg4: memref<1x3x16x16xf32, #tpu.memory_space<vmem>>, %arg5: memref<1x3x1x16xf32, #tpu.memory_space<vmem>>, %arg6: memref<1x8x8x16xf32, #tpu.memory_space<vmem>>, %arg7: memref<2x8x16xf32, #tpu.memory_space<vmem>>) attributes {dimension_semantics = [#tpu.dimension_semantics<parallel>, #tpu.dimension_semantics<parallel>, #tpu.dimension_semantics<arbitrary>], iteration_bounds = array<i64: 2, 1, 1>, scalar_prefetch = 0 : i64, scratch_operands = 1 : i64, tpu.core_type = #tpu.core_type<tc>, window_params = [{transform_indices = @transform_0, window_bounds = array<i64: 1, 8, 3, 8, 16>}, {transform_indices = @transform_1, window_bounds = array<i64: 1, 3, 16, 16>}, {transform_indices = @transform_2, window_bounds = array<i64: 1, 3, 1, 16>}, {transform_indices = @transform_3, window_bounds = array<i64: 1, 8, 8, 16>}]} {
    %c0_i32 = arith.constant 0 : i32
    %0 = arith.cmpi eq, %arg2, %c0_i32 : i32
    %1 = arith.extui %0 : i1 to i32
    %c0_i32_0 = arith.constant 0 : i32
    %2 = arith.cmpi ne, %1, %c0_i32_0 : i32
    scf.if %2 {
      %cst_146 = arith.constant 0.000000e+00 : f32
      %398 = vector.broadcast %cst_146 : f32 to vector<8x16xf32>
      %399 = arith.index_cast %arg0 : i32 to index
      %c0_147 = arith.constant 0 : index
      %c0_148 = arith.constant 0 : index
      %400 = vector.load %arg7[%399, %c0_147, %c0_148] : memref<2x8x16xf32, #tpu.memory_space<vmem>>, vector<1x8x16xf32>
      %401 = vector.shape_cast %400 : vector<1x8x16xf32> to vector<8x16xf32>
      %402 = vector.shape_cast %398 : vector<8x16xf32> to vector<1x8x16xf32>
      tpu.vector_store %arg7[%399, %c0_147, %c0_148], %402 {strides = array<i32>} : memref<2x8x16xf32, #tpu.memory_space<vmem>>, vector<1x8x16xf32>,
    } else {
    }
    %c0 = arith.constant 0 : index
    %c0_1 = arith.constant 0 : index
    %c0_2 = arith.constant 0 : index
    %c0_3 = arith.constant 0 : index
    %3 = vector.load %arg4[%c0, %c0_1, %c0_2, %c0_3] : memref<1x3x16x16xf32, #tpu.memory_space<vmem>>, vector<1x1x16x16xf32>
    %4 = vector.shape_cast %3 : vector<1x1x16x16xf32> to vector<16x16xf32>
    %c0_4 = arith.constant 0 : index
    %c1 = arith.constant 1 : index
    %c0_5 = arith.constant 0 : index
    %c0_6 = arith.constant 0 : index
    %5 = vector.load %arg4[%c0_4, %c1, %c0_5, %c0_6] : memref<1x3x16x16xf32, #tpu.memory_space<vmem>>, vector<1x1x16x16xf32>
    %6 = vector.shape_cast %5 : vector<1x1x16x16xf32> to vector<16x16xf32>
    %c0_7 = arith.constant 0 : index
    %c2 = arith.constant 2 : index
    %c0_8 = arith.constant 0 : index
    %c0_9 = arith.constant 0 : index
    %7 = vector.load %arg4[%c0_7, %c2, %c0_8, %c0_9] : memref<1x3x16x16xf32, #tpu.memory_space<vmem>>, vector<1x1x16x16xf32>
    %8 = vector.shape_cast %7 : vector<1x1x16x16xf32> to vector<16x16xf32>
    %c0_10 = arith.constant 0 : index
    %c0_11 = arith.constant 0 : index
    %c0_12 = arith.constant 0 : index
    %c0_13 = arith.constant 0 : index
    %9 = vector.load %arg5[%c0_10, %c0_11, %c0_12, %c0_13] : memref<1x3x1x16xf32, #tpu.memory_space<vmem>>, vector<1x1x1x16xf32>
    %10 = vector.shape_cast %9 : vector<1x1x1x16xf32> to vector<1x16xf32>
    %c0_14 = arith.constant 0 : index
    %c1_15 = arith.constant 1 : index
    %c0_16 = arith.constant 0 : index
    %c0_17 = arith.constant 0 : index
    %11 = vector.load %arg5[%c0_14, %c1_15, %c0_16, %c0_17] : memref<1x3x1x16xf32, #tpu.memory_space<vmem>>, vector<1x1x1x16xf32>
    %12 = vector.shape_cast %11 : vector<1x1x1x16xf32> to vector<1x16xf32>
    %c0_18 = arith.constant 0 : index
    %c2_19 = arith.constant 2 : index
    %c0_20 = arith.constant 0 : index
    %c0_21 = arith.constant 0 : index
    %13 = vector.load %arg5[%c0_18, %c2_19, %c0_20, %c0_21] : memref<1x3x1x16xf32, #tpu.memory_space<vmem>>, vector<1x1x1x16xf32>
    %14 = vector.shape_cast %13 : vector<1x1x1x16xf32> to vector<1x16xf32>
    %15 = arith.index_cast %arg0 : i32 to index
    %c0_22 = arith.constant 0 : index
    %c0_23 = arith.constant 0 : index
    %16 = vector.load %arg7[%15, %c0_22, %c0_23] : memref<2x8x16xf32, #tpu.memory_space<vmem>>, vector<1x8x16xf32>
    %17 = vector.shape_cast %16 : vector<1x8x16xf32> to vector<8x16xf32>
    %c0_i32_24 = arith.constant 0 : i32
    %c2_i32 = arith.constant 2 : i32
    %18 = arith.muli %c2_i32, %c0_i32_24 : i32
    %c7_i32 = arith.constant 7 : i32
    %19 = arith.subi %c7_i32, %18 : i32
    %20 = arith.muli %arg0, %19 : i32
    %21 = arith.addi %c0_i32_24, %20 : i32
    %c0_25 = arith.constant 0 : index
    %22 = arith.index_cast %21 : i32 to index
    %c0_26 = arith.constant 0 : index
    %c0_27 = arith.constant 0 : index
    %c0_28 = arith.constant 0 : index
    %23 = vector.load %arg3[%c0_25, %22, %c0_26, %c0_27, %c0_28] : memref<1x8x3x8x16xf32, #tpu.memory_space<vmem>>, vector<1x1x3x8x16xf32>
    %24 = vector.shape_cast %23 : vector<1x1x3x8x16xf32> to vector<3x8x16xf32>
    %cst = arith.constant dense<0.000000e+00> : vector<8x16xf32>
    %25 = tpu.matmul %17, %4, %cst {dimension_numbers = #tpu.dot_dimension_numbers<[1], [0], [0], [1], [0, 0, 1, 1], [], []>} : vector<8x16xf32>, vector<16x16xf32>, vector<8x16xf32> -> vector<8x16xf32>
    %26 = vector.broadcast %10 : vector<1x16xf32> to vector<8x16xf32>
    %27 = arith.addf %25, %26 : vector<8x16xf32>
    %cst_29 = arith.constant dense<0.000000e+00> : vector<8x16xf32>
    %28 = tpu.matmul %17, %6, %cst_29 {dimension_numbers = #tpu.dot_dimension_numbers<[1], [0], [0], [1], [0, 0, 1, 1], [], []>} : vector<8x16xf32>, vector<16x16xf32>, vector<8x16xf32> -> vector<8x16xf32>
    %29 = vector.broadcast %12 : vector<1x16xf32> to vector<8x16xf32>
    %30 = arith.addf %28, %29 : vector<8x16xf32>
    %cst_30 = arith.constant dense<0.000000e+00> : vector<8x16xf32>
    %31 = tpu.matmul %17, %8, %cst_30 {dimension_numbers = #tpu.dot_dimension_numbers<[1], [0], [0], [1], [0, 0, 1, 1], [], []>} : vector<8x16xf32>, vector<16x16xf32>, vector<8x16xf32> -> vector<8x16xf32>
    %32 = vector.broadcast %14 : vector<1x16xf32> to vector<8x16xf32>
    %33 = arith.addf %31, %32 : vector<8x16xf32>
    %34 = vector.extract_strided_slice %24 {offsets = [0, 0, 0], sizes = [1, 8, 16], strides = [1, 1, 1]} : vector<3x8x16xf32> to vector<1x8x16xf32>
    %35 = vector.shape_cast %34 : vector<1x8x16xf32> to vector<8x16xf32>
    %36 = arith.addf %35, %27 : vector<8x16xf32>
    %37 = arith.negf %36 : vector<8x16xf32>
    %38 = math.exp %37 : vector<8x16xf32>
    %cst_31 = arith.constant 1.000000e+00 : f32
    %39 = vector.broadcast %cst_31 : f32 to vector<8x16xf32>
    %40 = arith.addf %39, %38 : vector<8x16xf32>
    %41 = arith.divf %39, %40 : vector<8x16xf32>
    %42 = vector.extract_strided_slice %24 {offsets = [1, 0, 0], sizes = [1, 8, 16], strides = [1, 1, 1]} : vector<3x8x16xf32> to vector<1x8x16xf32>
    %43 = vector.shape_cast %42 : vector<1x8x16xf32> to vector<8x16xf32>
    %44 = arith.addf %43, %30 : vector<8x16xf32>
    %45 = arith.negf %44 : vector<8x16xf32>
    %46 = math.exp %45 : vector<8x16xf32>
    %cst_32 = arith.constant 1.000000e+00 : f32
    %47 = vector.broadcast %cst_32 : f32 to vector<8x16xf32>
    %48 = arith.addf %47, %46 : vector<8x16xf32>
    %49 = arith.divf %47, %48 : vector<8x16xf32>
    %50 = vector.extract_strided_slice %24 {offsets = [2, 0, 0], sizes = [1, 8, 16], strides = [1, 1, 1]} : vector<3x8x16xf32> to vector<1x8x16xf32>
    %51 = vector.shape_cast %50 : vector<1x8x16xf32> to vector<8x16xf32>
    %52 = arith.mulf %41, %33 : vector<8x16xf32>
    %53 = arith.addf %51, %52 : vector<8x16xf32>
    %54 = math.tanh %53 : vector<8x16xf32>
    %cst_33 = arith.constant 1.000000e+00 : f32
    %55 = vector.broadcast %cst_33 : f32 to vector<8x16xf32>
    %56 = arith.subf %55, %49 : vector<8x16xf32>
    %57 = arith.mulf %56, %54 : vector<8x16xf32>
    %58 = arith.mulf %49, %17 : vector<8x16xf32>
    %59 = arith.addf %57, %58 : vector<8x16xf32>
    %60 = vector.shape_cast %59 : vector<8x16xf32> to vector<8x1x16xf32>
    %c0_34 = arith.constant 0 : index
    %c0_35 = arith.constant 0 : index
    %61 = arith.index_cast %21 : i32 to index
    %c0_36 = arith.constant 0 : index
    %62 = vector.load %arg6[%c0_34, %c0_35, %61, %c0_36] : memref<1x8x8x16xf32, #tpu.memory_space<vmem>>, vector<1x8x1x16xf32>
    %63 = vector.shape_cast %62 : vector<1x8x1x16xf32> to vector<8x1x16xf32>
    %64 = vector.shape_cast %60 : vector<8x1x16xf32> to vector<1x8x1x16xf32>
    tpu.vector_store %arg6[%c0_34, %c0_35, %61, %c0_36], %64 {strides = array<i32>} : memref<1x8x8x16xf32, #tpu.memory_space<vmem>>, vector<1x8x1x16xf32>,
    %c1_i32 = arith.constant 1 : i32
    %c2_i32_37 = arith.constant 2 : i32
    %65 = arith.muli %c2_i32_37, %c1_i32 : i32
    %c7_i32_38 = arith.constant 7 : i32
    %66 = arith.subi %c7_i32_38, %65 : i32
    %67 = arith.muli %arg0, %66 : i32
    %68 = arith.addi %c1_i32, %67 : i32
    %c0_39 = arith.constant 0 : index
    %69 = arith.index_cast %68 : i32 to index
    %c0_40 = arith.constant 0 : index
    %c0_41 = arith.constant 0 : index
    %c0_42 = arith.constant 0 : index
    %70 = vector.load %arg3[%c0_39, %69, %c0_40, %c0_41, %c0_42] : memref<1x8x3x8x16xf32, #tpu.memory_space<vmem>>, vector<1x1x3x8x16xf32>
    %71 = vector.shape_cast %70 : vector<1x1x3x8x16xf32> to vector<3x8x16xf32>
    %cst_43 = arith.constant dense<0.000000e+00> : vector<8x16xf32>
    %72 = tpu.matmul %59, %4, %cst_43 {dimension_numbers = #tpu.dot_dimension_numbers<[1], [0], [0], [1], [0, 0, 1, 1], [], []>} : vector<8x16xf32>, vector<16x16xf32>, vector<8x16xf32> -> vector<8x16xf32>
    %73 = vector.broadcast %10 : vector<1x16xf32> to vector<8x16xf32>
    %74 = arith.addf %72, %73 : vector<8x16xf32>
    %cst_44 = arith.constant dense<0.000000e+00> : vector<8x16xf32>
    %75 = tpu.matmul %59, %6, %cst_44 {dimension_numbers = #tpu.dot_dimension_numbers<[1], [0], [0], [1], [0, 0, 1, 1], [], []>} : vector<8x16xf32>, vector<16x16xf32>, vector<8x16xf32> -> vector<8x16xf32>
    %76 = vector.broadcast %12 : vector<1x16xf32> to vector<8x16xf32>
    %77 = arith.addf %75, %76 : vector<8x16xf32>
    %cst_45 = arith.constant dense<0.000000e+00> : vector<8x16xf32>
    %78 = tpu.matmul %59, %8, %cst_45 {dimension_numbers = #tpu.dot_dimension_numbers<[1], [0], [0], [1], [0, 0, 1, 1], [], []>} : vector<8x16xf32>, vector<16x16xf32>, vector<8x16xf32> -> vector<8x16xf32>
    %79 = vector.broadcast %14 : vector<1x16xf32> to vector<8x16xf32>
    %80 = arith.addf %78, %79 : vector<8x16xf32>
    %81 = vector.extract_strided_slice %71 {offsets = [0, 0, 0], sizes = [1, 8, 16], strides = [1, 1, 1]} : vector<3x8x16xf32> to vector<1x8x16xf32>
    %82 = vector.shape_cast %81 : vector<1x8x16xf32> to vector<8x16xf32>
    %83 = arith.addf %82, %74 : vector<8x16xf32>
    %84 = arith.negf %83 : vector<8x16xf32>
    %85 = math.exp %84 : vector<8x16xf32>
    %cst_46 = arith.constant 1.000000e+00 : f32
    %86 = vector.broadcast %cst_46 : f32 to vector<8x16xf32>
    %87 = arith.addf %86, %85 : vector<8x16xf32>
    %88 = arith.divf %86, %87 : vector<8x16xf32>
    %89 = vector.extract_strided_slice %71 {offsets = [1, 0, 0], sizes = [1, 8, 16], strides = [1, 1, 1]} : vector<3x8x16xf32> to vector<1x8x16xf32>
    %90 = vector.shape_cast %89 : vector<1x8x16xf32> to vector<8x16xf32>
    %91 = arith.addf %90, %77 : vector<8x16xf32>
    %92 = arith.negf %91 : vector<8x16xf32>
    %93 = math.exp %92 : vector<8x16xf32>
    %cst_47 = arith.constant 1.000000e+00 : f32
    %94 = vector.broadcast %cst_47 : f32 to vector<8x16xf32>
    %95 = arith.addf %94, %93 : vector<8x16xf32>
    %96 = arith.divf %94, %95 : vector<8x16xf32>
    %97 = vector.extract_strided_slice %71 {offsets = [2, 0, 0], sizes = [1, 8, 16], strides = [1, 1, 1]} : vector<3x8x16xf32> to vector<1x8x16xf32>
    %98 = vector.shape_cast %97 : vector<1x8x16xf32> to vector<8x16xf32>
    %99 = arith.mulf %88, %80 : vector<8x16xf32>
    %100 = arith.addf %98, %99 : vector<8x16xf32>
    %101 = math.tanh %100 : vector<8x16xf32>
    %cst_48 = arith.constant 1.000000e+00 : f32
    %102 = vector.broadcast %cst_48 : f32 to vector<8x16xf32>
    %103 = arith.subf %102, %96 : vector<8x16xf32>
    %104 = arith.mulf %103, %101 : vector<8x16xf32>
    %105 = arith.mulf %96, %59 : vector<8x16xf32>
    %106 = arith.addf %104, %105 : vector<8x16xf32>
    %107 = vector.shape_cast %106 : vector<8x16xf32> to vector<8x1x16xf32>
    %c0_49 = arith.constant 0 : index
    %c0_50 = arith.constant 0 : index
    %108 = arith.index_cast %68 : i32 to index
    %c0_51 = arith.constant 0 : index
    %109 = vector.load %arg6[%c0_49, %c0_50, %108, %c0_51] : memref<1x8x8x16xf32, #tpu.memory_space<vmem>>, vector<1x8x1x16xf32>
    %110 = vector.shape_cast %109 : vector<1x8x1x16xf32> to vector<8x1x16xf32>
    %111 = vector.shape_cast %107 : vector<8x1x16xf32> to vector<1x8x1x16xf32>
    tpu.vector_store %arg6[%c0_49, %c0_50, %108, %c0_51], %111 {strides = array<i32>} : memref<1x8x8x16xf32, #tpu.memory_space<vmem>>, vector<1x8x1x16xf32>,
    %c2_i32_52 = arith.constant 2 : i32
    %c2_i32_53 = arith.constant 2 : i32
    %112 = arith.muli %c2_i32_53, %c2_i32_52 : i32
    %c7_i32_54 = arith.constant 7 : i32
    %113 = arith.subi %c7_i32_54, %112 : i32
    %114 = arith.muli %arg0, %113 : i32
    %115 = arith.addi %c2_i32_52, %114 : i32
    %c0_55 = arith.constant 0 : index
    %116 = arith.index_cast %115 : i32 to index
    %c0_56 = arith.constant 0 : index
    %c0_57 = arith.constant 0 : index
    %c0_58 = arith.constant 0 : index
    %117 = vector.load %arg3[%c0_55, %116, %c0_56, %c0_57, %c0_58] : memref<1x8x3x8x16xf32, #tpu.memory_space<vmem>>, vector<1x1x3x8x16xf32>
    %118 = vector.shape_cast %117 : vector<1x1x3x8x16xf32> to vector<3x8x16xf32>
    %cst_59 = arith.constant dense<0.000000e+00> : vector<8x16xf32>
    %119 = tpu.matmul %106, %4, %cst_59 {dimension_numbers = #tpu.dot_dimension_numbers<[1], [0], [0], [1], [0, 0, 1, 1], [], []>} : vector<8x16xf32>, vector<16x16xf32>, vector<8x16xf32> -> vector<8x16xf32>
    %120 = vector.broadcast %10 : vector<1x16xf32> to vector<8x16xf32>
    %121 = arith.addf %119, %120 : vector<8x16xf32>
    %cst_60 = arith.constant dense<0.000000e+00> : vector<8x16xf32>
    %122 = tpu.matmul %106, %6, %cst_60 {dimension_numbers = #tpu.dot_dimension_numbers<[1], [0], [0], [1], [0, 0, 1, 1], [], []>} : vector<8x16xf32>, vector<16x16xf32>, vector<8x16xf32> -> vector<8x16xf32>
    %123 = vector.broadcast %12 : vector<1x16xf32> to vector<8x16xf32>
    %124 = arith.addf %122, %123 : vector<8x16xf32>
    %cst_61 = arith.constant dense<0.000000e+00> : vector<8x16xf32>
    %125 = tpu.matmul %106, %8, %cst_61 {dimension_numbers = #tpu.dot_dimension_numbers<[1], [0], [0], [1], [0, 0, 1, 1], [], []>} : vector<8x16xf32>, vector<16x16xf32>, vector<8x16xf32> -> vector<8x16xf32>
    %126 = vector.broadcast %14 : vector<1x16xf32> to vector<8x16xf32>
    %127 = arith.addf %125, %126 : vector<8x16xf32>
    %128 = vector.extract_strided_slice %118 {offsets = [0, 0, 0], sizes = [1, 8, 16], strides = [1, 1, 1]} : vector<3x8x16xf32> to vector<1x8x16xf32>
    %129 = vector.shape_cast %128 : vector<1x8x16xf32> to vector<8x16xf32>
    %130 = arith.addf %129, %121 : vector<8x16xf32>
    %131 = arith.negf %130 : vector<8x16xf32>
    %132 = math.exp %131 : vector<8x16xf32>
    %cst_62 = arith.constant 1.000000e+00 : f32
    %133 = vector.broadcast %cst_62 : f32 to vector<8x16xf32>
    %134 = arith.addf %133, %132 : vector<8x16xf32>
    %135 = arith.divf %133, %134 : vector<8x16xf32>
    %136 = vector.extract_strided_slice %118 {offsets = [1, 0, 0], sizes = [1, 8, 16], strides = [1, 1, 1]} : vector<3x8x16xf32> to vector<1x8x16xf32>
    %137 = vector.shape_cast %136 : vector<1x8x16xf32> to vector<8x16xf32>
    %138 = arith.addf %137, %124 : vector<8x16xf32>
    %139 = arith.negf %138 : vector<8x16xf32>
    %140 = math.exp %139 : vector<8x16xf32>
    %cst_63 = arith.constant 1.000000e+00 : f32
    %141 = vector.broadcast %cst_63 : f32 to vector<8x16xf32>
    %142 = arith.addf %141, %140 : vector<8x16xf32>
    %143 = arith.divf %141, %142 : vector<8x16xf32>
    %144 = vector.extract_strided_slice %118 {offsets = [2, 0, 0], sizes = [1, 8, 16], strides = [1, 1, 1]} : vector<3x8x16xf32> to vector<1x8x16xf32>
    %145 = vector.shape_cast %144 : vector<1x8x16xf32> to vector<8x16xf32>
    %146 = arith.mulf %135, %127 : vector<8x16xf32>
    %147 = arith.addf %145, %146 : vector<8x16xf32>
    %148 = math.tanh %147 : vector<8x16xf32>
    %cst_64 = arith.constant 1.000000e+00 : f32
    %149 = vector.broadcast %cst_64 : f32 to vector<8x16xf32>
    %150 = arith.subf %149, %143 : vector<8x16xf32>
    %151 = arith.mulf %150, %148 : vector<8x16xf32>
    %152 = arith.mulf %143, %106 : vector<8x16xf32>
    %153 = arith.addf %151, %152 : vector<8x16xf32>
    %154 = vector.shape_cast %153 : vector<8x16xf32> to vector<8x1x16xf32>
    %c0_65 = arith.constant 0 : index
    %c0_66 = arith.constant 0 : index
    %155 = arith.index_cast %115 : i32 to index
    %c0_67 = arith.constant 0 : index
    %156 = vector.load %arg6[%c0_65, %c0_66, %155, %c0_67] : memref<1x8x8x16xf32, #tpu.memory_space<vmem>>, vector<1x8x1x16xf32>
    %157 = vector.shape_cast %156 : vector<1x8x1x16xf32> to vector<8x1x16xf32>
    %158 = vector.shape_cast %154 : vector<8x1x16xf32> to vector<1x8x1x16xf32>
    tpu.vector_store %arg6[%c0_65, %c0_66, %155, %c0_67], %158 {strides = array<i32>} : memref<1x8x8x16xf32, #tpu.memory_space<vmem>>, vector<1x8x1x16xf32>,
    %c3_i32 = arith.constant 3 : i32
    %c2_i32_68 = arith.constant 2 : i32
    %159 = arith.muli %c2_i32_68, %c3_i32 : i32
    %c7_i32_69 = arith.constant 7 : i32
    %160 = arith.subi %c7_i32_69, %159 : i32
    %161 = arith.muli %arg0, %160 : i32
    %162 = arith.addi %c3_i32, %161 : i32
    %c0_70 = arith.constant 0 : index
    %163 = arith.index_cast %162 : i32 to index
    %c0_71 = arith.constant 0 : index
    %c0_72 = arith.constant 0 : index
    %c0_73 = arith.constant 0 : index
    %164 = vector.load %arg3[%c0_70, %163, %c0_71, %c0_72, %c0_73] : memref<1x8x3x8x16xf32, #tpu.memory_space<vmem>>, vector<1x1x3x8x16xf32>
    %165 = vector.shape_cast %164 : vector<1x1x3x8x16xf32> to vector<3x8x16xf32>
    %cst_74 = arith.constant dense<0.000000e+00> : vector<8x16xf32>
    %166 = tpu.matmul %153, %4, %cst_74 {dimension_numbers = #tpu.dot_dimension_numbers<[1], [0], [0], [1], [0, 0, 1, 1], [], []>} : vector<8x16xf32>, vector<16x16xf32>, vector<8x16xf32> -> vector<8x16xf32>
    %167 = vector.broadcast %10 : vector<1x16xf32> to vector<8x16xf32>
    %168 = arith.addf %166, %167 : vector<8x16xf32>
    %cst_75 = arith.constant dense<0.000000e+00> : vector<8x16xf32>
    %169 = tpu.matmul %153, %6, %cst_75 {dimension_numbers = #tpu.dot_dimension_numbers<[1], [0], [0], [1], [0, 0, 1, 1], [], []>} : vector<8x16xf32>, vector<16x16xf32>, vector<8x16xf32> -> vector<8x16xf32>
    %170 = vector.broadcast %12 : vector<1x16xf32> to vector<8x16xf32>
    %171 = arith.addf %169, %170 : vector<8x16xf32>
    %cst_76 = arith.constant dense<0.000000e+00> : vector<8x16xf32>
    %172 = tpu.matmul %153, %8, %cst_76 {dimension_numbers = #tpu.dot_dimension_numbers<[1], [0], [0], [1], [0, 0, 1, 1], [], []>} : vector<8x16xf32>, vector<16x16xf32>, vector<8x16xf32> -> vector<8x16xf32>
    %173 = vector.broadcast %14 : vector<1x16xf32> to vector<8x16xf32>
    %174 = arith.addf %172, %173 : vector<8x16xf32>
    %175 = vector.extract_strided_slice %165 {offsets = [0, 0, 0], sizes = [1, 8, 16], strides = [1, 1, 1]} : vector<3x8x16xf32> to vector<1x8x16xf32>
    %176 = vector.shape_cast %175 : vector<1x8x16xf32> to vector<8x16xf32>
    %177 = arith.addf %176, %168 : vector<8x16xf32>
    %178 = arith.negf %177 : vector<8x16xf32>
    %179 = math.exp %178 : vector<8x16xf32>
    %cst_77 = arith.constant 1.000000e+00 : f32
    %180 = vector.broadcast %cst_77 : f32 to vector<8x16xf32>
    %181 = arith.addf %180, %179 : vector<8x16xf32>
    %182 = arith.divf %180, %181 : vector<8x16xf32>
    %183 = vector.extract_strided_slice %165 {offsets = [1, 0, 0], sizes = [1, 8, 16], strides = [1, 1, 1]} : vector<3x8x16xf32> to vector<1x8x16xf32>
    %184 = vector.shape_cast %183 : vector<1x8x16xf32> to vector<8x16xf32>
    %185 = arith.addf %184, %171 : vector<8x16xf32>
    %186 = arith.negf %185 : vector<8x16xf32>
    %187 = math.exp %186 : vector<8x16xf32>
    %cst_78 = arith.constant 1.000000e+00 : f32
    %188 = vector.broadcast %cst_78 : f32 to vector<8x16xf32>
    %189 = arith.addf %188, %187 : vector<8x16xf32>
    %190 = arith.divf %188, %189 : vector<8x16xf32>
    %191 = vector.extract_strided_slice %165 {offsets = [2, 0, 0], sizes = [1, 8, 16], strides = [1, 1, 1]} : vector<3x8x16xf32> to vector<1x8x16xf32>
    %192 = vector.shape_cast %191 : vector<1x8x16xf32> to vector<8x16xf32>
    %193 = arith.mulf %182, %174 : vector<8x16xf32>
    %194 = arith.addf %192, %193 : vector<8x16xf32>
    %195 = math.tanh %194 : vector<8x16xf32>
    %cst_79 = arith.constant 1.000000e+00 : f32
    %196 = vector.broadcast %cst_79 : f32 to vector<8x16xf32>
    %197 = arith.subf %196, %190 : vector<8x16xf32>
    %198 = arith.mulf %197, %195 : vector<8x16xf32>
    %199 = arith.mulf %190, %153 : vector<8x16xf32>
    %200 = arith.addf %198, %199 : vector<8x16xf32>
    %201 = vector.shape_cast %200 : vector<8x16xf32> to vector<8x1x16xf32>
    %c0_80 = arith.constant 0 : index
    %c0_81 = arith.constant 0 : index
    %202 = arith.index_cast %162 : i32 to index
    %c0_82 = arith.constant 0 : index
    %203 = vector.load %arg6[%c0_80, %c0_81, %202, %c0_82] : memref<1x8x8x16xf32, #tpu.memory_space<vmem>>, vector<1x8x1x16xf32>
    %204 = vector.shape_cast %203 : vector<1x8x1x16xf32> to vector<8x1x16xf32>
    %205 = vector.shape_cast %201 : vector<8x1x16xf32> to vector<1x8x1x16xf32>
    tpu.vector_store %arg6[%c0_80, %c0_81, %202, %c0_82], %205 {strides = array<i32>} : memref<1x8x8x16xf32, #tpu.memory_space<vmem>>, vector<1x8x1x16xf32>,
    %c4_i32 = arith.constant 4 : i32
    %c2_i32_83 = arith.constant 2 : i32
    %206 = arith.muli %c2_i32_83, %c4_i32 : i32
    %c7_i32_84 = arith.constant 7 : i32
    %207 = arith.subi %c7_i32_84, %206 : i32
    %208 = arith.muli %arg0, %207 : i32
    %209 = arith.addi %c4_i32, %208 : i32
    %c0_85 = arith.constant 0 : index
    %210 = arith.index_cast %209 : i32 to index
    %c0_86 = arith.constant 0 : index
    %c0_87 = arith.constant 0 : index
    %c0_88 = arith.constant 0 : index
    %211 = vector.load %arg3[%c0_85, %210, %c0_86, %c0_87, %c0_88] : memref<1x8x3x8x16xf32, #tpu.memory_space<vmem>>, vector<1x1x3x8x16xf32>
    %212 = vector.shape_cast %211 : vector<1x1x3x8x16xf32> to vector<3x8x16xf32>
    %cst_89 = arith.constant dense<0.000000e+00> : vector<8x16xf32>
    %213 = tpu.matmul %200, %4, %cst_89 {dimension_numbers = #tpu.dot_dimension_numbers<[1], [0], [0], [1], [0, 0, 1, 1], [], []>} : vector<8x16xf32>, vector<16x16xf32>, vector<8x16xf32> -> vector<8x16xf32>
    %214 = vector.broadcast %10 : vector<1x16xf32> to vector<8x16xf32>
    %215 = arith.addf %213, %214 : vector<8x16xf32>
    %cst_90 = arith.constant dense<0.000000e+00> : vector<8x16xf32>
    %216 = tpu.matmul %200, %6, %cst_90 {dimension_numbers = #tpu.dot_dimension_numbers<[1], [0], [0], [1], [0, 0, 1, 1], [], []>} : vector<8x16xf32>, vector<16x16xf32>, vector<8x16xf32> -> vector<8x16xf32>
    %217 = vector.broadcast %12 : vector<1x16xf32> to vector<8x16xf32>
    %218 = arith.addf %216, %217 : vector<8x16xf32>
    %cst_91 = arith.constant dense<0.000000e+00> : vector<8x16xf32>
    %219 = tpu.matmul %200, %8, %cst_91 {dimension_numbers = #tpu.dot_dimension_numbers<[1], [0], [0], [1], [0, 0, 1, 1], [], []>} : vector<8x16xf32>, vector<16x16xf32>, vector<8x16xf32> -> vector<8x16xf32>
    %220 = vector.broadcast %14 : vector<1x16xf32> to vector<8x16xf32>
    %221 = arith.addf %219, %220 : vector<8x16xf32>
    %222 = vector.extract_strided_slice %212 {offsets = [0, 0, 0], sizes = [1, 8, 16], strides = [1, 1, 1]} : vector<3x8x16xf32> to vector<1x8x16xf32>
    %223 = vector.shape_cast %222 : vector<1x8x16xf32> to vector<8x16xf32>
    %224 = arith.addf %223, %215 : vector<8x16xf32>
    %225 = arith.negf %224 : vector<8x16xf32>
    %226 = math.exp %225 : vector<8x16xf32>
    %cst_92 = arith.constant 1.000000e+00 : f32
    %227 = vector.broadcast %cst_92 : f32 to vector<8x16xf32>
    %228 = arith.addf %227, %226 : vector<8x16xf32>
    %229 = arith.divf %227, %228 : vector<8x16xf32>
    %230 = vector.extract_strided_slice %212 {offsets = [1, 0, 0], sizes = [1, 8, 16], strides = [1, 1, 1]} : vector<3x8x16xf32> to vector<1x8x16xf32>
    %231 = vector.shape_cast %230 : vector<1x8x16xf32> to vector<8x16xf32>
    %232 = arith.addf %231, %218 : vector<8x16xf32>
    %233 = arith.negf %232 : vector<8x16xf32>
    %234 = math.exp %233 : vector<8x16xf32>
    %cst_93 = arith.constant 1.000000e+00 : f32
    %235 = vector.broadcast %cst_93 : f32 to vector<8x16xf32>
    %236 = arith.addf %235, %234 : vector<8x16xf32>
    %237 = arith.divf %235, %236 : vector<8x16xf32>
    %238 = vector.extract_strided_slice %212 {offsets = [2, 0, 0], sizes = [1, 8, 16], strides = [1, 1, 1]} : vector<3x8x16xf32> to vector<1x8x16xf32>
    %239 = vector.shape_cast %238 : vector<1x8x16xf32> to vector<8x16xf32>
    %240 = arith.mulf %229, %221 : vector<8x16xf32>
    %241 = arith.addf %239, %240 : vector<8x16xf32>
    %242 = math.tanh %241 : vector<8x16xf32>
    %cst_94 = arith.constant 1.000000e+00 : f32
    %243 = vector.broadcast %cst_94 : f32 to vector<8x16xf32>
    %244 = arith.subf %243, %237 : vector<8x16xf32>
    %245 = arith.mulf %244, %242 : vector<8x16xf32>
    %246 = arith.mulf %237, %200 : vector<8x16xf32>
    %247 = arith.addf %245, %246 : vector<8x16xf32>
    %248 = vector.shape_cast %247 : vector<8x16xf32> to vector<8x1x16xf32>
    %c0_95 = arith.constant 0 : index
    %c0_96 = arith.constant 0 : index
    %249 = arith.index_cast %209 : i32 to index
    %c0_97 = arith.constant 0 : index
    %250 = vector.load %arg6[%c0_95, %c0_96, %249, %c0_97] : memref<1x8x8x16xf32, #tpu.memory_space<vmem>>, vector<1x8x1x16xf32>
    %251 = vector.shape_cast %250 : vector<1x8x1x16xf32> to vector<8x1x16xf32>
    %252 = vector.shape_cast %248 : vector<8x1x16xf32> to vector<1x8x1x16xf32>
    tpu.vector_store %arg6[%c0_95, %c0_96, %249, %c0_97], %252 {strides = array<i32>} : memref<1x8x8x16xf32, #tpu.memory_space<vmem>>, vector<1x8x1x16xf32>,
    %c5_i32 = arith.constant 5 : i32
    %c2_i32_98 = arith.constant 2 : i32
    %253 = arith.muli %c2_i32_98, %c5_i32 : i32
    %c7_i32_99 = arith.constant 7 : i32
    %254 = arith.subi %c7_i32_99, %253 : i32
    %255 = arith.muli %arg0, %254 : i32
    %256 = arith.addi %c5_i32, %255 : i32
    %c0_100 = arith.constant 0 : index
    %257 = arith.index_cast %256 : i32 to index
    %c0_101 = arith.constant 0 : index
    %c0_102 = arith.constant 0 : index
    %c0_103 = arith.constant 0 : index
    %258 = vector.load %arg3[%c0_100, %257, %c0_101, %c0_102, %c0_103] : memref<1x8x3x8x16xf32, #tpu.memory_space<vmem>>, vector<1x1x3x8x16xf32>
    %259 = vector.shape_cast %258 : vector<1x1x3x8x16xf32> to vector<3x8x16xf32>
    %cst_104 = arith.constant dense<0.000000e+00> : vector<8x16xf32>
    %260 = tpu.matmul %247, %4, %cst_104 {dimension_numbers = #tpu.dot_dimension_numbers<[1], [0], [0], [1], [0, 0, 1, 1], [], []>} : vector<8x16xf32>, vector<16x16xf32>, vector<8x16xf32> -> vector<8x16xf32>
    %261 = vector.broadcast %10 : vector<1x16xf32> to vector<8x16xf32>
    %262 = arith.addf %260, %261 : vector<8x16xf32>
    %cst_105 = arith.constant dense<0.000000e+00> : vector<8x16xf32>
    %263 = tpu.matmul %247, %6, %cst_105 {dimension_numbers = #tpu.dot_dimension_numbers<[1], [0], [0], [1], [0, 0, 1, 1], [], []>} : vector<8x16xf32>, vector<16x16xf32>, vector<8x16xf32> -> vector<8x16xf32>
    %264 = vector.broadcast %12 : vector<1x16xf32> to vector<8x16xf32>
    %265 = arith.addf %263, %264 : vector<8x16xf32>
    %cst_106 = arith.constant dense<0.000000e+00> : vector<8x16xf32>
    %266 = tpu.matmul %247, %8, %cst_106 {dimension_numbers = #tpu.dot_dimension_numbers<[1], [0], [0], [1], [0, 0, 1, 1], [], []>} : vector<8x16xf32>, vector<16x16xf32>, vector<8x16xf32> -> vector<8x16xf32>
    %267 = vector.broadcast %14 : vector<1x16xf32> to vector<8x16xf32>
    %268 = arith.addf %266, %267 : vector<8x16xf32>
    %269 = vector.extract_strided_slice %259 {offsets = [0, 0, 0], sizes = [1, 8, 16], strides = [1, 1, 1]} : vector<3x8x16xf32> to vector<1x8x16xf32>
    %270 = vector.shape_cast %269 : vector<1x8x16xf32> to vector<8x16xf32>
    %271 = arith.addf %270, %262 : vector<8x16xf32>
    %272 = arith.negf %271 : vector<8x16xf32>
    %273 = math.exp %272 : vector<8x16xf32>
    %cst_107 = arith.constant 1.000000e+00 : f32
    %274 = vector.broadcast %cst_107 : f32 to vector<8x16xf32>
    %275 = arith.addf %274, %273 : vector<8x16xf32>
    %276 = arith.divf %274, %275 : vector<8x16xf32>
    %277 = vector.extract_strided_slice %259 {offsets = [1, 0, 0], sizes = [1, 8, 16], strides = [1, 1, 1]} : vector<3x8x16xf32> to vector<1x8x16xf32>
    %278 = vector.shape_cast %277 : vector<1x8x16xf32> to vector<8x16xf32>
    %279 = arith.addf %278, %265 : vector<8x16xf32>
    %280 = arith.negf %279 : vector<8x16xf32>
    %281 = math.exp %280 : vector<8x16xf32>
    %cst_108 = arith.constant 1.000000e+00 : f32
    %282 = vector.broadcast %cst_108 : f32 to vector<8x16xf32>
    %283 = arith.addf %282, %281 : vector<8x16xf32>
    %284 = arith.divf %282, %283 : vector<8x16xf32>
    %285 = vector.extract_strided_slice %259 {offsets = [2, 0, 0], sizes = [1, 8, 16], strides = [1, 1, 1]} : vector<3x8x16xf32> to vector<1x8x16xf32>
    %286 = vector.shape_cast %285 : vector<1x8x16xf32> to vector<8x16xf32>
    %287 = arith.mulf %276, %268 : vector<8x16xf32>
    %288 = arith.addf %286, %287 : vector<8x16xf32>
    %289 = math.tanh %288 : vector<8x16xf32>
    %cst_109 = arith.constant 1.000000e+00 : f32
    %290 = vector.broadcast %cst_109 : f32 to vector<8x16xf32>
    %291 = arith.subf %290, %284 : vector<8x16xf32>
    %292 = arith.mulf %291, %289 : vector<8x16xf32>
    %293 = arith.mulf %284, %247 : vector<8x16xf32>
    %294 = arith.addf %292, %293 : vector<8x16xf32>
    %295 = vector.shape_cast %294 : vector<8x16xf32> to vector<8x1x16xf32>
    %c0_110 = arith.constant 0 : index
    %c0_111 = arith.constant 0 : index
    %296 = arith.index_cast %256 : i32 to index
    %c0_112 = arith.constant 0 : index
    %297 = vector.load %arg6[%c0_110, %c0_111, %296, %c0_112] : memref<1x8x8x16xf32, #tpu.memory_space<vmem>>, vector<1x8x1x16xf32>
    %298 = vector.shape_cast %297 : vector<1x8x1x16xf32> to vector<8x1x16xf32>
    %299 = vector.shape_cast %295 : vector<8x1x16xf32> to vector<1x8x1x16xf32>
    tpu.vector_store %arg6[%c0_110, %c0_111, %296, %c0_112], %299 {strides = array<i32>} : memref<1x8x8x16xf32, #tpu.memory_space<vmem>>, vector<1x8x1x16xf32>,
    %c6_i32 = arith.constant 6 : i32
    %c2_i32_113 = arith.constant 2 : i32
    %300 = arith.muli %c2_i32_113, %c6_i32 : i32
    %c7_i32_114 = arith.constant 7 : i32
    %301 = arith.subi %c7_i32_114, %300 : i32
    %302 = arith.muli %arg0, %301 : i32
    %303 = arith.addi %c6_i32, %302 : i32
    %c0_115 = arith.constant 0 : index
    %304 = arith.index_cast %303 : i32 to index
    %c0_116 = arith.constant 0 : index
    %c0_117 = arith.constant 0 : index
    %c0_118 = arith.constant 0 : index
    %305 = vector.load %arg3[%c0_115, %304, %c0_116, %c0_117, %c0_118] : memref<1x8x3x8x16xf32, #tpu.memory_space<vmem>>, vector<1x1x3x8x16xf32>
    %306 = vector.shape_cast %305 : vector<1x1x3x8x16xf32> to vector<3x8x16xf32>
    %cst_119 = arith.constant dense<0.000000e+00> : vector<8x16xf32>
    %307 = tpu.matmul %294, %4, %cst_119 {dimension_numbers = #tpu.dot_dimension_numbers<[1], [0], [0], [1], [0, 0, 1, 1], [], []>} : vector<8x16xf32>, vector<16x16xf32>, vector<8x16xf32> -> vector<8x16xf32>
    %308 = vector.broadcast %10 : vector<1x16xf32> to vector<8x16xf32>
    %309 = arith.addf %307, %308 : vector<8x16xf32>
    %cst_120 = arith.constant dense<0.000000e+00> : vector<8x16xf32>
    %310 = tpu.matmul %294, %6, %cst_120 {dimension_numbers = #tpu.dot_dimension_numbers<[1], [0], [0], [1], [0, 0, 1, 1], [], []>} : vector<8x16xf32>, vector<16x16xf32>, vector<8x16xf32> -> vector<8x16xf32>
    %311 = vector.broadcast %12 : vector<1x16xf32> to vector<8x16xf32>
    %312 = arith.addf %310, %311 : vector<8x16xf32>
    %cst_121 = arith.constant dense<0.000000e+00> : vector<8x16xf32>
    %313 = tpu.matmul %294, %8, %cst_121 {dimension_numbers = #tpu.dot_dimension_numbers<[1], [0], [0], [1], [0, 0, 1, 1], [], []>} : vector<8x16xf32>, vector<16x16xf32>, vector<8x16xf32> -> vector<8x16xf32>
    %314 = vector.broadcast %14 : vector<1x16xf32> to vector<8x16xf32>
    %315 = arith.addf %313, %314 : vector<8x16xf32>
    %316 = vector.extract_strided_slice %306 {offsets = [0, 0, 0], sizes = [1, 8, 16], strides = [1, 1, 1]} : vector<3x8x16xf32> to vector<1x8x16xf32>
    %317 = vector.shape_cast %316 : vector<1x8x16xf32> to vector<8x16xf32>
    %318 = arith.addf %317, %309 : vector<8x16xf32>
    %319 = arith.negf %318 : vector<8x16xf32>
    %320 = math.exp %319 : vector<8x16xf32>
    %cst_122 = arith.constant 1.000000e+00 : f32
    %321 = vector.broadcast %cst_122 : f32 to vector<8x16xf32>
    %322 = arith.addf %321, %320 : vector<8x16xf32>
    %323 = arith.divf %321, %322 : vector<8x16xf32>
    %324 = vector.extract_strided_slice %306 {offsets = [1, 0, 0], sizes = [1, 8, 16], strides = [1, 1, 1]} : vector<3x8x16xf32> to vector<1x8x16xf32>
    %325 = vector.shape_cast %324 : vector<1x8x16xf32> to vector<8x16xf32>
    %326 = arith.addf %325, %312 : vector<8x16xf32>
    %327 = arith.negf %326 : vector<8x16xf32>
    %328 = math.exp %327 : vector<8x16xf32>
    %cst_123 = arith.constant 1.000000e+00 : f32
    %329 = vector.broadcast %cst_123 : f32 to vector<8x16xf32>
    %330 = arith.addf %329, %328 : vector<8x16xf32>
    %331 = arith.divf %329, %330 : vector<8x16xf32>
    %332 = vector.extract_strided_slice %306 {offsets = [2, 0, 0], sizes = [1, 8, 16], strides = [1, 1, 1]} : vector<3x8x16xf32> to vector<1x8x16xf32>
    %333 = vector.shape_cast %332 : vector<1x8x16xf32> to vector<8x16xf32>
    %334 = arith.mulf %323, %315 : vector<8x16xf32>
    %335 = arith.addf %333, %334 : vector<8x16xf32>
    %336 = math.tanh %335 : vector<8x16xf32>
    %cst_124 = arith.constant 1.000000e+00 : f32
    %337 = vector.broadcast %cst_124 : f32 to vector<8x16xf32>
    %338 = arith.subf %337, %331 : vector<8x16xf32>
    %339 = arith.mulf %338, %336 : vector<8x16xf32>
    %340 = arith.mulf %331, %294 : vector<8x16xf32>
    %341 = arith.addf %339, %340 : vector<8x16xf32>
    %342 = vector.shape_cast %341 : vector<8x16xf32> to vector<8x1x16xf32>
    %c0_125 = arith.constant 0 : index
    %c0_126 = arith.constant 0 : index
    %343 = arith.index_cast %303 : i32 to index
    %c0_127 = arith.constant 0 : index
    %344 = vector.load %arg6[%c0_125, %c0_126, %343, %c0_127] : memref<1x8x8x16xf32, #tpu.memory_space<vmem>>, vector<1x8x1x16xf32>
    %345 = vector.shape_cast %344 : vector<1x8x1x16xf32> to vector<8x1x16xf32>
    %346 = vector.shape_cast %342 : vector<8x1x16xf32> to vector<1x8x1x16xf32>
    tpu.vector_store %arg6[%c0_125, %c0_126, %343, %c0_127], %346 {strides = array<i32>} : memref<1x8x8x16xf32, #tpu.memory_space<vmem>>, vector<1x8x1x16xf32>,
    %c7_i32_128 = arith.constant 7 : i32
    %c2_i32_129 = arith.constant 2 : i32
    %347 = arith.muli %c2_i32_129, %c7_i32_128 : i32
    %c7_i32_130 = arith.constant 7 : i32
    %348 = arith.subi %c7_i32_130, %347 : i32
    %349 = arith.muli %arg0, %348 : i32
    %350 = arith.addi %c7_i32_128, %349 : i32
    %c0_131 = arith.constant 0 : index
    %351 = arith.index_cast %350 : i32 to index
    %c0_132 = arith.constant 0 : index
    %c0_133 = arith.constant 0 : index
    %c0_134 = arith.constant 0 : index
    %352 = vector.load %arg3[%c0_131, %351, %c0_132, %c0_133, %c0_134] : memref<1x8x3x8x16xf32, #tpu.memory_space<vmem>>, vector<1x1x3x8x16xf32>
    %353 = vector.shape_cast %352 : vector<1x1x3x8x16xf32> to vector<3x8x16xf32>
    %cst_135 = arith.constant dense<0.000000e+00> : vector<8x16xf32>
    %354 = tpu.matmul %341, %4, %cst_135 {dimension_numbers = #tpu.dot_dimension_numbers<[1], [0], [0], [1], [0, 0, 1, 1], [], []>} : vector<8x16xf32>, vector<16x16xf32>, vector<8x16xf32> -> vector<8x16xf32>
    %355 = vector.broadcast %10 : vector<1x16xf32> to vector<8x16xf32>
    %356 = arith.addf %354, %355 : vector<8x16xf32>
    %cst_136 = arith.constant dense<0.000000e+00> : vector<8x16xf32>
    %357 = tpu.matmul %341, %6, %cst_136 {dimension_numbers = #tpu.dot_dimension_numbers<[1], [0], [0], [1], [0, 0, 1, 1], [], []>} : vector<8x16xf32>, vector<16x16xf32>, vector<8x16xf32> -> vector<8x16xf32>
    %358 = vector.broadcast %12 : vector<1x16xf32> to vector<8x16xf32>
    %359 = arith.addf %357, %358 : vector<8x16xf32>
    %cst_137 = arith.constant dense<0.000000e+00> : vector<8x16xf32>
    %360 = tpu.matmul %341, %8, %cst_137 {dimension_numbers = #tpu.dot_dimension_numbers<[1], [0], [0], [1], [0, 0, 1, 1], [], []>} : vector<8x16xf32>, vector<16x16xf32>, vector<8x16xf32> -> vector<8x16xf32>
    %361 = vector.broadcast %14 : vector<1x16xf32> to vector<8x16xf32>
    %362 = arith.addf %360, %361 : vector<8x16xf32>
    %363 = vector.extract_strided_slice %353 {offsets = [0, 0, 0], sizes = [1, 8, 16], strides = [1, 1, 1]} : vector<3x8x16xf32> to vector<1x8x16xf32>
    %364 = vector.shape_cast %363 : vector<1x8x16xf32> to vector<8x16xf32>
    %365 = arith.addf %364, %356 : vector<8x16xf32>
    %366 = arith.negf %365 : vector<8x16xf32>
    %367 = math.exp %366 : vector<8x16xf32>
    %cst_138 = arith.constant 1.000000e+00 : f32
    %368 = vector.broadcast %cst_138 : f32 to vector<8x16xf32>
    %369 = arith.addf %368, %367 : vector<8x16xf32>
    %370 = arith.divf %368, %369 : vector<8x16xf32>
    %371 = vector.extract_strided_slice %353 {offsets = [1, 0, 0], sizes = [1, 8, 16], strides = [1, 1, 1]} : vector<3x8x16xf32> to vector<1x8x16xf32>
    %372 = vector.shape_cast %371 : vector<1x8x16xf32> to vector<8x16xf32>
    %373 = arith.addf %372, %359 : vector<8x16xf32>
    %374 = arith.negf %373 : vector<8x16xf32>
    %375 = math.exp %374 : vector<8x16xf32>
    %cst_139 = arith.constant 1.000000e+00 : f32
    %376 = vector.broadcast %cst_139 : f32 to vector<8x16xf32>
    %377 = arith.addf %376, %375 : vector<8x16xf32>
    %378 = arith.divf %376, %377 : vector<8x16xf32>
    %379 = vector.extract_strided_slice %353 {offsets = [2, 0, 0], sizes = [1, 8, 16], strides = [1, 1, 1]} : vector<3x8x16xf32> to vector<1x8x16xf32>
    %380 = vector.shape_cast %379 : vector<1x8x16xf32> to vector<8x16xf32>
    %381 = arith.mulf %370, %362 : vector<8x16xf32>
    %382 = arith.addf %380, %381 : vector<8x16xf32>
    %383 = math.tanh %382 : vector<8x16xf32>
    %cst_140 = arith.constant 1.000000e+00 : f32
    %384 = vector.broadcast %cst_140 : f32 to vector<8x16xf32>
    %385 = arith.subf %384, %378 : vector<8x16xf32>
    %386 = arith.mulf %385, %383 : vector<8x16xf32>
    %387 = arith.mulf %378, %341 : vector<8x16xf32>
    %388 = arith.addf %386, %387 : vector<8x16xf32>
    %389 = vector.shape_cast %388 : vector<8x16xf32> to vector<8x1x16xf32>
    %c0_141 = arith.constant 0 : index
    %c0_142 = arith.constant 0 : index
    %390 = arith.index_cast %350 : i32 to index
    %c0_143 = arith.constant 0 : index
    %391 = vector.load %arg6[%c0_141, %c0_142, %390, %c0_143] : memref<1x8x8x16xf32, #tpu.memory_space<vmem>>, vector<1x8x1x16xf32>
    %392 = vector.shape_cast %391 : vector<1x8x1x16xf32> to vector<8x1x16xf32>
    %393 = vector.shape_cast %389 : vector<8x1x16xf32> to vector<1x8x1x16xf32>
    tpu.vector_store %arg6[%c0_141, %c0_142, %390, %c0_143], %393 {strides = array<i32>} : memref<1x8x8x16xf32, #tpu.memory_space<vmem>>, vector<1x8x1x16xf32>,
    %c8_i32 = arith.constant 8 : i32
    %394 = arith.index_cast %arg0 : i32 to index
    %c0_144 = arith.constant 0 : index
    %c0_145 = arith.constant 0 : index
    %395 = vector.load %arg7[%394, %c0_144, %c0_145] : memref<2x8x16xf32, #tpu.memory_space<vmem>>, vector<1x8x16xf32>
    %396 = vector.shape_cast %395 : vector<1x8x16xf32> to vector<8x16xf32>
    %397 = vector.shape_cast %388 : vector<8x16xf32> to vector<1x8x16xf32>
    tpu.vector_store %arg7[%394, %c0_144, %c0_145], %397 {strides = array<i32>} : memref<2x8x16xf32, #tpu.memory_space<vmem>>, vector<1x8x16xf32>,
    return
  }
  func.func @transform_0(%arg0: i32, %arg1: i32, %arg2: i32) -> (i32, i32, i32, i32, i32) {
    %c2_i32 = arith.constant 2 : i32
    %0 = arith.muli %c2_i32, %arg2 : i32
    %c0_i32 = arith.constant 0 : i32
    %1 = arith.subi %c0_i32, %0 : i32
    %2 = arith.muli %arg0, %1 : i32
    %3 = arith.addi %arg2, %2 : i32
    %c0_i32_0 = arith.constant 0 : i32
    %c0_i32_1 = arith.constant 0 : i32
    %c0_i32_2 = arith.constant 0 : i32
    return %arg0, %3, %c0_i32_0, %arg1, %c0_i32_1 : i32, i32, i32, i32, i32
  }
  func.func @transform_1(%arg0: i32, %arg1: i32, %arg2: i32) -> (i32, i32, i32, i32) {
    %c0_i32 = arith.constant 0 : i32
    %c0_i32_0 = arith.constant 0 : i32
    %c0_i32_1 = arith.constant 0 : i32
    %c0_i32_2 = arith.constant 0 : i32
    return %arg0, %c0_i32, %c0_i32_0, %c0_i32_1 : i32, i32, i32, i32
  }
  func.func @transform_2(%arg0: i32, %arg1: i32, %arg2: i32) -> (i32, i32, i32, i32) {
    %c0_i32 = arith.constant 0 : i32
    %c0_i32_0 = arith.constant 0 : i32
    %c0_i32_1 = arith.constant 0 : i32
    %c0_i32_2 = arith.constant 0 : i32
    return %arg0, %c0_i32, %c0_i32_0, %c0_i32_1 : i32, i32, i32, i32
  }
  func.func @transform_3(%arg0: i32, %arg1: i32, %arg2: i32) -> (i32, i32, i32, i32) {
    %c2_i32 = arith.constant 2 : i32
    %0 = arith.muli %c2_i32, %arg2 : i32
    %c0_i32 = arith.constant 0 : i32
    %1 = arith.subi %c0_i32, %0 : i32
    %2 = arith.muli %arg0, %1 : i32
    %3 = arith.addi %arg2, %2 : i32
    %c0_i32_0 = arith.constant 0 : i32
    %c0_i32_1 = arith.constant 0 : i32
    return %arg0, %arg1, %3, %c0_i32_0 : i32, i32, i32, i32
  }
}

module attributes {stable_mosaic.version = 11 : i64} {
  func.func @_word_attn_kernel(%arg0: i32, %arg1: memref<8x8x16xf32, #tpu.memory_space<vmem>>, %arg2: memref<8x8x16xf32, #tpu.memory_space<vmem>>, %arg3: memref<16x32xf32, #tpu.memory_space<vmem>>, %arg4: memref<16x32xf32, #tpu.memory_space<vmem>>, %arg5: memref<1x32xf32, #tpu.memory_space<vmem>>, %arg6: memref<1x32xf32, #tpu.memory_space<vmem>>, %arg7: memref<8x2x16xf32, #tpu.memory_space<vmem>>, %arg8: memref<8x8xf32, #tpu.memory_space<vmem>>) attributes {dimension_semantics = [#tpu.dimension_semantics<parallel>], iteration_bounds = array<i64: 1>, scalar_prefetch = 0 : i64, scratch_operands = 0 : i64, tpu.core_type = #tpu.core_type<tc>, window_params = [{transform_indices = @transform_0, window_bounds = array<i64: 8, 8, 16>}, {transform_indices = @transform_1, window_bounds = array<i64: 8, 8, 16>}, {pipeline_mode = #tpu.pipeline_mode<synchronous>, transform_indices = @transform_2, window_bounds = array<i64: 16, 32>}, {pipeline_mode = #tpu.pipeline_mode<synchronous>, transform_indices = @transform_3, window_bounds = array<i64: 16, 32>}, {pipeline_mode = #tpu.pipeline_mode<synchronous>, transform_indices = @transform_4, window_bounds = array<i64: 1, 32>}, {pipeline_mode = #tpu.pipeline_mode<synchronous>, transform_indices = @transform_5, window_bounds = array<i64: 1, 32>}, {transform_indices = @transform_6, window_bounds = array<i64: 8, 2, 16>}, {transform_indices = @transform_7, window_bounds = array<i64: 8, 8>}]} {
    %c0 = arith.constant 0 : index
    %c0_0 = arith.constant 0 : index
    %c0_1 = arith.constant 0 : index
    %0 = vector.load %arg1[%c0, %c0_0, %c0_1] : memref<8x8x16xf32, #tpu.memory_space<vmem>>, vector<8x8x16xf32>
    %c0_2 = arith.constant 0 : index
    %c0_3 = arith.constant 0 : index
    %c0_4 = arith.constant 0 : index
    %1 = vector.load %arg2[%c0_2, %c0_3, %c0_4] : memref<8x8x16xf32, #tpu.memory_space<vmem>>, vector<8x8x16xf32>
    %2 = vector.shape_cast %0 : vector<8x8x16xf32> to vector<64x16xf32>
    %c0_5 = arith.constant 0 : index
    %c0_6 = arith.constant 0 : index
    %3 = vector.load %arg3[%c0_5, %c0_6] : memref<16x32xf32, #tpu.memory_space<vmem>>, vector<16x32xf32>
    %cst = arith.constant dense<0.000000e+00> : vector<64x32xf32>
    %4 = tpu.matmul %2, %3, %cst {dimension_numbers = #tpu.dot_dimension_numbers<[1], [0], [0], [1], [0, 0, 1, 1], [], []>} : vector<64x16xf32>, vector<16x32xf32>, vector<64x32xf32> -> vector<64x32xf32>
    %5 = vector.shape_cast %1 : vector<8x8x16xf32> to vector<64x16xf32>
    %c0_7 = arith.constant 0 : index
    %c0_8 = arith.constant 0 : index
    %6 = vector.load %arg4[%c0_7, %c0_8] : memref<16x32xf32, #tpu.memory_space<vmem>>, vector<16x32xf32>
    %cst_9 = arith.constant dense<0.000000e+00> : vector<64x32xf32>
    %7 = tpu.matmul %5, %6, %cst_9 {dimension_numbers = #tpu.dot_dimension_numbers<[1], [0], [0], [1], [0, 0, 1, 1], [], []>} : vector<64x16xf32>, vector<16x32xf32>, vector<64x32xf32> -> vector<64x32xf32>
    %8 = arith.addf %4, %7 : vector<64x32xf32>
    %c0_10 = arith.constant 0 : index
    %c0_11 = arith.constant 0 : index
    %9 = vector.load %arg5[%c0_10, %c0_11] : memref<1x32xf32, #tpu.memory_space<vmem>>, vector<1x32xf32>
    %10 = vector.broadcast %9 : vector<1x32xf32> to vector<64x32xf32>
    %11 = arith.addf %8, %10 : vector<64x32xf32>
    %12 = math.tanh %11 : vector<64x32xf32>
    %13 = vector.shape_cast %12 : vector<64x32xf32> to vector<8x8x32xf32>
    %c0_12 = arith.constant 0 : index
    %c0_13 = arith.constant 0 : index
    %14 = vector.load %arg6[%c0_12, %c0_13] : memref<1x32xf32, #tpu.memory_space<vmem>>, vector<1x32xf32>
    %15 = vector.shape_cast %14 : vector<1x32xf32> to vector<1x1x32xf32>
    %16 = vector.broadcast %15 : vector<1x1x32xf32> to vector<8x8x32xf32>
    %17 = arith.mulf %13, %16 : vector<8x8x32xf32>
    %cst_14 = arith.constant dense<0.000000e+00> : vector<8x8xf32>
    %18 = vector.multi_reduction <add>, %17, %cst_14 [2] : vector<8x8x32xf32> to vector<8x8xf32>
    %cst_15 = arith.constant dense<0xFF800000> : vector<8xf32>
    %19 = vector.multi_reduction <maximumf>, %18, %cst_15 [1] : vector<8x8xf32> to vector<8xf32>
    %cst_16 = arith.constant 0xFF800000 : f32
    %20 = vector.broadcast %cst_16 : f32 to vector<8xf32>
    %21 = arith.maximumf %20, %19 : vector<8xf32>
    %22 = vector.shape_cast %21 : vector<8xf32> to vector<8x1xf32>
    %23 = vector.broadcast %22 : vector<8x1xf32> to vector<8x8xf32>
    %24 = arith.subf %18, %23 : vector<8x8xf32>
    %25 = math.exp %24 : vector<8x8xf32>
    %cst_17 = arith.constant dense<0.000000e+00> : vector<8xf32>
    %26 = vector.multi_reduction <add>, %25, %cst_17 [1] : vector<8x8xf32> to vector<8xf32>
    %27 = vector.shape_cast %26 : vector<8xf32> to vector<8x1xf32>
    %28 = vector.broadcast %27 : vector<8x1xf32> to vector<8x8xf32>
    %29 = arith.divf %25, %28 : vector<8x8xf32>
    %30 = vector.shape_cast %29 : vector<8x8xf32> to vector<8x8x1xf32>
    %31 = vector.broadcast %30 : vector<8x8x1xf32> to vector<8x8x16xf32>
    %32 = arith.mulf %31, %0 : vector<8x8x16xf32>
    %cst_18 = arith.constant dense<0.000000e+00> : vector<8x16xf32>
    %33 = vector.multi_reduction <add>, %32, %cst_18 [1] : vector<8x8x16xf32> to vector<8x16xf32>
    %c0_19 = arith.constant 0 : index
    %c0_20 = arith.constant 0 : index
    %c0_21 = arith.constant 0 : index
    %34 = vector.load %arg7[%c0_19, %c0_20, %c0_21] : memref<8x2x16xf32, #tpu.memory_space<vmem>>, vector<8x1x16xf32>
    %35 = vector.shape_cast %34 : vector<8x1x16xf32> to vector<8x16xf32>
    %36 = vector.shape_cast %33 : vector<8x16xf32> to vector<8x1x16xf32>
    tpu.vector_store %arg7[%c0_19, %c0_20, %c0_21], %36 {strides = array<i32>} : memref<8x2x16xf32, #tpu.memory_space<vmem>>, vector<8x1x16xf32>,
    %37 = vector.broadcast %30 : vector<8x8x1xf32> to vector<8x8x16xf32>
    %38 = arith.mulf %37, %1 : vector<8x8x16xf32>
    %cst_22 = arith.constant dense<0.000000e+00> : vector<8x16xf32>
    %39 = vector.multi_reduction <add>, %38, %cst_22 [1] : vector<8x8x16xf32> to vector<8x16xf32>
    %c0_23 = arith.constant 0 : index
    %c1 = arith.constant 1 : index
    %c0_24 = arith.constant 0 : index
    %40 = vector.load %arg7[%c0_23, %c1, %c0_24] : memref<8x2x16xf32, #tpu.memory_space<vmem>>, vector<8x1x16xf32>
    %41 = vector.shape_cast %40 : vector<8x1x16xf32> to vector<8x16xf32>
    %42 = vector.shape_cast %39 : vector<8x16xf32> to vector<8x1x16xf32>
    tpu.vector_store %arg7[%c0_23, %c1, %c0_24], %42 {strides = array<i32>} : memref<8x2x16xf32, #tpu.memory_space<vmem>>, vector<8x1x16xf32>,
    %c0_25 = arith.constant 0 : index
    %c0_26 = arith.constant 0 : index
    %43 = vector.load %arg8[%c0_25, %c0_26] : memref<8x8xf32, #tpu.memory_space<vmem>>, vector<8x8xf32>
    tpu.vector_store %arg8[%c0_25, %c0_26], %29 {strides = array<i32>} : memref<8x8xf32, #tpu.memory_space<vmem>>, vector<8x8xf32>,
    return
  }
  func.func @transform_0(%arg0: i32) -> (i32, i32, i32) {
    %c0_i32 = arith.constant 0 : i32
    %c0_i32_0 = arith.constant 0 : i32
    %c0_i32_1 = arith.constant 0 : i32
    return %arg0, %c0_i32, %c0_i32_0 : i32, i32, i32
  }
  func.func @transform_1(%arg0: i32) -> (i32, i32, i32) {
    %c0_i32 = arith.constant 0 : i32
    %c0_i32_0 = arith.constant 0 : i32
    %c0_i32_1 = arith.constant 0 : i32
    return %arg0, %c0_i32, %c0_i32_0 : i32, i32, i32
  }
  func.func @transform_2(%arg0: i32) -> (i32, i32) {
    %c0_i32 = arith.constant 0 : i32
    %c0_i32_0 = arith.constant 0 : i32
    %c0_i32_1 = arith.constant 0 : i32
    return %c0_i32, %c0_i32_0 : i32, i32
  }
  func.func @transform_3(%arg0: i32) -> (i32, i32) {
    %c0_i32 = arith.constant 0 : i32
    %c0_i32_0 = arith.constant 0 : i32
    %c0_i32_1 = arith.constant 0 : i32
    return %c0_i32, %c0_i32_0 : i32, i32
  }
  func.func @transform_4(%arg0: i32) -> (i32, i32) {
    %c0_i32 = arith.constant 0 : i32
    %c0_i32_0 = arith.constant 0 : i32
    %c0_i32_1 = arith.constant 0 : i32
    return %c0_i32, %c0_i32_0 : i32, i32
  }
  func.func @transform_5(%arg0: i32) -> (i32, i32) {
    %c0_i32 = arith.constant 0 : i32
    %c0_i32_0 = arith.constant 0 : i32
    %c0_i32_1 = arith.constant 0 : i32
    return %c0_i32, %c0_i32_0 : i32, i32
  }
  func.func @transform_6(%arg0: i32) -> (i32, i32, i32) {
    %c0_i32 = arith.constant 0 : i32
    %c0_i32_0 = arith.constant 0 : i32
    %c0_i32_1 = arith.constant 0 : i32
    return %arg0, %c0_i32, %c0_i32_0 : i32, i32, i32
  }
  func.func @transform_7(%arg0: i32) -> (i32, i32) {
    %c0_i32 = arith.constant 0 : i32
    %c0_i32_0 = arith.constant 0 : i32
    return %arg0, %c0_i32 : i32, i32
  }
}

module attributes {stable_mosaic.version = 11 : i64} {
  func.func @_bigru_chunk_kernel(%arg0: i32, %arg1: i32, %arg2: i32, %arg3: memref<1x4x3x8x16xf32, #tpu.memory_space<vmem>>, %arg4: memref<1x3x16x16xf32, #tpu.memory_space<vmem>>, %arg5: memref<1x3x1x16xf32, #tpu.memory_space<vmem>>, %arg6: memref<1x8x4x16xf32, #tpu.memory_space<vmem>>, %arg7: memref<2x8x16xf32, #tpu.memory_space<vmem>>) attributes {dimension_semantics = [#tpu.dimension_semantics<parallel>, #tpu.dimension_semantics<parallel>, #tpu.dimension_semantics<arbitrary>], iteration_bounds = array<i64: 2, 1, 1>, scalar_prefetch = 0 : i64, scratch_operands = 1 : i64, tpu.core_type = #tpu.core_type<tc>, window_params = [{transform_indices = @transform_0, window_bounds = array<i64: 1, 4, 3, 8, 16>}, {transform_indices = @transform_1, window_bounds = array<i64: 1, 3, 16, 16>}, {transform_indices = @transform_2, window_bounds = array<i64: 1, 3, 1, 16>}, {transform_indices = @transform_3, window_bounds = array<i64: 1, 8, 4, 16>}]} {
    %c0_i32 = arith.constant 0 : i32
    %0 = arith.cmpi eq, %arg2, %c0_i32 : i32
    %1 = arith.extui %0 : i1 to i32
    %c0_i32_0 = arith.constant 0 : i32
    %2 = arith.cmpi ne, %1, %c0_i32_0 : i32
    scf.if %2 {
      %cst_86 = arith.constant 0.000000e+00 : f32
      %210 = vector.broadcast %cst_86 : f32 to vector<8x16xf32>
      %211 = arith.index_cast %arg0 : i32 to index
      %c0_87 = arith.constant 0 : index
      %c0_88 = arith.constant 0 : index
      %212 = vector.load %arg7[%211, %c0_87, %c0_88] : memref<2x8x16xf32, #tpu.memory_space<vmem>>, vector<1x8x16xf32>
      %213 = vector.shape_cast %212 : vector<1x8x16xf32> to vector<8x16xf32>
      %214 = vector.shape_cast %210 : vector<8x16xf32> to vector<1x8x16xf32>
      tpu.vector_store %arg7[%211, %c0_87, %c0_88], %214 {strides = array<i32>} : memref<2x8x16xf32, #tpu.memory_space<vmem>>, vector<1x8x16xf32>,
    } else {
    }
    %c0 = arith.constant 0 : index
    %c0_1 = arith.constant 0 : index
    %c0_2 = arith.constant 0 : index
    %c0_3 = arith.constant 0 : index
    %3 = vector.load %arg4[%c0, %c0_1, %c0_2, %c0_3] : memref<1x3x16x16xf32, #tpu.memory_space<vmem>>, vector<1x1x16x16xf32>
    %4 = vector.shape_cast %3 : vector<1x1x16x16xf32> to vector<16x16xf32>
    %c0_4 = arith.constant 0 : index
    %c1 = arith.constant 1 : index
    %c0_5 = arith.constant 0 : index
    %c0_6 = arith.constant 0 : index
    %5 = vector.load %arg4[%c0_4, %c1, %c0_5, %c0_6] : memref<1x3x16x16xf32, #tpu.memory_space<vmem>>, vector<1x1x16x16xf32>
    %6 = vector.shape_cast %5 : vector<1x1x16x16xf32> to vector<16x16xf32>
    %c0_7 = arith.constant 0 : index
    %c2 = arith.constant 2 : index
    %c0_8 = arith.constant 0 : index
    %c0_9 = arith.constant 0 : index
    %7 = vector.load %arg4[%c0_7, %c2, %c0_8, %c0_9] : memref<1x3x16x16xf32, #tpu.memory_space<vmem>>, vector<1x1x16x16xf32>
    %8 = vector.shape_cast %7 : vector<1x1x16x16xf32> to vector<16x16xf32>
    %c0_10 = arith.constant 0 : index
    %c0_11 = arith.constant 0 : index
    %c0_12 = arith.constant 0 : index
    %c0_13 = arith.constant 0 : index
    %9 = vector.load %arg5[%c0_10, %c0_11, %c0_12, %c0_13] : memref<1x3x1x16xf32, #tpu.memory_space<vmem>>, vector<1x1x1x16xf32>
    %10 = vector.shape_cast %9 : vector<1x1x1x16xf32> to vector<1x16xf32>
    %c0_14 = arith.constant 0 : index
    %c1_15 = arith.constant 1 : index
    %c0_16 = arith.constant 0 : index
    %c0_17 = arith.constant 0 : index
    %11 = vector.load %arg5[%c0_14, %c1_15, %c0_16, %c0_17] : memref<1x3x1x16xf32, #tpu.memory_space<vmem>>, vector<1x1x1x16xf32>
    %12 = vector.shape_cast %11 : vector<1x1x1x16xf32> to vector<1x16xf32>
    %c0_18 = arith.constant 0 : index
    %c2_19 = arith.constant 2 : index
    %c0_20 = arith.constant 0 : index
    %c0_21 = arith.constant 0 : index
    %13 = vector.load %arg5[%c0_18, %c2_19, %c0_20, %c0_21] : memref<1x3x1x16xf32, #tpu.memory_space<vmem>>, vector<1x1x1x16xf32>
    %14 = vector.shape_cast %13 : vector<1x1x1x16xf32> to vector<1x16xf32>
    %15 = arith.index_cast %arg0 : i32 to index
    %c0_22 = arith.constant 0 : index
    %c0_23 = arith.constant 0 : index
    %16 = vector.load %arg7[%15, %c0_22, %c0_23] : memref<2x8x16xf32, #tpu.memory_space<vmem>>, vector<1x8x16xf32>
    %17 = vector.shape_cast %16 : vector<1x8x16xf32> to vector<8x16xf32>
    %c0_i32_24 = arith.constant 0 : i32
    %c2_i32 = arith.constant 2 : i32
    %18 = arith.muli %c2_i32, %c0_i32_24 : i32
    %c3_i32 = arith.constant 3 : i32
    %19 = arith.subi %c3_i32, %18 : i32
    %20 = arith.muli %arg0, %19 : i32
    %21 = arith.addi %c0_i32_24, %20 : i32
    %c0_25 = arith.constant 0 : index
    %22 = arith.index_cast %21 : i32 to index
    %c0_26 = arith.constant 0 : index
    %c0_27 = arith.constant 0 : index
    %c0_28 = arith.constant 0 : index
    %23 = vector.load %arg3[%c0_25, %22, %c0_26, %c0_27, %c0_28] : memref<1x4x3x8x16xf32, #tpu.memory_space<vmem>>, vector<1x1x3x8x16xf32>
    %24 = vector.shape_cast %23 : vector<1x1x3x8x16xf32> to vector<3x8x16xf32>
    %cst = arith.constant dense<0.000000e+00> : vector<8x16xf32>
    %25 = tpu.matmul %17, %4, %cst {dimension_numbers = #tpu.dot_dimension_numbers<[1], [0], [0], [1], [0, 0, 1, 1], [], []>} : vector<8x16xf32>, vector<16x16xf32>, vector<8x16xf32> -> vector<8x16xf32>
    %26 = vector.broadcast %10 : vector<1x16xf32> to vector<8x16xf32>
    %27 = arith.addf %25, %26 : vector<8x16xf32>
    %cst_29 = arith.constant dense<0.000000e+00> : vector<8x16xf32>
    %28 = tpu.matmul %17, %6, %cst_29 {dimension_numbers = #tpu.dot_dimension_numbers<[1], [0], [0], [1], [0, 0, 1, 1], [], []>} : vector<8x16xf32>, vector<16x16xf32>, vector<8x16xf32> -> vector<8x16xf32>
    %29 = vector.broadcast %12 : vector<1x16xf32> to vector<8x16xf32>
    %30 = arith.addf %28, %29 : vector<8x16xf32>
    %cst_30 = arith.constant dense<0.000000e+00> : vector<8x16xf32>
    %31 = tpu.matmul %17, %8, %cst_30 {dimension_numbers = #tpu.dot_dimension_numbers<[1], [0], [0], [1], [0, 0, 1, 1], [], []>} : vector<8x16xf32>, vector<16x16xf32>, vector<8x16xf32> -> vector<8x16xf32>
    %32 = vector.broadcast %14 : vector<1x16xf32> to vector<8x16xf32>
    %33 = arith.addf %31, %32 : vector<8x16xf32>
    %34 = vector.extract_strided_slice %24 {offsets = [0, 0, 0], sizes = [1, 8, 16], strides = [1, 1, 1]} : vector<3x8x16xf32> to vector<1x8x16xf32>
    %35 = vector.shape_cast %34 : vector<1x8x16xf32> to vector<8x16xf32>
    %36 = arith.addf %35, %27 : vector<8x16xf32>
    %37 = arith.negf %36 : vector<8x16xf32>
    %38 = math.exp %37 : vector<8x16xf32>
    %cst_31 = arith.constant 1.000000e+00 : f32
    %39 = vector.broadcast %cst_31 : f32 to vector<8x16xf32>
    %40 = arith.addf %39, %38 : vector<8x16xf32>
    %41 = arith.divf %39, %40 : vector<8x16xf32>
    %42 = vector.extract_strided_slice %24 {offsets = [1, 0, 0], sizes = [1, 8, 16], strides = [1, 1, 1]} : vector<3x8x16xf32> to vector<1x8x16xf32>
    %43 = vector.shape_cast %42 : vector<1x8x16xf32> to vector<8x16xf32>
    %44 = arith.addf %43, %30 : vector<8x16xf32>
    %45 = arith.negf %44 : vector<8x16xf32>
    %46 = math.exp %45 : vector<8x16xf32>
    %cst_32 = arith.constant 1.000000e+00 : f32
    %47 = vector.broadcast %cst_32 : f32 to vector<8x16xf32>
    %48 = arith.addf %47, %46 : vector<8x16xf32>
    %49 = arith.divf %47, %48 : vector<8x16xf32>
    %50 = vector.extract_strided_slice %24 {offsets = [2, 0, 0], sizes = [1, 8, 16], strides = [1, 1, 1]} : vector<3x8x16xf32> to vector<1x8x16xf32>
    %51 = vector.shape_cast %50 : vector<1x8x16xf32> to vector<8x16xf32>
    %52 = arith.mulf %41, %33 : vector<8x16xf32>
    %53 = arith.addf %51, %52 : vector<8x16xf32>
    %54 = math.tanh %53 : vector<8x16xf32>
    %cst_33 = arith.constant 1.000000e+00 : f32
    %55 = vector.broadcast %cst_33 : f32 to vector<8x16xf32>
    %56 = arith.subf %55, %49 : vector<8x16xf32>
    %57 = arith.mulf %56, %54 : vector<8x16xf32>
    %58 = arith.mulf %49, %17 : vector<8x16xf32>
    %59 = arith.addf %57, %58 : vector<8x16xf32>
    %60 = vector.shape_cast %59 : vector<8x16xf32> to vector<8x1x16xf32>
    %c0_34 = arith.constant 0 : index
    %c0_35 = arith.constant 0 : index
    %61 = arith.index_cast %21 : i32 to index
    %c0_36 = arith.constant 0 : index
    %62 = vector.load %arg6[%c0_34, %c0_35, %61, %c0_36] : memref<1x8x4x16xf32, #tpu.memory_space<vmem>>, vector<1x8x1x16xf32>
    %63 = vector.shape_cast %62 : vector<1x8x1x16xf32> to vector<8x1x16xf32>
    %64 = vector.shape_cast %60 : vector<8x1x16xf32> to vector<1x8x1x16xf32>
    tpu.vector_store %arg6[%c0_34, %c0_35, %61, %c0_36], %64 {strides = array<i32>} : memref<1x8x4x16xf32, #tpu.memory_space<vmem>>, vector<1x8x1x16xf32>,
    %c1_i32 = arith.constant 1 : i32
    %c2_i32_37 = arith.constant 2 : i32
    %65 = arith.muli %c2_i32_37, %c1_i32 : i32
    %c3_i32_38 = arith.constant 3 : i32
    %66 = arith.subi %c3_i32_38, %65 : i32
    %67 = arith.muli %arg0, %66 : i32
    %68 = arith.addi %c1_i32, %67 : i32
    %c0_39 = arith.constant 0 : index
    %69 = arith.index_cast %68 : i32 to index
    %c0_40 = arith.constant 0 : index
    %c0_41 = arith.constant 0 : index
    %c0_42 = arith.constant 0 : index
    %70 = vector.load %arg3[%c0_39, %69, %c0_40, %c0_41, %c0_42] : memref<1x4x3x8x16xf32, #tpu.memory_space<vmem>>, vector<1x1x3x8x16xf32>
    %71 = vector.shape_cast %70 : vector<1x1x3x8x16xf32> to vector<3x8x16xf32>
    %cst_43 = arith.constant dense<0.000000e+00> : vector<8x16xf32>
    %72 = tpu.matmul %59, %4, %cst_43 {dimension_numbers = #tpu.dot_dimension_numbers<[1], [0], [0], [1], [0, 0, 1, 1], [], []>} : vector<8x16xf32>, vector<16x16xf32>, vector<8x16xf32> -> vector<8x16xf32>
    %73 = vector.broadcast %10 : vector<1x16xf32> to vector<8x16xf32>
    %74 = arith.addf %72, %73 : vector<8x16xf32>
    %cst_44 = arith.constant dense<0.000000e+00> : vector<8x16xf32>
    %75 = tpu.matmul %59, %6, %cst_44 {dimension_numbers = #tpu.dot_dimension_numbers<[1], [0], [0], [1], [0, 0, 1, 1], [], []>} : vector<8x16xf32>, vector<16x16xf32>, vector<8x16xf32> -> vector<8x16xf32>
    %76 = vector.broadcast %12 : vector<1x16xf32> to vector<8x16xf32>
    %77 = arith.addf %75, %76 : vector<8x16xf32>
    %cst_45 = arith.constant dense<0.000000e+00> : vector<8x16xf32>
    %78 = tpu.matmul %59, %8, %cst_45 {dimension_numbers = #tpu.dot_dimension_numbers<[1], [0], [0], [1], [0, 0, 1, 1], [], []>} : vector<8x16xf32>, vector<16x16xf32>, vector<8x16xf32> -> vector<8x16xf32>
    %79 = vector.broadcast %14 : vector<1x16xf32> to vector<8x16xf32>
    %80 = arith.addf %78, %79 : vector<8x16xf32>
    %81 = vector.extract_strided_slice %71 {offsets = [0, 0, 0], sizes = [1, 8, 16], strides = [1, 1, 1]} : vector<3x8x16xf32> to vector<1x8x16xf32>
    %82 = vector.shape_cast %81 : vector<1x8x16xf32> to vector<8x16xf32>
    %83 = arith.addf %82, %74 : vector<8x16xf32>
    %84 = arith.negf %83 : vector<8x16xf32>
    %85 = math.exp %84 : vector<8x16xf32>
    %cst_46 = arith.constant 1.000000e+00 : f32
    %86 = vector.broadcast %cst_46 : f32 to vector<8x16xf32>
    %87 = arith.addf %86, %85 : vector<8x16xf32>
    %88 = arith.divf %86, %87 : vector<8x16xf32>
    %89 = vector.extract_strided_slice %71 {offsets = [1, 0, 0], sizes = [1, 8, 16], strides = [1, 1, 1]} : vector<3x8x16xf32> to vector<1x8x16xf32>
    %90 = vector.shape_cast %89 : vector<1x8x16xf32> to vector<8x16xf32>
    %91 = arith.addf %90, %77 : vector<8x16xf32>
    %92 = arith.negf %91 : vector<8x16xf32>
    %93 = math.exp %92 : vector<8x16xf32>
    %cst_47 = arith.constant 1.000000e+00 : f32
    %94 = vector.broadcast %cst_47 : f32 to vector<8x16xf32>
    %95 = arith.addf %94, %93 : vector<8x16xf32>
    %96 = arith.divf %94, %95 : vector<8x16xf32>
    %97 = vector.extract_strided_slice %71 {offsets = [2, 0, 0], sizes = [1, 8, 16], strides = [1, 1, 1]} : vector<3x8x16xf32> to vector<1x8x16xf32>
    %98 = vector.shape_cast %97 : vector<1x8x16xf32> to vector<8x16xf32>
    %99 = arith.mulf %88, %80 : vector<8x16xf32>
    %100 = arith.addf %98, %99 : vector<8x16xf32>
    %101 = math.tanh %100 : vector<8x16xf32>
    %cst_48 = arith.constant 1.000000e+00 : f32
    %102 = vector.broadcast %cst_48 : f32 to vector<8x16xf32>
    %103 = arith.subf %102, %96 : vector<8x16xf32>
    %104 = arith.mulf %103, %101 : vector<8x16xf32>
    %105 = arith.mulf %96, %59 : vector<8x16xf32>
    %106 = arith.addf %104, %105 : vector<8x16xf32>
    %107 = vector.shape_cast %106 : vector<8x16xf32> to vector<8x1x16xf32>
    %c0_49 = arith.constant 0 : index
    %c0_50 = arith.constant 0 : index
    %108 = arith.index_cast %68 : i32 to index
    %c0_51 = arith.constant 0 : index
    %109 = vector.load %arg6[%c0_49, %c0_50, %108, %c0_51] : memref<1x8x4x16xf32, #tpu.memory_space<vmem>>, vector<1x8x1x16xf32>
    %110 = vector.shape_cast %109 : vector<1x8x1x16xf32> to vector<8x1x16xf32>
    %111 = vector.shape_cast %107 : vector<8x1x16xf32> to vector<1x8x1x16xf32>
    tpu.vector_store %arg6[%c0_49, %c0_50, %108, %c0_51], %111 {strides = array<i32>} : memref<1x8x4x16xf32, #tpu.memory_space<vmem>>, vector<1x8x1x16xf32>,
    %c2_i32_52 = arith.constant 2 : i32
    %c2_i32_53 = arith.constant 2 : i32
    %112 = arith.muli %c2_i32_53, %c2_i32_52 : i32
    %c3_i32_54 = arith.constant 3 : i32
    %113 = arith.subi %c3_i32_54, %112 : i32
    %114 = arith.muli %arg0, %113 : i32
    %115 = arith.addi %c2_i32_52, %114 : i32
    %c0_55 = arith.constant 0 : index
    %116 = arith.index_cast %115 : i32 to index
    %c0_56 = arith.constant 0 : index
    %c0_57 = arith.constant 0 : index
    %c0_58 = arith.constant 0 : index
    %117 = vector.load %arg3[%c0_55, %116, %c0_56, %c0_57, %c0_58] : memref<1x4x3x8x16xf32, #tpu.memory_space<vmem>>, vector<1x1x3x8x16xf32>
    %118 = vector.shape_cast %117 : vector<1x1x3x8x16xf32> to vector<3x8x16xf32>
    %cst_59 = arith.constant dense<0.000000e+00> : vector<8x16xf32>
    %119 = tpu.matmul %106, %4, %cst_59 {dimension_numbers = #tpu.dot_dimension_numbers<[1], [0], [0], [1], [0, 0, 1, 1], [], []>} : vector<8x16xf32>, vector<16x16xf32>, vector<8x16xf32> -> vector<8x16xf32>
    %120 = vector.broadcast %10 : vector<1x16xf32> to vector<8x16xf32>
    %121 = arith.addf %119, %120 : vector<8x16xf32>
    %cst_60 = arith.constant dense<0.000000e+00> : vector<8x16xf32>
    %122 = tpu.matmul %106, %6, %cst_60 {dimension_numbers = #tpu.dot_dimension_numbers<[1], [0], [0], [1], [0, 0, 1, 1], [], []>} : vector<8x16xf32>, vector<16x16xf32>, vector<8x16xf32> -> vector<8x16xf32>
    %123 = vector.broadcast %12 : vector<1x16xf32> to vector<8x16xf32>
    %124 = arith.addf %122, %123 : vector<8x16xf32>
    %cst_61 = arith.constant dense<0.000000e+00> : vector<8x16xf32>
    %125 = tpu.matmul %106, %8, %cst_61 {dimension_numbers = #tpu.dot_dimension_numbers<[1], [0], [0], [1], [0, 0, 1, 1], [], []>} : vector<8x16xf32>, vector<16x16xf32>, vector<8x16xf32> -> vector<8x16xf32>
    %126 = vector.broadcast %14 : vector<1x16xf32> to vector<8x16xf32>
    %127 = arith.addf %125, %126 : vector<8x16xf32>
    %128 = vector.extract_strided_slice %118 {offsets = [0, 0, 0], sizes = [1, 8, 16], strides = [1, 1, 1]} : vector<3x8x16xf32> to vector<1x8x16xf32>
    %129 = vector.shape_cast %128 : vector<1x8x16xf32> to vector<8x16xf32>
    %130 = arith.addf %129, %121 : vector<8x16xf32>
    %131 = arith.negf %130 : vector<8x16xf32>
    %132 = math.exp %131 : vector<8x16xf32>
    %cst_62 = arith.constant 1.000000e+00 : f32
    %133 = vector.broadcast %cst_62 : f32 to vector<8x16xf32>
    %134 = arith.addf %133, %132 : vector<8x16xf32>
    %135 = arith.divf %133, %134 : vector<8x16xf32>
    %136 = vector.extract_strided_slice %118 {offsets = [1, 0, 0], sizes = [1, 8, 16], strides = [1, 1, 1]} : vector<3x8x16xf32> to vector<1x8x16xf32>
    %137 = vector.shape_cast %136 : vector<1x8x16xf32> to vector<8x16xf32>
    %138 = arith.addf %137, %124 : vector<8x16xf32>
    %139 = arith.negf %138 : vector<8x16xf32>
    %140 = math.exp %139 : vector<8x16xf32>
    %cst_63 = arith.constant 1.000000e+00 : f32
    %141 = vector.broadcast %cst_63 : f32 to vector<8x16xf32>
    %142 = arith.addf %141, %140 : vector<8x16xf32>
    %143 = arith.divf %141, %142 : vector<8x16xf32>
    %144 = vector.extract_strided_slice %118 {offsets = [2, 0, 0], sizes = [1, 8, 16], strides = [1, 1, 1]} : vector<3x8x16xf32> to vector<1x8x16xf32>
    %145 = vector.shape_cast %144 : vector<1x8x16xf32> to vector<8x16xf32>
    %146 = arith.mulf %135, %127 : vector<8x16xf32>
    %147 = arith.addf %145, %146 : vector<8x16xf32>
    %148 = math.tanh %147 : vector<8x16xf32>
    %cst_64 = arith.constant 1.000000e+00 : f32
    %149 = vector.broadcast %cst_64 : f32 to vector<8x16xf32>
    %150 = arith.subf %149, %143 : vector<8x16xf32>
    %151 = arith.mulf %150, %148 : vector<8x16xf32>
    %152 = arith.mulf %143, %106 : vector<8x16xf32>
    %153 = arith.addf %151, %152 : vector<8x16xf32>
    %154 = vector.shape_cast %153 : vector<8x16xf32> to vector<8x1x16xf32>
    %c0_65 = arith.constant 0 : index
    %c0_66 = arith.constant 0 : index
    %155 = arith.index_cast %115 : i32 to index
    %c0_67 = arith.constant 0 : index
    %156 = vector.load %arg6[%c0_65, %c0_66, %155, %c0_67] : memref<1x8x4x16xf32, #tpu.memory_space<vmem>>, vector<1x8x1x16xf32>
    %157 = vector.shape_cast %156 : vector<1x8x1x16xf32> to vector<8x1x16xf32>
    %158 = vector.shape_cast %154 : vector<8x1x16xf32> to vector<1x8x1x16xf32>
    tpu.vector_store %arg6[%c0_65, %c0_66, %155, %c0_67], %158 {strides = array<i32>} : memref<1x8x4x16xf32, #tpu.memory_space<vmem>>, vector<1x8x1x16xf32>,
    %c3_i32_68 = arith.constant 3 : i32
    %c2_i32_69 = arith.constant 2 : i32
    %159 = arith.muli %c2_i32_69, %c3_i32_68 : i32
    %c3_i32_70 = arith.constant 3 : i32
    %160 = arith.subi %c3_i32_70, %159 : i32
    %161 = arith.muli %arg0, %160 : i32
    %162 = arith.addi %c3_i32_68, %161 : i32
    %c0_71 = arith.constant 0 : index
    %163 = arith.index_cast %162 : i32 to index
    %c0_72 = arith.constant 0 : index
    %c0_73 = arith.constant 0 : index
    %c0_74 = arith.constant 0 : index
    %164 = vector.load %arg3[%c0_71, %163, %c0_72, %c0_73, %c0_74] : memref<1x4x3x8x16xf32, #tpu.memory_space<vmem>>, vector<1x1x3x8x16xf32>
    %165 = vector.shape_cast %164 : vector<1x1x3x8x16xf32> to vector<3x8x16xf32>
    %cst_75 = arith.constant dense<0.000000e+00> : vector<8x16xf32>
    %166 = tpu.matmul %153, %4, %cst_75 {dimension_numbers = #tpu.dot_dimension_numbers<[1], [0], [0], [1], [0, 0, 1, 1], [], []>} : vector<8x16xf32>, vector<16x16xf32>, vector<8x16xf32> -> vector<8x16xf32>
    %167 = vector.broadcast %10 : vector<1x16xf32> to vector<8x16xf32>
    %168 = arith.addf %166, %167 : vector<8x16xf32>
    %cst_76 = arith.constant dense<0.000000e+00> : vector<8x16xf32>
    %169 = tpu.matmul %153, %6, %cst_76 {dimension_numbers = #tpu.dot_dimension_numbers<[1], [0], [0], [1], [0, 0, 1, 1], [], []>} : vector<8x16xf32>, vector<16x16xf32>, vector<8x16xf32> -> vector<8x16xf32>
    %170 = vector.broadcast %12 : vector<1x16xf32> to vector<8x16xf32>
    %171 = arith.addf %169, %170 : vector<8x16xf32>
    %cst_77 = arith.constant dense<0.000000e+00> : vector<8x16xf32>
    %172 = tpu.matmul %153, %8, %cst_77 {dimension_numbers = #tpu.dot_dimension_numbers<[1], [0], [0], [1], [0, 0, 1, 1], [], []>} : vector<8x16xf32>, vector<16x16xf32>, vector<8x16xf32> -> vector<8x16xf32>
    %173 = vector.broadcast %14 : vector<1x16xf32> to vector<8x16xf32>
    %174 = arith.addf %172, %173 : vector<8x16xf32>
    %175 = vector.extract_strided_slice %165 {offsets = [0, 0, 0], sizes = [1, 8, 16], strides = [1, 1, 1]} : vector<3x8x16xf32> to vector<1x8x16xf32>
    %176 = vector.shape_cast %175 : vector<1x8x16xf32> to vector<8x16xf32>
    %177 = arith.addf %176, %168 : vector<8x16xf32>
    %178 = arith.negf %177 : vector<8x16xf32>
    %179 = math.exp %178 : vector<8x16xf32>
    %cst_78 = arith.constant 1.000000e+00 : f32
    %180 = vector.broadcast %cst_78 : f32 to vector<8x16xf32>
    %181 = arith.addf %180, %179 : vector<8x16xf32>
    %182 = arith.divf %180, %181 : vector<8x16xf32>
    %183 = vector.extract_strided_slice %165 {offsets = [1, 0, 0], sizes = [1, 8, 16], strides = [1, 1, 1]} : vector<3x8x16xf32> to vector<1x8x16xf32>
    %184 = vector.shape_cast %183 : vector<1x8x16xf32> to vector<8x16xf32>
    %185 = arith.addf %184, %171 : vector<8x16xf32>
    %186 = arith.negf %185 : vector<8x16xf32>
    %187 = math.exp %186 : vector<8x16xf32>
    %cst_79 = arith.constant 1.000000e+00 : f32
    %188 = vector.broadcast %cst_79 : f32 to vector<8x16xf32>
    %189 = arith.addf %188, %187 : vector<8x16xf32>
    %190 = arith.divf %188, %189 : vector<8x16xf32>
    %191 = vector.extract_strided_slice %165 {offsets = [2, 0, 0], sizes = [1, 8, 16], strides = [1, 1, 1]} : vector<3x8x16xf32> to vector<1x8x16xf32>
    %192 = vector.shape_cast %191 : vector<1x8x16xf32> to vector<8x16xf32>
    %193 = arith.mulf %182, %174 : vector<8x16xf32>
    %194 = arith.addf %192, %193 : vector<8x16xf32>
    %195 = math.tanh %194 : vector<8x16xf32>
    %cst_80 = arith.constant 1.000000e+00 : f32
    %196 = vector.broadcast %cst_80 : f32 to vector<8x16xf32>
    %197 = arith.subf %196, %190 : vector<8x16xf32>
    %198 = arith.mulf %197, %195 : vector<8x16xf32>
    %199 = arith.mulf %190, %153 : vector<8x16xf32>
    %200 = arith.addf %198, %199 : vector<8x16xf32>
    %201 = vector.shape_cast %200 : vector<8x16xf32> to vector<8x1x16xf32>
    %c0_81 = arith.constant 0 : index
    %c0_82 = arith.constant 0 : index
    %202 = arith.index_cast %162 : i32 to index
    %c0_83 = arith.constant 0 : index
    %203 = vector.load %arg6[%c0_81, %c0_82, %202, %c0_83] : memref<1x8x4x16xf32, #tpu.memory_space<vmem>>, vector<1x8x1x16xf32>
    %204 = vector.shape_cast %203 : vector<1x8x1x16xf32> to vector<8x1x16xf32>
    %205 = vector.shape_cast %201 : vector<8x1x16xf32> to vector<1x8x1x16xf32>
    tpu.vector_store %arg6[%c0_81, %c0_82, %202, %c0_83], %205 {strides = array<i32>} : memref<1x8x4x16xf32, #tpu.memory_space<vmem>>, vector<1x8x1x16xf32>,
    %c4_i32 = arith.constant 4 : i32
    %206 = arith.index_cast %arg0 : i32 to index
    %c0_84 = arith.constant 0 : index
    %c0_85 = arith.constant 0 : index
    %207 = vector.load %arg7[%206, %c0_84, %c0_85] : memref<2x8x16xf32, #tpu.memory_space<vmem>>, vector<1x8x16xf32>
    %208 = vector.shape_cast %207 : vector<1x8x16xf32> to vector<8x16xf32>
    %209 = vector.shape_cast %200 : vector<8x16xf32> to vector<1x8x16xf32>
    tpu.vector_store %arg7[%206, %c0_84, %c0_85], %209 {strides = array<i32>} : memref<2x8x16xf32, #tpu.memory_space<vmem>>, vector<1x8x16xf32>,
    return
  }
  func.func @transform_0(%arg0: i32, %arg1: i32, %arg2: i32) -> (i32, i32, i32, i32, i32) {
    %c2_i32 = arith.constant 2 : i32
    %0 = arith.muli %c2_i32, %arg2 : i32
    %c0_i32 = arith.constant 0 : i32
    %1 = arith.subi %c0_i32, %0 : i32
    %2 = arith.muli %arg0, %1 : i32
    %3 = arith.addi %arg2, %2 : i32
    %c0_i32_0 = arith.constant 0 : i32
    %c0_i32_1 = arith.constant 0 : i32
    %c0_i32_2 = arith.constant 0 : i32
    return %arg0, %3, %c0_i32_0, %arg1, %c0_i32_1 : i32, i32, i32, i32, i32
  }
  func.func @transform_1(%arg0: i32, %arg1: i32, %arg2: i32) -> (i32, i32, i32, i32) {
    %c0_i32 = arith.constant 0 : i32
    %c0_i32_0 = arith.constant 0 : i32
    %c0_i32_1 = arith.constant 0 : i32
    %c0_i32_2 = arith.constant 0 : i32
    return %arg0, %c0_i32, %c0_i32_0, %c0_i32_1 : i32, i32, i32, i32
  }
  func.func @transform_2(%arg0: i32, %arg1: i32, %arg2: i32) -> (i32, i32, i32, i32) {
    %c0_i32 = arith.constant 0 : i32
    %c0_i32_0 = arith.constant 0 : i32
    %c0_i32_1 = arith.constant 0 : i32
    %c0_i32_2 = arith.constant 0 : i32
    return %arg0, %c0_i32, %c0_i32_0, %c0_i32_1 : i32, i32, i32, i32
  }
  func.func @transform_3(%arg0: i32, %arg1: i32, %arg2: i32) -> (i32, i32, i32, i32) {
    %c2_i32 = arith.constant 2 : i32
    %0 = arith.muli %c2_i32, %arg2 : i32
    %c0_i32 = arith.constant 0 : i32
    %1 = arith.subi %c0_i32, %0 : i32
    %2 = arith.muli %arg0, %1 : i32
    %3 = arith.addi %arg2, %2 : i32
    %c0_i32_0 = arith.constant 0 : i32
    %c0_i32_1 = arith.constant 0 : i32
    return %arg0, %arg1, %3, %c0_i32_0 : i32, i32, i32, i32
  }
}

module attributes {stable_mosaic.version = 11 : i64} {
  func.func @_doc_attn_kernel(%arg0: i32, %arg1: memref<2x4x16xf32, #tpu.memory_space<vmem>>, %arg2: memref<2x4x16xf32, #tpu.memory_space<vmem>>, %arg3: memref<16x8xf32, #tpu.memory_space<vmem>>, %arg4: memref<16x8xf32, #tpu.memory_space<vmem>>, %arg5: memref<1x4xf32, #tpu.memory_space<vmem>>, %arg6: memref<2x4xf32, #tpu.memory_space<vmem>>, %arg7: memref<2x4x4xf32, #tpu.memory_space<vmem>>) attributes {dimension_semantics = [#tpu.dimension_semantics<parallel>], iteration_bounds = array<i64: 1>, scalar_prefetch = 0 : i64, scratch_operands = 0 : i64, tpu.core_type = #tpu.core_type<tc>, window_params = [{transform_indices = @transform_0, window_bounds = array<i64: 2, 4, 16>}, {transform_indices = @transform_1, window_bounds = array<i64: 2, 4, 16>}, {pipeline_mode = #tpu.pipeline_mode<synchronous>, transform_indices = @transform_2, window_bounds = array<i64: 16, 8>}, {pipeline_mode = #tpu.pipeline_mode<synchronous>, transform_indices = @transform_3, window_bounds = array<i64: 16, 8>}, {pipeline_mode = #tpu.pipeline_mode<synchronous>, transform_indices = @transform_4, window_bounds = array<i64: 1, 4>}, {transform_indices = @transform_5, window_bounds = array<i64: 2, 4>}, {transform_indices = @transform_6, window_bounds = array<i64: 2, 4, 4>}]} {
    %c0 = arith.constant 0 : index
    %c0_0 = arith.constant 0 : index
    %c0_1 = arith.constant 0 : index
    %0 = vector.load %arg1[%c0, %c0_0, %c0_1] : memref<2x4x16xf32, #tpu.memory_space<vmem>>, vector<2x4x16xf32>
    %c0_2 = arith.constant 0 : index
    %c0_3 = arith.constant 0 : index
    %c0_4 = arith.constant 0 : index
    %1 = vector.load %arg2[%c0_2, %c0_3, %c0_4] : memref<2x4x16xf32, #tpu.memory_space<vmem>>, vector<2x4x16xf32>
    %2 = vector.shape_cast %0 : vector<2x4x16xf32> to vector<8x16xf32>
    %c0_5 = arith.constant 0 : index
    %c0_6 = arith.constant 0 : index
    %3 = vector.load %arg3[%c0_5, %c0_6] : memref<16x8xf32, #tpu.memory_space<vmem>>, vector<16x8xf32>
    %cst = arith.constant dense<0.000000e+00> : vector<8x8xf32>
    %4 = tpu.matmul %2, %3, %cst {dimension_numbers = #tpu.dot_dimension_numbers<[1], [0], [0], [1], [0, 0, 1, 1], [], []>} : vector<8x16xf32>, vector<16x8xf32>, vector<8x8xf32> -> vector<8x8xf32>
    %5 = vector.shape_cast %1 : vector<2x4x16xf32> to vector<8x16xf32>
    %c0_7 = arith.constant 0 : index
    %c0_8 = arith.constant 0 : index
    %6 = vector.load %arg4[%c0_7, %c0_8] : memref<16x8xf32, #tpu.memory_space<vmem>>, vector<16x8xf32>
    %cst_9 = arith.constant dense<0.000000e+00> : vector<8x8xf32>
    %7 = tpu.matmul %5, %6, %cst_9 {dimension_numbers = #tpu.dot_dimension_numbers<[1], [0], [0], [1], [0, 0, 1, 1], [], []>} : vector<8x16xf32>, vector<16x8xf32>, vector<8x8xf32> -> vector<8x8xf32>
    %8 = arith.addf %4, %7 : vector<8x8xf32>
    %9 = vector.shape_cast %8 : vector<8x8xf32> to vector<2x4x8xf32>
    %10 = vector.extract_strided_slice %9 {offsets = [0, 0, 0], sizes = [2, 4, 4], strides = [1, 1, 1]} : vector<2x4x8xf32> to vector<2x4x4xf32>
    %11 = vector.extract_strided_slice %9 {offsets = [0, 0, 4], sizes = [2, 4, 4], strides = [1, 1, 1]} : vector<2x4x8xf32> to vector<2x4x4xf32>
    %cst_10 = arith.constant dense<0xFF800000> : vector<2x4xf32>
    %12 = vector.multi_reduction <maximumf>, %10, %cst_10 [1] : vector<2x4x4xf32> to vector<2x4xf32>
    %cst_11 = arith.constant 0xFF800000 : f32
    %13 = vector.broadcast %cst_11 : f32 to vector<2x4xf32>
    %14 = arith.maximumf %13, %12 : vector<2x4xf32>
    %15 = vector.shape_cast %14 : vector<2x4xf32> to vector<2x1x4xf32>
    %16 = vector.broadcast %15 : vector<2x1x4xf32> to vector<2x4x4xf32>
    %17 = arith.subf %10, %16 : vector<2x4x4xf32>
    %18 = math.exp %17 : vector<2x4x4xf32>
    %cst_12 = arith.constant dense<0.000000e+00> : vector<2x4xf32>
    %19 = vector.multi_reduction <add>, %18, %cst_12 [1] : vector<2x4x4xf32> to vector<2x4xf32>
    %20 = vector.shape_cast %19 : vector<2x4xf32> to vector<2x1x4xf32>
    %21 = vector.broadcast %20 : vector<2x1x4xf32> to vector<2x4x4xf32>
    %22 = arith.divf %18, %21 : vector<2x4x4xf32>
    %23 = arith.mulf %22, %11 : vector<2x4x4xf32>
    %cst_13 = arith.constant dense<0.000000e+00> : vector<2x4xf32>
    %24 = vector.multi_reduction <add>, %23, %cst_13 [1] : vector<2x4x4xf32> to vector<2x4xf32>
    %c0_14 = arith.constant 0 : index
    %c0_15 = arith.constant 0 : index
    %25 = vector.load %arg5[%c0_14, %c0_15] : memref<1x4xf32, #tpu.memory_space<vmem>>, vector<1x4xf32>
    %26 = vector.broadcast %25 : vector<1x4xf32> to vector<2x4xf32>
    %27 = arith.addf %24, %26 : vector<2x4xf32>
    %c0_16 = arith.constant 0 : index
    %c0_17 = arith.constant 0 : index
    %28 = vector.load %arg6[%c0_16, %c0_17] : memref<2x4xf32, #tpu.memory_space<vmem>>, vector<2x4xf32>
    tpu.vector_store %arg6[%c0_16, %c0_17], %27 {strides = array<i32>} : memref<2x4xf32, #tpu.memory_space<vmem>>, vector<2x4xf32>,
    %c0_18 = arith.constant 0 : index
    %c0_19 = arith.constant 0 : index
    %c0_20 = arith.constant 0 : index
    %29 = vector.load %arg7[%c0_18, %c0_19, %c0_20] : memref<2x4x4xf32, #tpu.memory_space<vmem>>, vector<2x4x4xf32>
    tpu.vector_store %arg7[%c0_18, %c0_19, %c0_20], %22 {strides = array<i32>} : memref<2x4x4xf32, #tpu.memory_space<vmem>>, vector<2x4x4xf32>,
    return
  }
  func.func @transform_0(%arg0: i32) -> (i32, i32, i32) {
    %c0_i32 = arith.constant 0 : i32
    %c0_i32_0 = arith.constant 0 : i32
    %c0_i32_1 = arith.constant 0 : i32
    return %arg0, %c0_i32, %c0_i32_0 : i32, i32, i32
  }
  func.func @transform_1(%arg0: i32) -> (i32, i32, i32) {
    %c0_i32 = arith.constant 0 : i32
    %c0_i32_0 = arith.constant 0 : i32
    %c0_i32_1 = arith.constant 0 : i32
    return %arg0, %c0_i32, %c0_i32_0 : i32, i32, i32
  }
  func.func @transform_2(%arg0: i32) -> (i32, i32) {
    %c0_i32 = arith.constant 0 : i32
    %c0_i32_0 = arith.constant 0 : i32
    %c0_i32_1 = arith.constant 0 : i32
    return %c0_i32, %c0_i32_0 : i32, i32
  }
  func.func @transform_3(%arg0: i32) -> (i32, i32) {
    %c0_i32 = arith.constant 0 : i32
    %c0_i32_0 = arith.constant 0 : i32
    %c0_i32_1 = arith.constant 0 : i32
    return %c0_i32, %c0_i32_0 : i32, i32
  }
  func.func @transform_4(%arg0: i32) -> (i32, i32) {
    %c0_i32 = arith.constant 0 : i32
    %c0_i32_0 = arith.constant 0 : i32
    %c0_i32_1 = arith.constant 0 : i32
    return %c0_i32, %c0_i32_0 : i32, i32
  }
  func.func @transform_5(%arg0: i32) -> (i32, i32) {
    %c0_i32 = arith.constant 0 : i32
    %c0_i32_0 = arith.constant 0 : i32
    return %arg0, %c0_i32 : i32, i32
  }
  func.func @transform_6(%arg0: i32) -> (i32, i32, i32) {
    %c0_i32 = arith.constant 0 : i32
    %c0_i32_0 = arith.constant 0 : i32
    %c0_i32_1 = arith.constant 0 : i32
    return %arg0, %c0_i32, %c0_i32_0 : i32, i32, i32
  }
}

</mosaic_0001>

<bundles_post_ra>
// kernel: hgrulwan_forward.7
= control target key start
LH: loop header
LB: loop body
LE: loop exit
PB: predicated region body
PF: predicated region fallthrough
CT: control target
= control target key end

     0   :  { %12 = vsyncpa [#allocation3], 0  ;;  %v392_v3 = vmov 0.0|0.0   ;;  %vm393_vm0 = vmmov 0   ;;  %v394_v7 = vmov 0.0   ;;  %vm35_vm1 = vcmask 130048   ;;  %s488_s0 = inlined_call_operand.vmem [shape: f32[2,4,16], index: 0, kind: input, shape index: {}]   ;;  %s489_s1 = inlined_call_operand.vmem [shape: f32[2,4,16], index: 1, kind: input, shape index: {}]   ;;  %s490_s2 = inlined_call_operand.vmem [shape: f32[16,8], index: 2, kind: input, shape index: {}]   ;;  %s491_s3 = inlined_call_operand.vmem [shape: f32[16,8], index: 3, kind: input, shape index: {}]   ;;  %s492_s4 = inlined_call_operand.vmem [shape: f32[1,4], index: 4, kind: input, shape index: {}]   ;;  %s493_s5 = inlined_call_operand.hbm [shape: f32[2,4], index: 5, kind: output, shape index: {0}]   ;;  %s494_s6 = inlined_call_operand.hbm [shape: f32[2,4,4], index: 6, kind: output, shape index: {1}]  }
   0x1   :  { %v30_v0 = vld [vmem:[%s491_s3] sm:$0xff]  ;;  %v31_v1 = vld [vmem:[%s491_s3 + $0x8] sm:$0xff]  ;;  %319 = vmatprep.subr.bf16.mxu1 %v392_v3  ;;  %322 = vmatprep.subr.bf16.mxu0 %v392_v3 }
   0x2   :  { %v28_v2 = vld [vmem:[%s490_s2] sm:$0xff]  ;;  %v320_v4 = vpack.c.bf16 %v31_v1, %v30_v0  ;;  %v29_v5 = vld [vmem:[%s490_s2 + $0x8] sm:$0xff]  ;;  %309 = vmatprep.mubr.msk.f32.mxu1 %vm393_vm0, %v394_v7  ;;  %316 = vmatprep.mubr.msk.f32.mxu0 %vm393_vm0, %v394_v7 }
   0x3   :  { %v323_v6 = vpack.c.bf16 %v29_v5, %v28_v2  ;;  %v334_v8 = vld [vmem:[%s489_s1] sm:$0xff]  }
   0x4   :  { %321 = vmatpush3.bf16.msra.mxu1 %v320_v4  ;;  %v335_v9 = vld [vmem:[%s488_s0] sm:$0xff]  }
   0x5   :  { %13 = vsyncpa [#allocation5], 0  ;;  %324 = vmatpush3.bf16.msra.mxu0 %v323_v6  ;;  %vm186_vm2 = vcmask 27648   ;;  %s395_s1 = smov 124   ;;  %s396_s0 = smov [#allocation4]  }
   0x6   :  { %s281_s2 = sshll.u32 %s396_s0, 4  ;;  %s282_s2 = int_to_ptr.vmem [resolvable:$true] %s281_s2 }
   0x7   :  { %310 = vmatmul.mubr.msk.f32.vlgmr.msra.gmra.mrb[0].mxu1 %vm35_vm1, %v334_v8  ;;  %s344_s8 = scalar_lea.vmem %s282_s2, 128  ;;  %p349_p1 = scmp.lt.s32.totalorder %s282_s2, %s282_s2 }
   0x8   :  { %317 = vmatmul.mubr.msk.f32.vlgmr.msra.gmra.mrb[0].mxu0 %vm35_vm1, %v335_v9  ;;  %p345_p0 = scmp.ne.s32.totalorder %s282_s2, %s344_s8  ;;  %p350_p2 = scmp.lt.s32.totalorder %s344_s8, %s344_s8 }
   0xa   :  { %p351_p3 = por %p350_p2, %p349_p1 }
   0xc   :  { %p352_p4 = pnand %p351_p3, %p345_p0 }
  0xda   :  { %v104_v10 = vpop.f32.mrb[0].mxu1 }
  0xdb   :  { %v179_v11 = vpop.f32.mrb[0].mxu0  ;;  %v311_v12 = vpop.f32.mrb[1].mxu1 }
  0xdc   :  { %v180_v13 = vadd.f32 %v179_v11, %v104_v10  ;;  %v318_v14 = vpop.f32.mrb[1].mxu0 }
  0xde   :  { %v187_v15 = vsel %vm186_vm2, %v180_v13, -inf  ;;  %v184_v16 = vcombine.high %v180_v13, %v180_v13 }
  0xdf   :  { %v188_v17 = vrot.slane %v187_v15, 4 }
  0xe0   :  { %227 = vrot.lane.b32.xlu0 %v184_v16, %s395_s1  ;;  %v194_v18 = vsel %vm186_vm2, %v184_v16, -inf }
  0xe1   :  { %v189_v19 = vmax.f32 %v187_v15, %v188_v17  ;;  %v195_v20 = vrot.slane %v194_v18, 4 }
  0xe3   :  { %v190_v21 = vrot.slane %v189_v19, 2  ;;  %v196_v22 = vmax.f32 %v194_v18, %v195_v20 }
  0xe4   :  { %225 = vrot.lane.b32.xlu0 %v180_v13, %s395_s1 }
  0xe5   :  { %v191_v23 = vmax.f32 %v189_v19, %v190_v21  ;;  %v197_v24 = vrot.slane %v196_v22, 2 }
  0xe7   :  { %v192_v25 = vrot.slane %v191_v23, 1  ;;  %v198_v26 = vmax.f32 %v196_v22, %v197_v24 }
  0xe9   :  { %v193_v27 = vmax.f32 %v191_v23, %v192_v25  ;;  %v199_v28 = vrot.slane %v198_v26, 1 }
  0xeb   :  { %v201_v29 = vsub.f32 %v180_v13, %v193_v27  ;;  %v200_v30 = vmax.f32 %v198_v26, %v199_v28 }
  0xed   :  { %v203_v31 = vmul.f32 1.442695, %v201_v29  ;;  %v202_v32 = vsub.f32 %v184_v16, %v200_v30 }
  0xef   :  { %336 = vpow2.f32 %v203_v31  ;;  %v205_v33 = vmul.f32 1.442695, %v202_v32 }
  0xf1   :  { %338 = vpow2.f32 %v205_v33 }
  0xf9   :  { %v337_v34 = vpop.eup %336 }
  0xfa   :  { %v207_v35 = vsel %vm186_vm2, %v337_v34, 0.0 }
  0xfb   :  { %v339_v36 = vpop.eup %338  ;;  %v208_v37 = vrot.slane %v207_v35, 4 }
  0xfc   :  { %v214_v38 = vsel %vm186_vm2, %v339_v36, 0.0 }
  0xfd   :  { %v215_v39 = vrot.slane %v214_v38, 4  ;;  %v209_v40 = vadd.f32 %v208_v37, %v207_v35 }
  0xff   :  { %v216_v41 = vadd.f32 %v215_v39, %v214_v38  ;;  %v210_v42 = vrot.slane %v209_v40, 2 }
 0x101   :  { %v217_v43 = vrot.slane %v216_v41, 2  ;;  %v211_v44 = vadd.f32 %v210_v42, %v209_v40 }
 0x103   :  { %v218_v45 = vadd.f32 %v217_v43, %v216_v41  ;;  %v212_v46 = vrot.slane %v211_v44, 1 }
 0x105   :  { %v219_v47 = vrot.slane %v218_v45, 1  ;;  %v213_v48 = vadd.f32 %v212_v46, %v211_v44 }
 0x107   :  { %v220_v49 = vadd.f32 %v219_v47, %v218_v45  ;;  %340 = vrcp.f32 %v213_v48 }
 0x109   :  { %342 = vrcp.f32 %v220_v49 }
 0x111   :  { %v341_v50 = vpop.eup %340 }
 0x112   :  { %v222_v51 = vmul.f32 %v341_v50, %v337_v34 }
 0x113   :  { %v343_v52 = vpop.eup %342 }
 0x114   :  { %v224_v53 = vmul.f32 %v343_v52, %v339_v36  ;;  %264 = vst.msk [vmem:[#allocation4] sm:$0xf] %vm186_vm2, %v222_v51 }
 0x116   :  { %265 = vst.msk [vmem:[#allocation4 + $0x4] sm:$0xf] %vm186_vm2, %v224_v53 }
 0x117   :  { %355 = shalt.err (!%p352_p4)
}
 0x118   :  { %s356_s11 = scalar_lea.hbm %s494_s6, 128 }
 0x119   :  { %p357_p5 = scmp.ne.s32.totalorder %s494_s6, %s356_s11  ;;  %p360_p6 = scmp.lt.u32.totalorder %s356_s11, %s494_s6 }
 0x11b   :  { %p362_p7 = pnand %p360_p6, %p357_p5 }
 0x11d   :  { %365 = shalt.err (!%p362_p7)
}
 0x11e   :  { %s397_s16 = smov 64   ;;  %s398_s17 = smov 4   ;;  %v298_v4 = vld [vmem:[%s492_s4] ss:$0 sm:$0xff]  ;;  %vm259_vm3 = vcmask 1041409   ;;  %vm262_vm4 = vcmask 25600  }
 0x11f   :  { %287 = dma.vmem_to_hbm [thread:$0]  %s282_s2, 128, %s494_s6, [#allocation5], %s397_s16, %s397_s16, %s398_s17  }
 0x120   :  { %s399_s6 = smov [#allocation2]  }
 0x121   :  { %s272_s22 = sshll.u32 %s399_s6, 4  ;;  %s273_s22 = int_to_ptr.vmem [resolvable:$true] %s272_s22 }
 0x122   :  { %s366_s23 = scalar_lea.vmem %s273_s22, 32  ;;  %p371_p9 = scmp.lt.s32.totalorder %s273_s22, %s273_s22 }
 0x123   :  { %p367_p8 = scmp.ne.s32.totalorder %s273_s22, %s366_s23  ;;  %p372_p10 = scmp.lt.s32.totalorder %s366_s23, %s366_s23 }
 0x125   :  { %p373_p11 = por %p372_p10, %p371_p9 }
 0x127   :  { %p374_p12 = pnand %p373_p11, %p367_p8 }
 0x152   :  { %v228_v54 = vpop.permute.xlu0 %227 }
 0x153   :  { %v232_v55 = vmul.f32 %v228_v54, %v224_v53 }
 0x155   :  { %v240_v56 = vsel %vm186_vm2, %v232_v55, 0.0 }
 0x156   :  { %v241_v57 = vrot.slane %v240_v56, 4  ;;  %v226_v58 = vpop.permute.xlu0 %225 }
 0x157   :  { %v231_v59 = vmul.f32 %v226_v58, %v222_v51 }
 0x158   :  { %v242_v60 = vadd.f32 %v241_v57, %v240_v56 }
 0x159   :  { %v233_v61 = vsel %vm186_vm2, %v231_v59, 0.0 }
 0x15a   :  { %v243_v62 = vrot.slane %v242_v60, 2  ;;  %v234_v63 = vrot.slane %v233_v61, 4 }
 0x15c   :  { %v244_v0 = vadd.f32 %v243_v62, %v242_v60  ;;  %v235_v1 = vadd.f32 %v234_v63, %v233_v61 }
 0x15e   :  { %v245_v2 = vrot.slane %v244_v0, 1  ;;  %v236_v3 = vrot.slane %v235_v1, 2 }
 0x160   :  { %v246_v5 = vadd.f32 %v245_v2, %v244_v0  ;;  %v237_v6 = vadd.f32 %v236_v3, %v235_v1 }
 0x162   :  { %v238_v7 = vrot.slane %v237_v6, 1  ;;  %v255_v8 = vadd.f32 %v298_v4, %v246_v5 }
 0x164   :  { %v239_v9 = vadd.f32 %v238_v7, %v237_v6  ;;  %v258_v11 = vrot.slane %v255_v8, 7 }
 0x166   :  { %v254_v10 = vadd.f32 %v298_v4, %v239_v9 }
 0x168   :  { %v260_v12 = vsel %vm259_vm3, %v258_v11, %v254_v10 }
 0x169   :  { %263 = vst.msk [vmem:[#allocation2] sm:$0x3] %vm262_vm4, %v260_v12 }
 0x16a   :  { %377 = shalt.err (!%p374_p12)
}
 0x16b   :  { %s378_s25 = scalar_lea.hbm %s493_s5, 32 }
 0x16c   :  { %p379_p13 = scmp.ne.s32.totalorder %s493_s5, %s378_s25  ;;  %p382_p0 = scmp.lt.u32.totalorder %s378_s25, %s493_s5 }
 0x16e   :  { %p384_p1 = pnand %p382_p0, %p379_p13 }
 0x170   :  { %387 = shalt.err (!%p384_p1)
}
 0x171   :  { %275 = dma.vmem_to_hbm [thread:$0]  %s273_s22, 32, %s493_s5, [#allocation3]  }
 0x172   :  { %388 = dma.done.wait [#allocation3], 32  }
 0x173   :  { %389 = vsyncadd [#allocation3], 4294967264 }
 0x174   :  { %390 = dma.done.wait [#allocation5], 128  }
 0x175   :  { %391 = vsyncadd [#allocation5], 4294967168 }
 0x176   :  { %294 = vsyncpa [#allocation3], 1 }
 0x177   :  { %295 = vsyncpa [#allocation5], 1 }

// kernel: hgrulwan_forward.5
= control target key start
LH: loop header
LB: loop body
LE: loop exit
PB: predicated region body
PF: predicated region fallthrough
CT: control target
= control target key end

     0   :  { %vm46_vm0 = vcmask 130048   ;;  %s1446_s0 = inlined_call_operand.vmem [shape: f32[8,8,16], index: 0, kind: input, shape index: {}]   ;;  %s1447_s1 = inlined_call_operand.vmem [shape: f32[8,8,16], index: 1, kind: input, shape index: {}]   ;;  %s1448_s2 = inlined_call_operand.vmem [shape: f32[16,32], index: 2, kind: input, shape index: {}]   ;;  %s1449_s3 = inlined_call_operand.vmem [shape: f32[16,32], index: 3, kind: input, shape index: {}]   ;;  %s1450_s4 = inlined_call_operand.vmem [shape: f32[1,32], index: 4, kind: input, shape index: {}]   ;;  %s1451_s5 = inlined_call_operand.vmem [shape: f32[1,32], index: 5, kind: input, shape index: {}]   ;;  %s1452_s6 = inlined_call_operand.vmem [shape: f32[8,2,16], index: 6, kind: output, shape index: {0}]   ;;  %s1453_s7 = inlined_call_operand.hbm [shape: f32[8,8], index: 7, kind: output, shape index: {1}]  }
   0x1   :  { %v44_v0 = vld [vmem:[%s1449_s3] sm:$0xff]  ;;  %v45_v1 = vld [vmem:[%s1449_s3 + $0x8] sm:$0xff]  ;;  %v1113_v10 = vld [vmem:[%s1447_s1 + $0x10] sm:$0xff] }
   0x2   :  { %v42_v2 = vld [vmem:[%s1448_s2] sm:$0xff]  ;;  %v940_v3 = vpack.c.bf16 %v45_v1, %v44_v0  ;;  %v43_v4 = vld [vmem:[%s1448_s2 + $0x8] sm:$0xff]  ;;  %v1118_v11 = vld [vmem:[%s1446_s0 + $0x10] sm:$0xff] }
   0x3   :  { %v1089_v5 = vld [vmem:[%s1447_s1] sm:$0xff]  ;;  %v944_v7 = vpack.c.bf16 %v43_v4, %v42_v2  ;;  %v1103_v8 = vld [vmem:[%s1447_s1 + $0x8] sm:$0xff] }
   0x4   :  { %v1094_v6 = vld [vmem:[%s1446_s0] sm:$0xff]  ;;  %912 = vmatprep.mubr.msk.f32.mxu1 %vm46_vm0, %v1089_v5  ;;  %941 = vmatprep.subr.bf16.mxu1 %v940_v3  ;;  %v1108_v9 = vld [vmem:[%s1446_s0 + $0x8] sm:$0xff] }
   0x5   :  { %928 = vmatprep.mubr.msk.f32.mxu0 %vm46_vm0, %v1094_v6  ;;  %945 = vmatprep.subr.bf16.mxu0 %v944_v7 }
   0x6   :  { %943 = vmatpush3.bf16.msra.mxu1 %v940_v3  ;;  %947 = vmatpush3.bf16.msra.mxu0 %v944_v7 }
   0x7   :  { %13 = vsyncpa [#allocation3], 0  ;;  %v1129_v12 = vld [vmem:[%s1447_s1 + $0x18] sm:$0xff]  ;;  %v1141_v14 = vld [vmem:[%s1447_s1 + $0x20] sm:$0xff]  ;;  %vm343_vm1 = vcmask 261120   ;;  %vm410_vm2 = vcmask 1041409  }
   0x8   :  { %v1136_v13 = vld [vmem:[%s1446_s0 + $0x18] sm:$0xff]  ;;  %v1146_v15 = vld [vmem:[%s1446_s0 + $0x20] sm:$0xff]  ;;  %v1157_v16 = vld [vmem:[%s1447_s1 + $0x28] sm:$0xff]  ;;  %vm412_vm3 = vcmask 1042434   ;;  %vm414_vm4 = vcmask 1043459   ;;  %vm416_vm5 = vcmask 1044484  }
   0x9   :  { %913 = vmatmul.mubr.msk.f32.vlgmr.msra.gmra.mrb[0].mxu1 %vm46_vm0, %v1103_v8  ;;  %929 = vmatmul.mubr.msk.f32.vlgmr.msra.gmra.mrb[0].mxu0 %vm46_vm0, %v1108_v9  ;;  %v1164_v17 = vld [vmem:[%s1446_s0 + $0x28] sm:$0xff]  ;;  %v1169_v18 = vld [vmem:[%s1447_s1 + $0x30] sm:$0xff]  ;;  %v1185_v20 = vld [vmem:[%s1447_s1 + $0x38] sm:$0xff]  ;;  %vm418_vm6 = vcmask 1045509   ;;  %vm420_vm7 = vcmask 1046534   ;;  %vm422_vm8 = vcmask 1047559  }
   0xa   :  { %915 = vmatprep.mubr.msk.f32.mxu1 %vm46_vm0, %v1113_v10  ;;  %931 = vmatprep.mubr.msk.f32.mxu0 %vm46_vm0, %v1118_v11  ;;  %v1174_v19 = vld [vmem:[%s1446_s0 + $0x30] sm:$0xff]  ;;  %v1192_v21 = vld [vmem:[%s1446_s0 + $0x38] sm:$0xff]  ;;  %v886_v24 = vld [vmem:[%s1450_s4] ss:$0 sm:$0xff]  ;;  %vm425_vm9 = vcmask 64512   ;;  %vm730_vm10 = vcmask 122880  }
   0xb   :  { %v887_v52 = vld [vmem:[%s1451_s5] ss:$0 sm:$0xff]  ;;  %s1033_s9 = smov [#allocation2]  }
   0xc   :  { %s860_s10 = sshll.u32 %s1033_s9, 4  ;;  %s861_s10 = int_to_ptr.vmem [resolvable:$true] %s860_s10 }
   0xd   :  { %916 = vmatmul.mubr.msk.f32.gmra.mrb[2].mxu1 %vm46_vm0, %v1129_v12  ;;  %932 = vmatmul.mubr.msk.f32.gmra.mrb[2].mxu0 %vm46_vm0, %v1136_v13  ;;  %s1008_s13 = scalar_lea.vmem %s861_s10, 128  ;;  %p1013_p1 = scmp.lt.s32.totalorder %s861_s10, %s861_s10 }
   0xe   :  { %918 = vmatprep.mubr.msk.f32.mxu1 %vm46_vm0, %v1141_v14  ;;  %934 = vmatprep.mubr.msk.f32.mxu0 %vm46_vm0, %v1146_v15  ;;  %p1009_p0 = scmp.ne.s32.totalorder %s861_s10, %s1008_s13  ;;  %p1014_p2 = scmp.lt.s32.totalorder %s1008_s13, %s1008_s13 }
  0x10   :  { %p1015_p3 = por %p1014_p2, %p1013_p1 }
  0x11   :  { %919 = vmatmul.mubr.msk.f32.gmra.mrb[4].mxu1 %vm46_vm0, %v1157_v16  ;;  %935 = vmatmul.mubr.msk.f32.gmra.mrb[4].mxu0 %vm46_vm0, %v1164_v17 }
  0x12   :  { %921 = vmatprep.mubr.msk.f32.mxu1 %vm46_vm0, %v1169_v18  ;;  %937 = vmatprep.mubr.msk.f32.mxu0 %vm46_vm0, %v1174_v19  ;;  %p1016_p4 = pnand %p1015_p3, %p1009_p0 }
  0x15   :  { %922 = vmatmul.mubr.msk.f32.gmra.mrb[6].mxu1 %vm46_vm0, %v1185_v20  ;;  %938 = vmatmul.mubr.msk.f32.gmra.mrb[6].mxu0 %vm46_vm0, %v1192_v21 }
  0xdc   :  { %v914_v22 = vpop.f32.mrb[0].mxu1  ;;  %v930_v23 = vpop.f32.mrb[0].mxu0 }
  0xdd   :  { %v137_v25 = vpop.f32.mrb[1].mxu1  ;;  %v272_v26 = vadd.f32 %v930_v23, %v914_v22  ;;  %v266_v27 = vpop.f32.mrb[1].mxu0 }
  0xde   :  { %v267_v28 = vadd.f32 %v266_v27, %v137_v25 }
  0xdf   :  { %v313_v29 = vadd.f32 %v886_v24, %v272_v26 }
  0xe0   :  { %v917_v30 = vpop.f32.mrb[2].mxu1  ;;  %v312_v31 = vadd.f32 %v886_v24, %v267_v28  ;;  %v933_v32 = vpop.f32.mrb[2].mxu0 }
  0xe1   :  { %v147_v33 = vpop.f32.mrb[3].mxu1  ;;  %960 = vtanh.f32 %v313_v29  ;;  %v282_v34 = vadd.f32 %v933_v32, %v917_v30  ;;  %v276_v35 = vpop.f32.mrb[3].mxu0  ;;  %v376_v32 = vlaneseq }
  0xe2   :  { %962 = vtanh.f32 %v312_v31  ;;  %v277_v36 = vadd.f32 %v276_v35, %v147_v33 }
  0xe3   :  { %v315_v37 = vadd.f32 %v886_v24, %v282_v34  ;;  %v377_v33 = vand.u32 127, %v376_v32  ;;  %v1212_v34 = vshrl.u32 %v376_v32, 7 }
  0xe4   :  { %v920_v38 = vpop.f32.mrb[4].mxu1  ;;  %v314_v39 = vadd.f32 %v886_v24, %v277_v36  ;;  %v936_v40 = vpop.f32.mrb[4].mxu0 }
  0xe5   :  { %v157_v41 = vpop.f32.mrb[5].mxu1  ;;  %964 = vtanh.f32 %v315_v37  ;;  %v292_v42 = vadd.f32 %v936_v40, %v920_v38  ;;  %v286_v43 = vpop.f32.mrb[5].mxu0  ;;  %v1215_v36 = vsub.s32 %v377_v33, %v1212_v34  ;;  %v456_v32 = vsub.s32 6, %v1212_v34 }
  0xe6   :  { %966 = vtanh.f32 %v314_v39  ;;  %v287_v44 = vadd.f32 %v286_v43, %v157_v41 }
  0xe7   :  { %v317_v45 = vadd.f32 %v886_v24, %v292_v42 }
  0xe8   :  { %v923_v46 = vpop.f32.mrb[6].mxu1  ;;  %v316_v47 = vadd.f32 %v886_v24, %v287_v44  ;;  %v939_v48 = vpop.f32.mrb[6].mxu0 }
  0xe9   :  { %v167_v49 = vpop.f32.mrb[7].mxu1  ;;  %968 = vtanh.f32 %v317_v45  ;;  %v302_v50 = vadd.f32 %v939_v48, %v923_v46  ;;  %v296_v51 = vpop.f32.mrb[7].mxu0 }
  0xea   :  { %970 = vtanh.f32 %v316_v47  ;;  %v297_v53 = vadd.f32 %v296_v51, %v167_v49 }
  0xeb   :  { %v961_v54 = vpop.eup %960  ;;  %v319_v55 = vadd.f32 %v886_v24, %v302_v50 }
  0xec   :  { %v963_v56 = vpop.eup %962  ;;  %v318_v57 = vadd.f32 %v886_v24, %v297_v53  ;;  %v336_v58 = vmul.f32 %v961_v54, %v887_v52 }
  0xed   :  { %972 = vtanh.f32 %v319_v55  ;;  %v335_v60 = vmul.f32 %v963_v56, %v887_v52 }
  0xee   :  { %974 = vtanh.f32 %v318_v57  ;;  %v347_v59 = vsel %vm343_vm1, %v336_v58, 0.0 }
  0xef   :  { %v965_v61 = vpop.eup %964  ;;  %348 = vadd.xlane.f32.xlu0 %v347_v59  ;;  %v344_v1 = vsel %vm343_vm1, %v335_v60, 0.0  ;;  %v1032_v60 = vmov 0  }
  0xf0   :  { %v967_v62 = vpop.eup %966  ;;  %v338_v63 = vmul.f32 %v965_v61, %v887_v52  ;;  %959 = vset.pattern.permute.xlu0 %v1032_v60  ;;  %958 = vset.pattern.permute.xlu1 %v1032_v60  ;;  %v432_v61 = vsub.s32 0, %v1212_v34 }
  0xf1   :  { %v337_v2 = vmul.f32 %v967_v62, %v887_v52  ;;  %v436_v62 = vsub.s32 1, %v1212_v34 }
  0xf2   :  { %v353_v0 = vsel %vm343_vm1, %v338_v63, 0.0  ;;  %v440_v63 = vsub.s32 2, %v1212_v34 }
  0xf3   :  { %v969_v3 = vpop.eup %968  ;;  %354 = vadd.xlane.f32.xlu1 %v353_v0  ;;  %345 = vadd.xlane.f32.xlu0 %v344_v1  ;;  %v350_v22 = vsel %vm343_vm1, %v337_v2, 0.0  ;;  %v444_v0 = vsub.s32 3, %v1212_v34 }
  0xf4   :  { %v971_v4 = vpop.eup %970  ;;  %v340_v23 = vmul.f32 %v969_v3, %v887_v52 }
  0xf5   :  { %v339_v7 = vmul.f32 %v971_v4, %v887_v52 }
  0xf6   :  { %v359_v28 = vsel %vm343_vm1, %v340_v23, 0.0 }
  0xf7   :  { %v973_v24 = vpop.eup %972  ;;  %351 = vadd.xlane.f32.xlu1 %v350_v22  ;;  %v356_v25 = vsel %vm343_vm1, %v339_v7, 0.0  ;;  %v448_v7 = vsub.s32 4, %v1212_v34 }
  0xf8   :  { %v975_v26 = vpop.eup %974  ;;  %357 = vadd.xlane.f32.xlu0 %v356_v25  ;;  %v342_v29 = vmul.f32 %v973_v24, %v887_v52 }
  0xf9   :  { %v341_v27 = vmul.f32 %v975_v26, %v887_v52 }
  0xfa   :  { %v365_v31 = vsel %vm343_vm1, %v342_v29, 0.0 }
  0xfb   :  { %360 = vadd.xlane.f32.xlu1 %v359_v28  ;;  %v362_v30 = vsel %vm343_vm1, %v341_v27, 0.0  ;;  %v452_v28 = vsub.s32 5, %v1212_v34 }
  0xfc   :  { %363 = vadd.xlane.f32.xlu0 %v362_v30 }
  0xff   :  { %366 = vadd.xlane.f32.xlu1 %v365_v31 }
 0x17c   :  { %v349_v35 = vpop.xlane.xlu0 %348 }
 0x17d   :  { %v385_v40 = vrot.slane %v349_v35, %v1215_v36 }
 0x180   :  { %v355_v37 = vpop.xlane.xlu1 %354  ;;  %v346_v38 = vpop.xlane.xlu0 %345 }
 0x181   :  { %v381_v39 = vrot.slane %v346_v38, %v1215_v36  ;;  %v393_v44 = vrot.slane %v355_v37, %v1215_v36 }
 0x183   :  { %v411_v45 = vsel %vm410_vm2, %v385_v40, %v381_v39 }
 0x184   :  { %v352_v41 = vpop.xlane.xlu1 %351 }
 0x185   :  { %v389_v42 = vrot.slane %v352_v41, %v1215_v36  ;;  %v358_v43 = vpop.xlane.xlu0 %357 }
 0x186   :  { %v397_v46 = vrot.slane %v358_v43, %v1215_v36 }
 0x187   :  { %v413_v47 = vsel %vm412_vm3, %v389_v42, %v411_v45 }
 0x188   :  { %v415_v48 = vsel %vm414_vm4, %v393_v44, %v413_v47  ;;  %v361_v49 = vpop.xlane.xlu1 %360 }
 0x189   :  { %v417_v50 = vsel %vm416_vm5, %v397_v46, %v415_v48  ;;  %v401_v51 = vrot.slane %v361_v49, %v1215_v36  ;;  %v364_v52 = vpop.xlane.xlu0 %363 }
 0x18a   :  { %v405_v53 = vrot.slane %v364_v52, %v1215_v36 }
 0x18b   :  { %v419_v54 = vsel %vm418_vm6, %v401_v51, %v417_v50 }
 0x18c   :  { %v367_v55 = vpop.xlane.xlu1 %366  ;;  %v421_v57 = vsel %vm420_vm7, %v405_v53, %v419_v54 }
 0x18d   :  { %v409_v56 = vrot.slane %v367_v55, %v1215_v36 }
 0x18f   :  { %v423_v58 = vsel %vm422_vm8, %v409_v56, %v421_v57 }
 0x190   :  { %v426_v59 = vsel %vm425_vm9, %v423_v58, -inf }
 0x191   :  { %427 = vmax.xlane.f32.xlu0 %v426_v59 }
 0x21e   :  { %v428_v1 = vpop.xlane.xlu0 %427 }
 0x21f   :  { %v433_v2 = vrot.slane %v428_v1, %v432_v61  ;;  %v437_v3 = vrot.slane %v428_v1, %v436_v62  ;;  %v441_v4 = vrot.slane %v428_v1, %v440_v63  ;;  %v445_v22 = vrot.slane %v428_v1, %v444_v0 }
 0x220   :  { %v449_v29 = vrot.slane %v428_v1, %v448_v7  ;;  %v453_v33 = vrot.slane %v428_v1, %v452_v28  ;;  %v457_v40 = vrot.slane %v428_v1, %v456_v32 }
 0x221   :  { %v470_v23 = vsub.f32 %v346_v38, %v433_v2  ;;  %v471_v24 = vsub.f32 %v349_v35, %v437_v3  ;;  %v472_v25 = vsub.f32 %v352_v41, %v441_v4  ;;  %v473_v30 = vsub.f32 %v355_v37, %v445_v22 }
 0x222   :  { %v474_v39 = vsub.f32 %v358_v43, %v449_v29  ;;  %v460_v38 = vsub.s32 7, %v1212_v34  ;;  %v475_v41 = vsub.f32 %v361_v49, %v453_v33  ;;  %v476_v46 = vsub.f32 %v364_v52, %v457_v40 }
 0x223   :  { %v478_v26 = vmul.f32 1.442695, %v470_v23  ;;  %v480_v27 = vmul.f32 1.442695, %v471_v24  ;;  %v482_v31 = vmul.f32 1.442695, %v472_v25 }
 0x224   :  { %v484_v35 = vmul.f32 1.442695, %v473_v30  ;;  %v486_v42 = vmul.f32 1.442695, %v474_v39  ;;  %v461_v45 = vrot.slane %v428_v1, %v460_v38  ;;  %v488_v43 = vmul.f32 1.442695, %v475_v41 }
 0x225   :  { %976 = vpow2.f32 %v478_v26  ;;  %v490_v49 = vmul.f32 1.442695, %v476_v46 }
 0x226   :  { %978 = vpow2.f32 %v480_v27  ;;  %v477_v48 = vsub.f32 %v367_v55, %v461_v45 }
 0x227   :  { %980 = vpow2.f32 %v482_v31 }
 0x228   :  { %982 = vpow2.f32 %v484_v35  ;;  %v492_v51 = vmul.f32 1.442695, %v477_v48 }
 0x229   :  { %984 = vpow2.f32 %v486_v42 }
 0x22a   :  { %986 = vpow2.f32 %v488_v43 }
 0x22b   :  { %988 = vpow2.f32 %v490_v49 }
 0x22c   :  { %990 = vpow2.f32 %v492_v51 }
 0x22f   :  { %v977_v37 = vpop.eup %976 }
 0x230   :  { %v1255_v44 = vpop.eup %978  ;;  %503 = vperm.xlu1 %958, %v977_v37  }
 0x231   :  { %506 = vperm.xlu0 %959, %v1255_v44   ;;  %v1260_v47 = vpop.eup %980 }
 0x232   :  { %v1263_v50 = vpop.eup %982 }
 0x233   :  { %v1266_v53 = vpop.eup %984 }
 0x234   :  { %509 = vperm.xlu1 %958, %v1260_v47   ;;  %v1269_v52 = vpop.eup %986 }
 0x235   :  { %v1272_v54 = vpop.eup %988 }
 0x236   :  { %v1275_v55 = vpop.eup %990 }
 0x238   :  { %512 = vperm.xlu1 %958, %v1263_v50  }
 0x23c   :  { %515 = vperm.xlu1 %958, %v1266_v53  }
 0x240   :  { %518 = vperm.xlu1 %958, %v1269_v52  }
 0x244   :  { %521 = vperm.xlu1 %958, %v1272_v54  }
 0x248   :  { %524 = vperm.xlu1 %958, %v1275_v55  }
 0x2af   :  { %v504_v56 = vpop.permute.xlu1 %503 }
 0x2b0   :  { %v507_v60 = vpop.permute.xlu0 %506  ;;  %v529_v3 = vrot.slane %v504_v56, %v1215_v36 }
 0x2b1   :  { %v533_v2 = vrot.slane %v507_v60, %v1215_v36 }
 0x2b3   :  { %v510_v57 = vpop.permute.xlu1 %509  ;;  %v558_v25 = vsel %vm410_vm2, %v533_v2, %v529_v3 }
 0x2b4   :  { %v537_v4 = vrot.slane %v510_v57, %v1215_v36 }
 0x2b6   :  { %v559_v27 = vsel %vm412_vm3, %v537_v4, %v558_v25 }
 0x2b7   :  { %v513_v58 = vpop.permute.xlu1 %512 }
 0x2b8   :  { %v541_v22 = vrot.slane %v513_v58, %v1215_v36 }
 0x2ba   :  { %v560_v30 = vsel %vm414_vm4, %v541_v22, %v559_v27 }
 0x2bb   :  { %v516_v59 = vpop.permute.xlu1 %515 }
 0x2bc   :  { %v545_v23 = vrot.slane %v516_v59, %v1215_v36 }
 0x2be   :  { %v561_v31 = vsel %vm416_vm5, %v545_v23, %v560_v30 }
 0x2bf   :  { %v519_v1 = vpop.permute.xlu1 %518 }
 0x2c0   :  { %v549_v26 = vrot.slane %v519_v1, %v1215_v36 }
 0x2c2   :  { %v562_v39 = vsel %vm418_vm6, %v549_v26, %v561_v31 }
 0x2c3   :  { %v522_v24 = vpop.permute.xlu1 %521 }
 0x2c4   :  { %v553_v29 = vrot.slane %v522_v24, %v1215_v36 }
 0x2c6   :  { %v563_v40 = vsel %vm420_vm7, %v553_v29, %v562_v39 }
 0x2c7   :  { %v525_v33 = vpop.permute.xlu1 %524 }
 0x2c8   :  { %v557_v35 = vrot.slane %v525_v33, %v1215_v36 }
 0x2ca   :  { %v564_v41 = vsel %vm422_vm8, %v557_v35, %v563_v40 }
 0x2cb   :  { %v566_v42 = vsel %vm425_vm9, %v564_v41, 0.0 }
 0x2cc   :  { %567 = vadd.xlane.f32.xlu1 %v566_v42 }
 0x359   :  { %v568_v45 = vpop.xlane.xlu1 %567 }
 0x35a   :  { %v573_v46 = vrot.slane %v568_v45, %v432_v61  ;;  %v577_v43 = vrot.slane %v568_v45, %v436_v62  ;;  %v581_v48 = vrot.slane %v568_v45, %v440_v63  ;;  %v585_v49 = vrot.slane %v568_v45, %v444_v0 }
 0x35b   :  { %v589_v56 = vrot.slane %v568_v45, %v448_v7  ;;  %v593_v61 = vrot.slane %v568_v45, %v452_v28  ;;  %v597_v63 = vrot.slane %v568_v45, %v456_v32  ;;  %v601_v7 = vrot.slane %v568_v45, %v460_v38 }
 0x35c   :  { %992 = vrcp.f32 %v573_v46 }
 0x35d   :  { %994 = vrcp.f32 %v577_v43 }
 0x35e   :  { %996 = vrcp.f32 %v581_v48 }
 0x35f   :  { %998 = vrcp.f32 %v585_v49 }
 0x360   :  { %1000 = vrcp.f32 %v589_v56 }
 0x361   :  { %1002 = vrcp.f32 %v593_v61 }
 0x362   :  { %1004 = vrcp.f32 %v597_v63 }
 0x363   :  { %1006 = vrcp.f32 %v601_v7 }
 0x366   :  { %v993_v51 = vpop.eup %992 }
 0x367   :  { %v611_v57 = vmul.f32 %v993_v51, %v977_v37  ;;  %v995_v58 = vpop.eup %994 }
 0x368   :  { %v613_v62 = vmul.f32 %v995_v58, %v1255_v44  ;;  %v997_v59 = vpop.eup %996 }
 0x369   :  { %628 = vperm.xlu0 %959, %v611_v57   ;;  %v615_v0 = vmul.f32 %v997_v59, %v1260_v47  ;;  %v999_v60 = vpop.eup %998 }
 0x36a   :  { %v617_v37 = vmul.f32 %v999_v60, %v1263_v50  ;;  %v1001_v1 = vpop.eup %1000 }
 0x36b   :  { %v619_v28 = vmul.f32 %v1001_v1, %v1266_v53  ;;  %v1003_v44 = vpop.eup %1002 }
 0x36c   :  { %v621_v2 = vmul.f32 %v1003_v44, %v1269_v52  ;;  %v1005_v32 = vpop.eup %1004 }
 0x36d   :  { %633 = vperm.xlu0 %959, %v613_v62   ;;  %v623_v47 = vmul.f32 %v1005_v32, %v1272_v54  ;;  %v1007_v3 = vpop.eup %1006 }
 0x36e   :  { %v625_v34 = vmul.f32 %v1007_v3, %v1275_v55 }
 0x371   :  { %638 = vperm.xlu0 %959, %v615_v0  }
 0x375   :  { %643 = vperm.xlu0 %959, %v617_v37  }
 0x379   :  { %648 = vperm.xlu0 %959, %v619_v28  }
 0x37d   :  { %653 = vperm.xlu0 %959, %v621_v2  }
 0x381   :  { %658 = vperm.xlu0 %959, %v623_v47  }
 0x385   :  { %663 = vperm.xlu0 %959, %v625_v34  }
 0x3e8   :  { %v629_v38 = vpop.permute.xlu0 %628 }
 0x3e9   :  { %v666_v50 = vmul.f32 %v629_v38, %v1094_v6  ;;  %v739_v4 = vmul.f32 %v629_v38, %v1089_v5  ;;  %v814_v29 = vrot.slane %v629_v38, %v1215_v36 }
 0x3eb   :  { %v674_v53 = vsel %vm46_vm0, %v666_v50, 0.0  ;;  %v747_v22 = vsel %vm46_vm0, %v739_v4, 0.0 }
 0x3ec   :  { %v675_v23 = vrot.slane %v674_v53, 4  ;;  %v748_v52 = vrot.slane %v747_v22, 4  ;;  %v634_v24 = vpop.permute.xlu0 %633 }
 0x3ed   :  { %v667_v25 = vmul.f32 %v634_v24, %v1108_v9  ;;  %v740_v54 = vmul.f32 %v634_v24, %v1103_v8  ;;  %v818_v26 = vrot.slane %v634_v24, %v1215_v36 }
 0x3ee   :  { %v676_v55 = vadd.f32 %v675_v23, %v674_v53  ;;  %v749_v27 = vadd.f32 %v748_v52, %v747_v22 }
 0x3ef   :  { %v681_v6 = vsel %vm46_vm0, %v667_v25, 0.0  ;;  %v754_v5 = vsel %vm46_vm0, %v740_v54, 0.0  ;;  %v843_v40 = vsel %vm410_vm2, %v818_v26, %v814_v29 }
 0x3f0   :  { %v677_v30 = vrot.slane %v676_v55, 2  ;;  %v750_v31 = vrot.slane %v749_v27, 2  ;;  %v682_v33 = vrot.slane %v681_v6, 4  ;;  %v755_v39 = vrot.slane %v754_v5, 4  ;;  %v639_v35 = vpop.permute.xlu0 %638 }
 0x3f1   :  { %v668_v9 = vmul.f32 %v639_v35, %v1118_v11  ;;  %v741_v8 = vmul.f32 %v639_v35, %v1113_v10  ;;  %v822_v41 = vrot.slane %v639_v35, %v1215_v36 }
 0x3f2   :  { %v678_v42 = vadd.f32 %v677_v30, %v676_v55  ;;  %v751_v45 = vadd.f32 %v750_v31, %v749_v27  ;;  %v683_v46 = vadd.f32 %v682_v33, %v681_v6  ;;  %v756_v43 = vadd.f32 %v755_v39, %v754_v5 }
 0x3f3   :  { %v688_v48 = vsel %vm46_vm0, %v668_v9, 0.0  ;;  %v761_v49 = vsel %vm46_vm0, %v741_v8, 0.0  ;;  %v844_v51 = vsel %vm412_vm3, %v822_v41, %v843_v40 }
 0x3f4   :  { %v679_v56 = vrot.slane %v678_v42, 1  ;;  %v752_v57 = vrot.slane %v751_v45, 1  ;;  %v684_v58 = vrot.slane %v683_v46, 2  ;;  %v757_v61 = vrot.slane %v756_v43, 2  ;;  %v644_v11 = vpop.permute.xlu0 %643 }
 0x3f5   :  { %v689_v62 = vrot.slane %v688_v48, 4  ;;  %v762_v10 = vrot.slane %v761_v49, 4  ;;  %v669_v59 = vmul.f32 %v644_v11, %v1136_v13  ;;  %v742_v63 = vmul.f32 %v644_v11, %v1129_v12 }
 0x3f6   :  { %v680_v0 = vadd.f32 %v679_v56, %v678_v42  ;;  %v753_v60 = vadd.f32 %v752_v57, %v751_v45  ;;  %v685_v7 = vadd.f32 %v684_v58, %v683_v46  ;;  %v758_v37 = vadd.f32 %v757_v61, %v756_v43 }
 0x3f7   :  { %v690_v1 = vadd.f32 %v689_v62, %v688_v48  ;;  %v763_v28 = vadd.f32 %v762_v10, %v761_v49  ;;  %v695_v44 = vsel %vm46_vm0, %v669_v59, 0.0  ;;  %v768_v2 = vsel %vm46_vm0, %v742_v63, 0.0 }
 0x3f8   :  { %731 = vst.msk [vmem:[%s1452_s6] sm:$0x1] %vm730_vm10, %v680_v0  ;;  %803 = vst.msk [vmem:[%s1452_s6 + $0x1] sm:$0x1] %vm730_vm10, %v753_v60  ;;  %v686_v12 = vrot.slane %v685_v7, 1  ;;  %v759_v13 = vrot.slane %v758_v37, 1  ;;  %v649_v3 = vpop.permute.xlu0 %648  ;;  %v826_v50 = vrot.slane %v644_v11, %v1215_v36 }
 0x3f9   :  { %v696_v32 = vrot.slane %v695_v44, 4  ;;  %v769_v47 = vrot.slane %v768_v2, 4  ;;  %v691_v34 = vrot.slane %v690_v1, 2  ;;  %v764_v38 = vrot.slane %v763_v28, 2 }
 0x3fa   :  { %v670_v4 = vmul.f32 %v649_v3, %v1146_v15  ;;  %v687_v53 = vadd.f32 %v686_v12, %v685_v7  ;;  %v760_v22 = vadd.f32 %v759_v13, %v758_v37  ;;  %v845_v54 = vsel %vm414_vm4, %v826_v50, %v844_v51 }
 0x3fb   :  { %v697_v23 = vadd.f32 %v696_v32, %v695_v44  ;;  %v770_v52 = vadd.f32 %v769_v47, %v768_v2  ;;  %v692_v24 = vadd.f32 %v691_v34, %v690_v1  ;;  %v765_v25 = vadd.f32 %v764_v38, %v763_v28 }
 0x3fc   :  { %v702_v26 = vsel %vm46_vm0, %v670_v4, 0.0  ;;  %732 = vst.msk [vmem:[%s1452_s6 + $0x2] sm:$0x1] %vm730_vm10, %v687_v53  ;;  %804 = vst.msk [vmem:[%s1452_s6 + $0x3] sm:$0x1] %vm730_vm10, %v760_v22  ;;  %v743_v29 = vmul.f32 %v649_v3, %v1141_v14  ;;  %v1359_v6 = vpop.permute.xlu0 %653  ;;  %v830_v31 = vrot.slane %v649_v3, %v1215_v36 }
 0x3fd   :  { %v698_v15 = vrot.slane %v697_v23, 2  ;;  %v771_v55 = vrot.slane %v770_v52, 2  ;;  %v703_v27 = vrot.slane %v702_v26, 4  ;;  %v693_v5 = vrot.slane %v692_v24, 1 }
 0x3fe   :  { %v766_v30 = vrot.slane %v765_v25, 1  ;;  %v671_v33 = vmul.f32 %v1359_v6, %v1164_v17  ;;  %v775_v9 = vsel %vm46_vm0, %v743_v29, 0.0  ;;  %v846_v45 = vsel %vm416_vm5, %v830_v31, %v845_v54 }
 0x3ff   :  { %v699_v39 = vadd.f32 %v698_v15, %v697_v23  ;;  %v772_v35 = vadd.f32 %v771_v55, %v770_v52  ;;  %v704_v40 = vadd.f32 %v703_v27, %v702_v26  ;;  %v694_v8 = vadd.f32 %v693_v5, %v692_v24 }
 0x400   :  { %v767_v41 = vadd.f32 %v766_v30, %v765_v25  ;;  %v776_v42 = vrot.slane %v775_v9, 4  ;;  %v709_v48 = vsel %vm46_vm0, %v671_v33, 0.0  ;;  %v659_v49 = vpop.permute.xlu0 %658  ;;  %v744_v56 = vmul.f32 %v1359_v6, %v1157_v16 }
 0x401   :  { %v700_v14 = vrot.slane %v699_v39, 1  ;;  %v773_v46 = vrot.slane %v772_v35, 1  ;;  %v705_v43 = vrot.slane %v704_v40, 2  ;;  %733 = vst.msk [vmem:[%s1452_s6 + $0x4] sm:$0x1] %vm730_vm10, %v694_v8  ;;  %v710_v51 = vrot.slane %v709_v48, 4 }
 0x402   :  { %805 = vst.msk [vmem:[%s1452_s6 + $0x5] sm:$0x1] %vm730_vm10, %v767_v41  ;;  %v777_v17 = vadd.f32 %v776_v42, %v775_v9  ;;  %v834_v57 = vrot.slane %v1359_v6, %v1215_v36  ;;  %v672_v62 = vmul.f32 %v659_v49, %v1174_v19  ;;  %v782_v63 = vsel %vm46_vm0, %v744_v56, 0.0 }
 0x403   :  { %v701_v58 = vadd.f32 %v700_v14, %v699_v39  ;;  %v774_v61 = vadd.f32 %v773_v46, %v772_v35  ;;  %v706_v11 = vadd.f32 %v705_v43, %v704_v40  ;;  %v711_v59 = vadd.f32 %v710_v51, %v709_v48 }
 0x404   :  { %v778_v10 = vrot.slane %v777_v17, 2  ;;  %v745_v0 = vmul.f32 %v659_v49, %v1169_v18  ;;  %v783_v60 = vrot.slane %v782_v63, 4  ;;  %v716_v19 = vsel %vm46_vm0, %v672_v62, 0.0  ;;  %v664_v37 = vpop.permute.xlu0 %663 }
 0x405   :  { %734 = vst.msk [vmem:[%s1452_s6 + $0x6] sm:$0x1] %vm730_vm10, %v701_v58  ;;  %806 = vst.msk [vmem:[%s1452_s6 + $0x7] sm:$0x1] %vm730_vm10, %v774_v61  ;;  %v707_v16 = vrot.slane %v706_v11, 1  ;;  %v838_v7 = vrot.slane %v659_v49, %v1215_v36  ;;  %v712_v28 = vrot.slane %v711_v59, 2  ;;  %v673_v32 = vmul.f32 %v664_v37, %v1192_v21 }
 0x406   :  { %v779_v1 = vadd.f32 %v778_v10, %v777_v17  ;;  %v717_v18 = vrot.slane %v716_v19, 4  ;;  %v789_v44 = vsel %vm46_vm0, %v745_v0, 0.0  ;;  %v784_v12 = vadd.f32 %v783_v60, %v782_v63 }
 0x407   :  { %v708_v2 = vadd.f32 %v707_v16, %v706_v11  ;;  %v790_v13 = vrot.slane %v789_v44, 4  ;;  %v713_v3 = vadd.f32 %v712_v28, %v711_v59  ;;  %v746_v38 = vmul.f32 %v664_v37, %v1185_v20 }
 0x408   :  { %v780_v47 = vrot.slane %v779_v1, 1  ;;  %v718_v34 = vadd.f32 %v717_v18, %v716_v19  ;;  %v785_v50 = vrot.slane %v784_v12, 2  ;;  %v723_v53 = vsel %vm46_vm0, %v673_v32, 0.0 }
 0x409   :  { %735 = vst.msk [vmem:[%s1452_s6 + $0x8] sm:$0x1] %vm730_vm10, %v708_v2  ;;  %v791_v4 = vadd.f32 %v790_v13, %v789_v44  ;;  %v842_v22 = vrot.slane %v664_v37, %v1215_v36  ;;  %v714_v52 = vrot.slane %v713_v3, 1  ;;  %v724_v21 = vrot.slane %v723_v53, 4 }
 0x40a   :  { %v781_v23 = vadd.f32 %v780_v47, %v779_v1  ;;  %v719_v24 = vrot.slane %v718_v34, 2  ;;  %v786_v25 = vadd.f32 %v785_v50, %v784_v12  ;;  %v796_v20 = vsel %vm46_vm0, %v746_v38, 0.0 }
 0x40b   :  { %v792_v54 = vrot.slane %v791_v4, 2  ;;  %v847_v26 = vsel %vm418_vm6, %v834_v57, %v846_v45  ;;  %v715_v15 = vadd.f32 %v714_v52, %v713_v3  ;;  %v725_v36 = vadd.f32 %v724_v21, %v723_v53 }
 0x40c   :  { %807 = vst.msk [vmem:[%s1452_s6 + $0x9] sm:$0x1] %vm730_vm10, %v781_v23  ;;  %v720_v55 = vadd.f32 %v719_v24, %v718_v34  ;;  %v797_v27 = vrot.slane %v796_v20, 4  ;;  %v787_v29 = vrot.slane %v786_v25, 1  ;;  %v848_v5 = vsel %vm420_vm7, %v838_v7, %v847_v26 }
 0x40d   :  { %v793_v6 = vadd.f32 %v792_v54, %v791_v4  ;;  %736 = vst.msk [vmem:[%s1452_s6 + $0xa] sm:$0x1] %vm730_vm10, %v715_v15  ;;  %v726_v31 = vrot.slane %v725_v36, 2  ;;  %v849_v39 = vsel %vm422_vm8, %v842_v22, %v848_v5 }
 0x40e   :  { %v721_v30 = vrot.slane %v720_v55, 1  ;;  %v798_v33 = vadd.f32 %v797_v27, %v796_v20  ;;  %v788_v35 = vadd.f32 %v787_v29, %v786_v25  ;;  %851 = vst.msk [vmem:[#allocation2] sm:$0xff] %vm425_vm9, %v849_v39 }
 0x40f   :  { %v794_v40 = vrot.slane %v793_v6, 1  ;;  %v727_v8 = vadd.f32 %v726_v31, %v725_v36 }
 0x410   :  { %v722_v9 = vadd.f32 %v721_v30, %v720_v55  ;;  %v799_v41 = vrot.slane %v798_v33, 2 }
 0x411   :  { %1019 = shalt.err (!%p1016_p4)
}
 0x412   :  { %s1020_s0 = scalar_lea.hbm %s1453_s7, 128 }
 0x413   :  { %p1021_p5 = scmp.ne.s32.totalorder %s1453_s7, %s1020_s0  ;;  %p1024_p6 = scmp.lt.u32.totalorder %s1020_s0, %s1453_s7 }
 0x415   :  { %p1026_p7 = pnand %p1024_p6, %p1021_p5 }
 0x417   :  { %1029 = shalt.err (!%p1026_p7)
}
 0x418   :  { %863 = dma.vmem_to_hbm [thread:$0]  %s861_s10, 128, %s1453_s7, [#allocation3]   ;;  %808 = vst.msk [vmem:[%s1452_s6 + $0xb] sm:$0x1] %vm730_vm10, %v788_v35  ;;  %v795_v42 = vadd.f32 %v794_v40, %v793_v6  ;;  %737 = vst.msk [vmem:[%s1452_s6 + $0xc] sm:$0x1] %vm730_vm10, %v722_v9  ;;  %v800_v14 = vadd.f32 %v799_v41, %v798_v33 }
 0x419   :  { %v728_v45 = vrot.slane %v727_v8, 1 }
 0x41a   :  { %809 = vst.msk [vmem:[%s1452_s6 + $0xd] sm:$0x1] %vm730_vm10, %v795_v42  ;;  %v801_v43 = vrot.slane %v800_v14, 1 }
 0x41b   :  { %v729_v46 = vadd.f32 %v728_v45, %v727_v8 }
 0x41c   :  { %v802_v48 = vadd.f32 %v801_v43, %v800_v14 }
 0x41d   :  { %738 = vst.msk [vmem:[%s1452_s6 + $0xe] sm:$0x1] %vm730_vm10, %v729_v46 }
 0x41e   :  { %810 = vst.msk [vmem:[%s1452_s6 + $0xf] sm:$0x1] %vm730_vm10, %v802_v48 }
 0x41f   :  { %1030 = dma.done.wait [#allocation3], 128  }
 0x420   :  { %1031 = vsyncadd [#allocation3], 4294967168 }
 0x421   :  { %869 = vsyncpa [#allocation3], 1 }

// kernel: hgrulwan_forward.4
= control target key start
LH: loop header
LB: loop body
LE: loop exit
PB: predicated region body
PF: predicated region fallthrough
CT: control target
= control target key end

     0   :  { %s3622_s12 = smov 0   ;;  %s3624_s13 = smov 0   ;;  %s4049_s0 = inlined_call_operand.vmem [shape: f32[2,8,3,8,16], index: 0, kind: input, shape index: {}]   ;;  %s4050_s1 = inlined_call_operand.vmem [shape: f32[2,3,16,16], index: 1, kind: input, shape index: {}]   ;;  %s4051_s2 = inlined_call_operand.vmem [shape: f32[2,3,1,16], index: 2, kind: input, shape index: {}]   ;;  %s4052_s3 = inlined_call_operand.vmem [shape: f32[2,8,8,16], index: 3, kind: output, shape index: {}]  }
   0x1   :  { %s3626_s14 = smov 0  }
   0x2 LB: > { %s32_s15 = sadd.s32 1, %s3592_s13  ;;  %p3020_p0 = scmp.ge.s32.totalorder %s3596_s14, 1  ;;  %s3596_s14 = sphi %s3626_s14, %s13_s14   ;;  %s3592_s13 = sphi %s3624_s13, %s4054_s13   ;;  %s3588_s12 = sphi %s3622_s12, %s4053_s12  }
   0x3   : > { %p34_p1 = scmp.ge.s32.totalorder %s32_s15, 2  ;;  %p216_p2 = scmp.lt.s32.totalorder %s3596_s14, 3 }
   0x5   : > { %s4056_s15 = smov (%p34_p1, %s32_s15), 0  ;;  %p217_p3 = pnand %p3020_p0, %p216_p2 }
   0x6   : > { %p277_p4 = scmp.lt.s32.totalorder (!%p217_p3), %s3588_s12, 1  ;;  %s3025_s16 = sshll.u32 (!%p217_p3), %s3588_s12, 3  ;;  %vm330_vm0 = vcmask (!%p217_p3), 130048   ;;  %v3598_v0 = vmov (!%p217_p3), 0.0|0.0   ;;  %vm3599_vm1 = vmmov (!%p217_p3), 0   ;;  %v3600_v1 = vmov (!%p217_p3), 0.0  }
   0x7   : > { %220 = sbr.rel (%p217_p3) target bundleno = 2124 (0x84c), region = 32  ;;  %3391 = vmatprep.subr.bf16.mxu0 (!%p217_p3), %v3598_v0  ;;  %3227 = vmatprep.mubr.msk.f32.mxu0 (!%p217_p3), %vm3599_vm1, %v3600_v1  ;;  %s3650_s18 = scalar_lea.vmem (!%p217_p3), [#allocation2], %s3025_s16  ;;  %v3601_v38 = vmov (!%p217_p3), 1966171168   ;;  %v612_v40 = vlaneseq (!%p217_p3)  ;;  %vm666_vm2 = vcmask (!%p217_p3), 122880  }
   0x8   : > { %331 = vst.msk [vmem:[%s3650_s18] sm:$0xff] (!%p217_p3), %vm330_vm0, %v3600_v1  ;;  %3394 = vmatprep.subr.bf16.mxu1 (!%p217_p3), %v3598_v0  ;;  %3234 = vmatprep.mubr.msk.f32.mxu1 (!%p217_p3), %vm3599_vm1, %v3600_v1  ;;  %s3033_s25 = smul.u32 (!%p217_p3), 168, %s3588_s12  ;;  %v610_v39 = vunpack.c.l.s4 (!%p217_p3), %v3601_v38  ;;  %s1595_s29 = ssub.s32 (!%p217_p3), 4, %s3588_s12 }
   0x9   : > { %v613_v44 = vshrl.u32 (!%p217_p3), %v612_v40, 7  ;;  %s348_s7 = smul.u32 (!%p217_p3), 7, %s3588_s12 }
   0xa   : > { %v611_v43 = vunpack.c.0.s8 (!%p217_p3), %v610_v39  ;;  %s3042_s16 = smul.u32 (!%p217_p3), 120, %s3588_s12 }
   0xb   : > { %s3059_s21 = smul.u32 (!%p217_p3), 72, %s3588_s12 }
   0xc   : > { %v3716_v48 = vsub.s32 (!%p217_p3), %v611_v43, %v613_v44  ;;  %s1596_s30 = smul.u32 (!%p217_p3), 24, %s1595_s29 }
   0xd   : > { %s2945_s8 = smul.u32 (!%p217_p3), 4294967293, %s3588_s12 }
   0xe   : > { %s3648_s17 = scalar_select %p277_p4, %s3588_s12, 1 }
   0xf   : > { %v3668_v10 = vld [vmem:[%s3650_s18] sm:$0xff] }
  0x10   : > { %s3464_s19 = smul.u32 48, %s3648_s17  ;;  %s3150_s6 = sshll.u32 %s3648_s17, 6 }
  0x11   : > { %s3463_s23 = smul.u32 192, %s3648_s17  ;;  %s3724_s10 = scalar_lea.vmem %s4052_s3, %s3150_s6 }
  0x12   : > { %s298_s22 = scalar_lea.vmem %s4050_s1, %s3464_s19  ;;  %s3465_s24 = smul.u32 3, %s3648_s17 }
  0x13   : > { %v332_v2 = vld [vmem:[%s298_s22] sm:$0xff]  ;;  %v333_v3 = vld [vmem:[%s298_s22 + $0x8] sm:$0xff]  ;;  %v3026_v4 = vld [vmem:[%s298_s22 + $0x10] sm:$0xff]  ;;  %s3699_s28 = scalar_lea.vmem %s4049_s0, %s3463_s23  ;;  %s665_s11 = scalar_lea.vmem %s3724_s10, %s348_s7 }
  0x14   : > { %v3662_v5 = vpack.c.bf16 %v333_v3, %v332_v2  ;;  %v3027_v6 = vld [vmem:[%s298_s22 + $0x18] sm:$0xff]  ;;  %v3028_v7 = vld [vmem:[%s298_s22 + $0x20] sm:$0xff]  ;;  %v3029_v8 = vld [vmem:[%s298_s22 + $0x28] sm:$0xff]  ;;  %s302_s4 = scalar_lea.vmem %s4051_s2, %s3465_s24  ;;  %s350_s5 = scalar_lea.vmem %s3699_s28, %s3033_s25 }
  0x15   : > { %v3664_v9 = vpack.c.bf16 %v3027_v6, %v3026_v4  ;;  %v3670_v11 = vpack.c.bf16 %v3029_v8, %v3028_v7  ;;  %v3705_v12 = vld [vmem:[%s302_s4] ss:$0 sm:$0xff]  ;;  %v3707_v13 = vld [vmem:[%s302_s4 + $0x1] ss:$0 sm:$0xff]  ;;  %v352_v18 = vld [vmem:[%s350_s5 + $0x8] sm:$0xff]  ;;  %s2921_s17 = scalar_lea.vmem %s3699_s28, %s3042_s16  ;;  %s2923_s19 = smul.u32 5, %s3588_s12 }
  0x16   : > { %3393 = vmatpush3.bf16.msra.mxu0 %v3662_v5  ;;  %v351_v14 = vld [vmem:[%s350_s5] sm:$0xff]  ;;  %v353_v35 = vld [vmem:[%s350_s5 + $0x10] sm:$0xff]  ;;  %v3043_v63 = vld [vmem:[%s2921_s17 + $0x18] sm:$0xff]  ;;  %s2928_s22 = scalar_lea.vmem %s3699_s28, %s3059_s21  ;;  %s2930_s23 = smul.u32 3, %s3588_s12 }
  0x17   : > { %3396 = vmatpush3.bf16.msra.mxu1 %v3664_v9  ;;  %3397 = vmatprep.subr.bf16.mxu0 %v3598_v0  ;;  %v3711_v31 = vld [vmem:[%s302_s4 + $0x2] ss:$0 sm:$0xff]  ;;  %s2924_s20 = scalar_lea.vmem %s3724_s10, %s2923_s19  ;;  %s2933_s25 = smul.u32 24, %s3588_s12 }
  0x18   : > { %3400 = vmatprep.subr.bf16.mxu1 %v3598_v0  ;;  %s2931_s24 = scalar_lea.vmem %s3724_s10, %s2930_s23  ;;  %s2936_s27 = scalar_lea.vmem %s3724_s10, %s3588_s12 }
  0x19   : > { %3228 = vmatmul.mubr.msk.f32.vlgmr.msra.gmra.mrb[0].mxu0 %vm330_vm0, %v3668_v10  ;;  %s2934_s26 = scalar_lea.vmem %s3699_s28, %s2933_s25  ;;  %s1597_s4 = scalar_lea.vmem %s3699_s28, %s1596_s30 }
  0x1a   : > { %3235 = vmatmul.mubr.msk.f32.vlgmr.msra.gmra.mrb[0].mxu1 %vm330_vm0, %v3668_v10  ;;  %3399 = vmatpush3.bf16.msra.mxu0 %v3670_v11  ;;  %s1892_s5 = scalar_lea.vmem %s3724_s10, %s1595_s29  ;;  %s3097_s6 = smul.u32 4294967224, %s3588_s12 }
  0x1b   : > { %3241 = vmatprep.mubr.msk.f32.mxu0 %vm3599_vm1, %v3600_v1  ;;  %3402 = vmatpush3.bf16.msra.mxu1 %v3662_v5  ;;  %s2946_s9 = scalar_lea.vmem %s3724_s10, %s2945_s8 }
  0x1c   : > { %3403 = vmatprep.subr.bf16.mxu0 %v3598_v0  ;;  %3248 = vmatprep.mubr.msk.f32.mxu1 %vm3599_vm1, %v3600_v1  ;;  %s2943_s7 = scalar_lea.vmem %s3699_s28, %s3097_s6 }
  0x1d   : > { %3242 = vmatmul.mubr.msk.f32.vlgmr.msra.gmra.mrb[2].mxu0 %vm330_vm0, %v3668_v10  ;;  %3406 = vmatprep.subr.bf16.mxu1 %v3598_v0 }
  0x1e   : > { %3405 = vmatpush3.bf16.msra.mxu0 %v3664_v9  ;;  %3255 = vmatprep.mubr.msk.f32.mxu0 %vm3599_vm1, %v3600_v1 }
  0x1f   : > { %3409 = vmatprep.subr.bf16.mxu0 %v3598_v0 }
  0xec   : > { %v430_v15 = vpop.f32.mrb[0].mxu0 }
  0xed   : > { %v431_v16 = vadd.f32 %v3705_v12, %v430_v15  ;;  %v3229_v17 = vpop.f32.mrb[1].mxu0  ;;  %v506_v19 = vpop.f32.mrb[0].mxu1 }
  0xee   : > { %v507_v20 = vadd.f32 %v3707_v13, %v506_v19  ;;  %v3236_v21 = vpop.f32.mrb[1].mxu1 }
  0xef   : > { %v586_v22 = vadd.f32 %v431_v16, %v351_v14  ;;  %v3044_v14 = vld [vmem:[%s2921_s17 + $0x20] sm:$0xff] }
  0xf0   : > { %v593_v23 = vadd.f32 %v507_v20, %v352_v18  ;;  %v582_v24 = vpop.f32.mrb[2].mxu0 }
  0xf1   : > { %v3040_v25 = vmul.f32 -1.442695, %v586_v22  ;;  %v3243_v26 = vpop.f32.mrb[3].mxu0  ;;  %v583_v33 = vadd.f32 %v3711_v31, %v582_v24 }
  0xf2   : > { %v3041_v27 = vmul.f32 -1.442695, %v593_v23  ;;  %v3045_v26 = vld [vmem:[%s2921_s17 + $0x28] sm:$0xff]  ;;  %s2952_s17 = smul.u32 4294967291, %s3588_s12 }
  0xf3   : > { %3494 = vpow2.f32 %v3040_v25 }
  0xf4   : > { %3496 = vpow2.f32 %v3041_v27  ;;  %s2953_s19 = scalar_lea.vmem %s3724_s10, %s2952_s17 }
  0xfd   : > { %v3495_v28 = vpop.eup %3494 }
  0xfe   : > { %v590_v29 = vadd.f32 1.0, %v3495_v28  ;;  %v3497_v30 = vpop.eup %3496 }
  0xff   : > { %v597_v32 = vadd.f32 1.0, %v3497_v30 }
 0x100   : > { %3498 = vrcp.f32 %v590_v29 }
 0x101   : > { %3500 = vrcp.f32 %v597_v32 }
 0x10a   : > { %v3499_v34 = vpop.eup %3498 }
 0x10b   : > { %v600_v36 = vmul.f32 %v3499_v34, %v583_v33  ;;  %v3501_v41 = vpop.eup %3500 }
 0x10c   : > { %v603_v42 = vsub.f32 1.0, %v3501_v41  ;;  %v605_v46 = vmul.f32 %v3501_v41, %v3668_v10 }
 0x10d   : > { %v601_v37 = vadd.f32 %v600_v36, %v353_v35 }
 0x10f   : > { %3502 = vtanh.f32 %v601_v37 }
 0x119   : > { %v3503_v45 = vpop.eup %3502 }
 0x11a   : > { %v604_v47 = vmul.f32 %v3503_v45, %v603_v42 }
 0x11c   : > { %v3719_v49 = vadd.f32 %v605_v46, %v604_v47 }
 0x11e   : > { %v608_v50 = vcombine.high %v3719_v49, %v3719_v49  ;;  %v615_v51 = vrot.slane %v3719_v49, %v3716_v48  ;;  %3249 = vmatmul.mubr.msk.f32.vlgmr.msra.gmra.mrb[2].mxu1 %vm330_vm0, %v3719_v49  ;;  %3256 = vmatmul.mubr.msk.f32.vlgmr.msra.gmra.mrb[4].mxu0 %vm330_vm0, %v3719_v49 }
 0x11f   : > { %3408 = vmatpush3.bf16.msra.mxu1 %v3670_v11  ;;  %3262 = vmatprep.mubr.msk.f32.mxu1 %vm3599_vm1, %v3600_v1 }
 0x120   : > { %v622_v52 = vrot.slane %v608_v50, %v3716_v48  ;;  %v623_v53 = vcombine.high %v615_v51, %v615_v51  ;;  %v631_v54 = vrot.slane %v615_v51, %v3716_v48  ;;  %3411 = vmatpush3.bf16.msra.mxu0 %v3662_v5  ;;  %3412 = vmatprep.subr.bf16.mxu1 %v3598_v0  ;;  %v3060_v50 = vld [vmem:[%s2928_s22 + $0x30] sm:$0xff] }
 0x121   : > { %3269 = vmatprep.mubr.msk.f32.mxu0 %vm3599_vm1, %v3600_v1  ;;  %3415 = vmatprep.subr.bf16.mxu0 %v3598_v0 }
 0x122   : > { %v624_v55 = vcombine.high %v622_v52, %v622_v52  ;;  %v638_v56 = vrot.slane %v622_v52, %v3716_v48  ;;  %v645_v57 = vrot.slane %v623_v53, %v3716_v48  ;;  %v653_v58 = vcombine.high %v631_v54, %v631_v54  ;;  %3263 = vmatmul.mubr.msk.f32.vlgmr.msra.gmra.mrb[4].mxu1 %vm330_vm0, %v3719_v49 }
 0x123   : > { %667 = vst.msk [vmem:[%s665_s11] sm:$0x1] %vm666_vm2, %v631_v54  ;;  %3414 = vmatpush3.bf16.msra.mxu1 %v3664_v9  ;;  %3276 = vmatprep.mubr.msk.f32.mxu1 %vm3599_vm1, %v3600_v1 }
 0x124   : > { %v652_v59 = vrot.slane %v624_v55, %v3716_v48  ;;  %v654_v60 = vcombine.high %v638_v56, %v638_v56  ;;  %v655_v61 = vcombine.high %v645_v57, %v645_v57  ;;  %3418 = vmatprep.subr.bf16.mxu1 %v3598_v0  ;;  %668 = vst.msk [vmem:[%s665_s11 + $0x8] sm:$0x1] %vm666_vm2, %v645_v57  ;;  %669 = vst.msk [vmem:[%s665_s11 + $0x10] sm:$0x1] %vm666_vm2, %v653_v58  ;;  %v3061_v58 = vld [vmem:[%s2928_s22 + $0x38] sm:$0xff] }
 0x125   : > { %671 = vst.msk [vmem:[%s665_s11 + $0x20] sm:$0x1] %vm666_vm2, %v638_v56 }
 0x126   : > { %v656_v62 = vcombine.high %v652_v59, %v652_v59  ;;  %670 = vst.msk [vmem:[%s665_s11 + $0x18] sm:$0x1] %vm666_vm2, %v655_v61  ;;  %672 = vst.msk [vmem:[%s665_s11 + $0x28] sm:$0x1] %vm666_vm2, %v652_v59 }
 0x127   : > { %673 = vst.msk [vmem:[%s665_s11 + $0x30] sm:$0x1] %vm666_vm2, %v654_v60 }
 0x128   : > { %674 = vst.msk [vmem:[%s665_s11 + $0x38] sm:$0x1] %vm666_vm2, %v656_v62  ;;  %s3114_s11 = smul.u32 4294967176, %s3588_s12 }
 0x12a   : > { %s2950_s16 = scalar_lea.vmem %s3699_s28, %s3114_s11 }
 0x1f1   : > { %v750_v2 = vpop.f32.mrb[2].mxu1  ;;  %v820_v3 = vpop.f32.mrb[4].mxu0 }
 0x1f2   : > { %v751_v4 = vadd.f32 %v3705_v12, %v750_v2  ;;  %v3250_v6 = vpop.f32.mrb[3].mxu1  ;;  %v3257_v7 = vpop.f32.mrb[5].mxu0  ;;  %v821_v8 = vadd.f32 %v3707_v13, %v820_v3 }
 0x1f4   : > { %v894_v10 = vadd.f32 %v3043_v63, %v751_v4  ;;  %v901_v18 = vadd.f32 %v3044_v14, %v821_v8 }
 0x1f5   : > { %v890_v15 = vpop.f32.mrb[4].mxu1 }
 0x1f6   : > { %v3049_v16 = vmul.f32 -1.442695, %v894_v10  ;;  %v3264_v17 = vpop.f32.mrb[5].mxu1  ;;  %v3050_v19 = vmul.f32 -1.442695, %v901_v18  ;;  %v891_v24 = vadd.f32 %v3711_v31, %v890_v15  ;;  %v3062_v10 = vld [vmem:[%s2928_s22 + $0x40] sm:$0xff] }
 0x1f8   : > { %3504 = vpow2.f32 %v3049_v16 }
 0x1f9   : > { %3506 = vpow2.f32 %v3050_v19 }
 0x202   : > { %v3505_v20 = vpop.eup %3504 }
 0x203   : > { %v898_v21 = vadd.f32 1.0, %v3505_v20  ;;  %v3507_v22 = vpop.eup %3506 }
 0x204   : > { %v905_v23 = vadd.f32 1.0, %v3507_v22 }
 0x205   : > { %3508 = vrcp.f32 %v898_v21 }
 0x206   : > { %3510 = vrcp.f32 %v905_v23 }
 0x20f   : > { %v3509_v25 = vpop.eup %3508 }
 0x210   : > { %v908_v27 = vmul.f32 %v3509_v25, %v891_v24  ;;  %v3511_v29 = vpop.eup %3510 }
 0x211   : > { %v911_v30 = vsub.f32 1.0, %v3511_v29  ;;  %v913_v33 = vmul.f32 %v3511_v29, %v3719_v49 }
 0x212   : > { %v909_v28 = vadd.f32 %v3045_v26, %v908_v27 }
 0x214   : > { %3512 = vtanh.f32 %v909_v28 }
 0x21e   : > { %v3513_v32 = vpop.eup %3512 }
 0x21f   : > { %v912_v34 = vmul.f32 %v3513_v32, %v911_v30 }
 0x221   : > { %v3769_v35 = vadd.f32 %v913_v33, %v912_v34 }
 0x223   : > { %v916_v36 = vcombine.high %v3769_v35, %v3769_v35  ;;  %v923_v37 = vrot.slane %v3769_v35, %v3716_v48  ;;  %3270 = vmatmul.mubr.msk.f32.vlgmr.msra.gmra.mrb[6].mxu0 %vm330_vm0, %v3769_v35  ;;  %3277 = vmatmul.mubr.msk.f32.vlgmr.msra.gmra.mrb[6].mxu1 %vm330_vm0, %v3769_v35 }
 0x224   : > { %3417 = vmatpush3.bf16.msra.mxu0 %v3670_v11  ;;  %3283 = vmatprep.mubr.msk.f32.mxu0 %vm3599_vm1, %v3600_v1 }
 0x225   : > { %v930_v38 = vrot.slane %v916_v36, %v3716_v48  ;;  %v931_v39 = vcombine.high %v923_v37, %v923_v37  ;;  %v939_v40 = vrot.slane %v923_v37, %v3716_v48  ;;  %3420 = vmatpush3.bf16.msra.mxu1 %v3662_v5  ;;  %3421 = vmatprep.subr.bf16.mxu0 %v3598_v0  ;;  %v3076_v36 = vld [vmem:[%s2934_s26 + $0x48] sm:$0xff] }
 0x226   : > { %3290 = vmatprep.mubr.msk.f32.mxu1 %vm3599_vm1, %v3600_v1  ;;  %3424 = vmatprep.subr.bf16.mxu1 %v3598_v0 }
 0x227   : > { %v932_v41 = vcombine.high %v930_v38, %v930_v38  ;;  %v946_v42 = vrot.slane %v930_v38, %v3716_v48  ;;  %v953_v43 = vrot.slane %v931_v39, %v3716_v48  ;;  %v961_v44 = vcombine.high %v939_v40, %v939_v40  ;;  %3284 = vmatmul.mubr.msk.f32.vlgmr.msra.gmra.mrb[8].mxu0 %vm330_vm0, %v3769_v35 }
 0x228   : > { %3051 = vst.msk [vmem:[%s2924_s20 + $0x1] sm:$0x1] %vm666_vm2, %v939_v40  ;;  %3423 = vmatpush3.bf16.msra.mxu0 %v3664_v9  ;;  %3297 = vmatprep.mubr.msk.f32.mxu0 %vm3599_vm1, %v3600_v1 }
 0x229   : > { %v960_v45 = vrot.slane %v932_v41, %v3716_v48  ;;  %v962_v46 = vcombine.high %v946_v42, %v946_v42  ;;  %v963_v47 = vcombine.high %v953_v43, %v953_v43  ;;  %3427 = vmatprep.subr.bf16.mxu0 %v3598_v0  ;;  %3052 = vst.msk [vmem:[%s2924_s20 + $0x9] sm:$0x1] %vm666_vm2, %v953_v43  ;;  %3053 = vst.msk [vmem:[%s2924_s20 + $0x11] sm:$0x1] %vm666_vm2, %v961_v44  ;;  %v3077_v44 = vld [vmem:[%s2934_s26 + $0x50] sm:$0xff] }
 0x22a   : > { %3055 = vst.msk [vmem:[%s2924_s20 + $0x21] sm:$0x1] %vm666_vm2, %v946_v42 }
 0x22b   : > { %v964_v49 = vcombine.high %v960_v45, %v960_v45  ;;  %3054 = vst.msk [vmem:[%s2924_s20 + $0x19] sm:$0x1] %vm666_vm2, %v963_v47  ;;  %3056 = vst.msk [vmem:[%s2924_s20 + $0x29] sm:$0x1] %vm666_vm2, %v960_v45 }
 0x22c   : > { %3057 = vst.msk [vmem:[%s2924_s20 + $0x31] sm:$0x1] %vm666_vm2, %v962_v46 }
 0x22d   : > { %3058 = vst.msk [vmem:[%s2924_s20 + $0x39] sm:$0x1] %vm666_vm2, %v964_v49  ;;  %s3131_s20 = smul.u32 4294967128, %s3588_s12 }
 0x22f   : > { %s2957_s21 = scalar_lea.vmem %s3699_s28, %s3131_s20  ;;  %s2959_s28 = smul.u32 4294967289, %s3588_s12 }
 0x231   : > { %s2960_s22 = scalar_lea.vmem %s3724_s10, %s2959_s28 }
 0x2f6   : > { %v1057_v51 = vpop.f32.mrb[6].mxu0  ;;  %v1127_v52 = vpop.f32.mrb[6].mxu1 }
 0x2f7   : > { %v1058_v53 = vadd.f32 %v3705_v12, %v1057_v51  ;;  %v3271_v54 = vpop.f32.mrb[7].mxu0  ;;  %v3278_v55 = vpop.f32.mrb[7].mxu1  ;;  %v1128_v56 = vadd.f32 %v3707_v13, %v1127_v52 }
 0x2f9   : > { %v1201_v57 = vadd.f32 %v3060_v50, %v1058_v53  ;;  %v1208_v62 = vadd.f32 %v3061_v58, %v1128_v56 }
 0x2fa   : > { %v1197_v59 = vpop.f32.mrb[8].mxu0 }
 0x2fb   : > { %v3066_v60 = vmul.f32 -1.442695, %v1201_v57  ;;  %v3285_v61 = vpop.f32.mrb[9].mxu0  ;;  %v3067_v63 = vmul.f32 -1.442695, %v1208_v62  ;;  %v1198_v7 = vadd.f32 %v3711_v31, %v1197_v59  ;;  %v3078_v57 = vld [vmem:[%s2934_s26 + $0x58] sm:$0xff] }
 0x2fd   : > { %3514 = vpow2.f32 %v3066_v60 }
 0x2fe   : > { %3516 = vpow2.f32 %v3067_v63 }
 0x307   : > { %v3515_v2 = vpop.eup %3514 }
 0x308   : > { %v1205_v3 = vadd.f32 1.0, %v3515_v2  ;;  %v3517_v4 = vpop.eup %3516 }
 0x309   : > { %v1212_v6 = vadd.f32 1.0, %v3517_v4 }
 0x30a   : > { %3518 = vrcp.f32 %v1205_v3 }
 0x30b   : > { %3520 = vrcp.f32 %v1212_v6 }
 0x314   : > { %v3519_v8 = vpop.eup %3518 }
 0x315   : > { %v1215_v14 = vmul.f32 %v3519_v8, %v1198_v7  ;;  %v3521_v16 = vpop.eup %3520 }
 0x316   : > { %v1218_v17 = vsub.f32 1.0, %v3521_v16  ;;  %v1220_v19 = vmul.f32 %v3521_v16, %v3769_v35 }
 0x317   : > { %v1216_v15 = vadd.f32 %v3062_v10, %v1215_v14 }
 0x319   : > { %3522 = vtanh.f32 %v1216_v15 }
 0x323   : > { %v3523_v18 = vpop.eup %3522 }
 0x324   : > { %v1219_v20 = vmul.f32 %v3523_v18, %v1218_v17 }
 0x326   : > { %v3814_v21 = vadd.f32 %v1220_v19, %v1219_v20 }
 0x328   : > { %v1223_v22 = vcombine.high %v3814_v21, %v3814_v21  ;;  %v1230_v23 = vrot.slane %v3814_v21, %v3716_v48  ;;  %3291 = vmatmul.mubr.msk.f32.vlgmr.msra.gmra.mrb[8].mxu1 %vm330_vm0, %v3814_v21  ;;  %3298 = vmatmul.mubr.msk.f32.vlgmr.msra.gmra.mrb[10].mxu0 %vm330_vm0, %v3814_v21 }
 0x329   : > { %3426 = vmatpush3.bf16.msra.mxu1 %v3670_v11  ;;  %3304 = vmatprep.mubr.msk.f32.mxu1 %vm3599_vm1, %v3600_v1 }
 0x32a   : > { %v1237_v24 = vrot.slane %v1223_v22, %v3716_v48  ;;  %v1238_v25 = vcombine.high %v1230_v23, %v1230_v23  ;;  %v1246_v26 = vrot.slane %v1230_v23, %v3716_v48  ;;  %3429 = vmatpush3.bf16.msra.mxu0 %v3662_v5  ;;  %3430 = vmatprep.subr.bf16.mxu1 %v3598_v0  ;;  %v1598_v22 = vld [vmem:[%s1597_s4] sm:$0xff] }
 0x32b   : > { %3311 = vmatprep.mubr.msk.f32.mxu0 %vm3599_vm1, %v3600_v1  ;;  %3433 = vmatprep.subr.bf16.mxu0 %v3598_v0 }
 0x32c   : > { %v1239_v27 = vcombine.high %v1237_v24, %v1237_v24  ;;  %v1253_v28 = vrot.slane %v1237_v24, %v3716_v48  ;;  %v1260_v29 = vrot.slane %v1238_v25, %v3716_v48  ;;  %v1268_v30 = vcombine.high %v1246_v26, %v1246_v26  ;;  %3305 = vmatmul.mubr.msk.f32.vlgmr.msra.gmra.mrb[10].mxu1 %vm330_vm0, %v3814_v21 }
 0x32d   : > { %3068 = vst.msk [vmem:[%s2931_s24 + $0x2] sm:$0x1] %vm666_vm2, %v1246_v26  ;;  %3432 = vmatpush3.bf16.msra.mxu1 %v3664_v9  ;;  %3318 = vmatprep.mubr.msk.f32.mxu1 %vm3599_vm1, %v3600_v1 }
 0x32e   : > { %v1267_v32 = vrot.slane %v1239_v27, %v3716_v48  ;;  %v1269_v33 = vcombine.high %v1253_v28, %v1253_v28  ;;  %v1270_v34 = vcombine.high %v1260_v29, %v1260_v29  ;;  %3069 = vst.msk [vmem:[%s2931_s24 + $0xa] sm:$0x1] %vm666_vm2, %v1260_v29  ;;  %3070 = vst.msk [vmem:[%s2931_s24 + $0x12] sm:$0x1] %vm666_vm2, %v1268_v30  ;;  %3436 = vmatprep.subr.bf16.mxu1 %v3598_v0  ;;  %v1599_v30 = vld [vmem:[%s1597_s4 + $0x8] sm:$0xff] }
 0x32f   : > { %3072 = vst.msk [vmem:[%s2931_s24 + $0x22] sm:$0x1] %vm666_vm2, %v1253_v28 }
 0x330   : > { %v1271_v35 = vcombine.high %v1267_v32, %v1267_v32  ;;  %3071 = vst.msk [vmem:[%s2931_s24 + $0x1a] sm:$0x1] %vm666_vm2, %v1270_v34  ;;  %3073 = vst.msk [vmem:[%s2931_s24 + $0x2a] sm:$0x1] %vm666_vm2, %v1267_v32 }
 0x331   : > { %3074 = vst.msk [vmem:[%s2931_s24 + $0x32] sm:$0x1] %vm666_vm2, %v1269_v33 }
 0x332   : > { %3075 = vst.msk [vmem:[%s2931_s24 + $0x3a] sm:$0x1] %vm666_vm2, %v1271_v35 }
 0x3fb   : > { %v1363_v37 = vpop.f32.mrb[8].mxu1  ;;  %v1433_v38 = vpop.f32.mrb[10].mxu0 }
 0x3fc   : > { %v1364_v39 = vadd.f32 %v3705_v12, %v1363_v37  ;;  %v3292_v40 = vpop.f32.mrb[9].mxu1  ;;  %v3299_v41 = vpop.f32.mrb[11].mxu0  ;;  %v1434_v42 = vadd.f32 %v3707_v13, %v1433_v38 }
 0x3fe   : > { %v1507_v43 = vadd.f32 %v3076_v36, %v1364_v39  ;;  %v1514_v49 = vadd.f32 %v3077_v44, %v1434_v42 }
 0x3ff   : > { %v1503_v45 = vpop.f32.mrb[10].mxu1 }
 0x400   : > { %v3082_v46 = vmul.f32 -1.442695, %v1507_v43  ;;  %v3306_v47 = vpop.f32.mrb[11].mxu1  ;;  %v3083_v50 = vmul.f32 -1.442695, %v1514_v49  ;;  %v1504_v55 = vadd.f32 %v3711_v31, %v1503_v45  ;;  %v1600_v43 = vld [vmem:[%s1597_s4 + $0x10] sm:$0xff] }
 0x402   : > { %3524 = vpow2.f32 %v3082_v46 }
 0x403   : > { %3526 = vpow2.f32 %v3083_v50 }
 0x40c   : > { %v3525_v51 = vpop.eup %3524 }
 0x40d   : > { %v1511_v52 = vadd.f32 1.0, %v3525_v51  ;;  %v3527_v53 = vpop.eup %3526 }
 0x40e   : > { %v1518_v54 = vadd.f32 1.0, %v3527_v53 }
 0x40f   : > { %3528 = vrcp.f32 %v1511_v52 }
 0x410   : > { %3530 = vrcp.f32 %v1518_v54 }
 0x419   : > { %v3529_v56 = vpop.eup %3528 }
 0x41a   : > { %v1521_v58 = vmul.f32 %v3529_v56, %v1504_v55  ;;  %v3531_v60 = vpop.eup %3530 }
 0x41b   : > { %v1524_v61 = vsub.f32 1.0, %v3531_v60  ;;  %v1526_v63 = vmul.f32 %v3531_v60, %v3814_v21 }
 0x41c   : > { %v1522_v59 = vadd.f32 %v3078_v57, %v1521_v58 }
 0x41e   : > { %3532 = vtanh.f32 %v1522_v59 }
 0x428   : > { %v3533_v62 = vpop.eup %3532 }
 0x429   : > { %v1525_v2 = vmul.f32 %v3533_v62, %v1524_v61 }
 0x42b   : > { %v3858_v3 = vadd.f32 %v1526_v63, %v1525_v2 }
 0x42d   : > { %v1529_v4 = vcombine.high %v3858_v3, %v3858_v3  ;;  %v1536_v6 = vrot.slane %v3858_v3, %v3716_v48  ;;  %3312 = vmatmul.mubr.msk.f32.vlgmr.msra.gmra.mrb[12].mxu0 %vm330_vm0, %v3858_v3  ;;  %3319 = vmatmul.mubr.msk.f32.vlgmr.msra.gmra.mrb[12].mxu1 %vm330_vm0, %v3858_v3 }
 0x42e   : > { %3435 = vmatpush3.bf16.msra.mxu0 %v3670_v11  ;;  %3325 = vmatprep.mubr.msk.f32.mxu0 %vm3599_vm1, %v3600_v1 }
 0x42f   : > { %v1543_v7 = vrot.slane %v1529_v4, %v3716_v48  ;;  %v1544_v8 = vcombine.high %v1536_v6, %v1536_v6  ;;  %v1552_v10 = vrot.slane %v1536_v6, %v3716_v48  ;;  %3438 = vmatpush3.bf16.msra.mxu1 %v3662_v5  ;;  %3439 = vmatprep.subr.bf16.mxu0 %v3598_v0  ;;  %v3098_v4 = vld [vmem:[%s2943_s7 + $0x78] sm:$0xff] }
 0x430   : > { %3332 = vmatprep.mubr.msk.f32.mxu1 %vm3599_vm1, %v3600_v1  ;;  %3442 = vmatprep.subr.bf16.mxu1 %v3598_v0 }
 0x431   : > { %v1545_v14 = vcombine.high %v1543_v7, %v1543_v7  ;;  %v1559_v15 = vrot.slane %v1543_v7, %v3716_v48  ;;  %v1566_v16 = vrot.slane %v1544_v8, %v3716_v48  ;;  %v1574_v17 = vcombine.high %v1552_v10, %v1552_v10  ;;  %3326 = vmatmul.mubr.msk.f32.vlgmr.msra.gmra.mrb[14].mxu0 %vm330_vm0, %v3858_v3 }
 0x432   : > { %3084 = vst.msk [vmem:[%s2936_s27 + $0x3] sm:$0x1] %vm666_vm2, %v1552_v10  ;;  %3441 = vmatpush3.bf16.msra.mxu0 %v3664_v9  ;;  %3339 = vmatprep.mubr.msk.f32.mxu0 %vm3599_vm1, %v3600_v1 }
 0x433   : > { %v1573_v18 = vrot.slane %v1545_v14, %v3716_v48  ;;  %v1575_v19 = vcombine.high %v1559_v15, %v1559_v15  ;;  %v1576_v20 = vcombine.high %v1566_v16, %v1566_v16  ;;  %3085 = vst.msk [vmem:[%s2936_s27 + $0xb] sm:$0x1] %vm666_vm2, %v1566_v16  ;;  %3086 = vst.msk [vmem:[%s2936_s27 + $0x13] sm:$0x1] %vm666_vm2, %v1574_v17  ;;  %3445 = vmatprep.subr.bf16.mxu0 %v3598_v0  ;;  %v3099_v17 = vld [vmem:[%s2943_s7 + $0x80] sm:$0xff] }
 0x434   : > { %3088 = vst.msk [vmem:[%s2936_s27 + $0x23] sm:$0x1] %vm666_vm2, %v1559_v15 }
 0x435   : > { %v1577_v21 = vcombine.high %v1573_v18, %v1573_v18  ;;  %3087 = vst.msk [vmem:[%s2936_s27 + $0x1b] sm:$0x1] %vm666_vm2, %v1576_v20  ;;  %3089 = vst.msk [vmem:[%s2936_s27 + $0x2b] sm:$0x1] %vm666_vm2, %v1573_v18 }
 0x436   : > { %3090 = vst.msk [vmem:[%s2936_s27 + $0x33] sm:$0x1] %vm666_vm2, %v1575_v19 }
 0x437   : > { %3091 = vst.msk [vmem:[%s2936_s27 + $0x3b] sm:$0x1] %vm666_vm2, %v1577_v21 }
 0x500   : > { %v1669_v23 = vpop.f32.mrb[12].mxu0  ;;  %v1739_v24 = vpop.f32.mrb[12].mxu1 }
 0x501   : > { %v1670_v25 = vadd.f32 %v3705_v12, %v1669_v23  ;;  %v3313_v26 = vpop.f32.mrb[13].mxu0  ;;  %v3320_v27 = vpop.f32.mrb[13].mxu1  ;;  %v1740_v28 = vadd.f32 %v3707_v13, %v1739_v24 }
 0x503   : > { %v1813_v29 = vadd.f32 %v1670_v25, %v1598_v22  ;;  %v1820_v35 = vadd.f32 %v1740_v28, %v1599_v30 }
 0x504   : > { %v1809_v32 = vpop.f32.mrb[14].mxu0 }
 0x505   : > { %v3095_v33 = vmul.f32 -1.442695, %v1813_v29  ;;  %v3327_v34 = vpop.f32.mrb[15].mxu0  ;;  %v3096_v36 = vmul.f32 -1.442695, %v1820_v35  ;;  %v1810_v41 = vadd.f32 %v3711_v31, %v1809_v32  ;;  %v3100_v29 = vld [vmem:[%s2943_s7 + $0x88] sm:$0xff] }
 0x507   : > { %3534 = vpow2.f32 %v3095_v33 }
 0x508   : > { %3536 = vpow2.f32 %v3096_v36 }
 0x511   : > { %v3535_v37 = vpop.eup %3534 }
 0x512   : > { %v1817_v38 = vadd.f32 1.0, %v3535_v37  ;;  %v3537_v39 = vpop.eup %3536 }
 0x513   : > { %v1824_v40 = vadd.f32 1.0, %v3537_v39 }
 0x514   : > { %3538 = vrcp.f32 %v1817_v38 }
 0x515   : > { %3540 = vrcp.f32 %v1824_v40 }
 0x51e   : > { %v3539_v42 = vpop.eup %3538 }
 0x51f   : > { %v1827_v44 = vmul.f32 %v3539_v42, %v1810_v41  ;;  %v3541_v46 = vpop.eup %3540 }
 0x520   : > { %v1830_v47 = vsub.f32 1.0, %v3541_v46  ;;  %v1832_v50 = vmul.f32 %v3541_v46, %v3858_v3 }
 0x521   : > { %v1828_v45 = vadd.f32 %v1827_v44, %v1600_v43 }
 0x523   : > { %3542 = vtanh.f32 %v1828_v45 }
 0x52d   : > { %v3543_v49 = vpop.eup %3542 }
 0x52e   : > { %v1831_v51 = vmul.f32 %v3543_v49, %v1830_v47 }
 0x530   : > { %v3905_v52 = vadd.f32 %v1832_v50, %v1831_v51 }
 0x532   : > { %v1835_v53 = vcombine.high %v3905_v52, %v3905_v52  ;;  %v1842_v54 = vrot.slane %v3905_v52, %v3716_v48  ;;  %3333 = vmatmul.mubr.msk.f32.vlgmr.msra.gmra.mrb[14].mxu1 %vm330_vm0, %v3905_v52  ;;  %3340 = vmatmul.mubr.msk.f32.vlgmr.msra.gmra.mrb[16].mxu0 %vm330_vm0, %v3905_v52 }
 0x533   : > { %3444 = vmatpush3.bf16.msra.mxu1 %v3670_v11  ;;  %3346 = vmatprep.mubr.msk.f32.mxu1 %vm3599_vm1, %v3600_v1 }
 0x534   : > { %v1849_v55 = vrot.slane %v1835_v53, %v3716_v48  ;;  %v1850_v56 = vcombine.high %v1842_v54, %v1842_v54  ;;  %v1858_v57 = vrot.slane %v1842_v54, %v3716_v48  ;;  %3447 = vmatpush3.bf16.msra.mxu0 %v3662_v5  ;;  %3448 = vmatprep.subr.bf16.mxu1 %v3598_v0 }
 0x535   : > { %3353 = vmatprep.mubr.msk.f32.mxu0 %vm3599_vm1, %v3600_v1  ;;  %3451 = vmatprep.subr.bf16.mxu0 %v3598_v0 }
 0x536   : > { %v1851_v58 = vcombine.high %v1849_v55, %v1849_v55  ;;  %v1865_v59 = vrot.slane %v1849_v55, %v3716_v48  ;;  %v1872_v60 = vrot.slane %v1850_v56, %v3716_v48  ;;  %v1880_v61 = vcombine.high %v1858_v57, %v1858_v57  ;;  %1893 = vst.msk [vmem:[%s1892_s5] sm:$0x1] %vm666_vm2, %v1858_v57 }
 0x537   : > { %3347 = vmatmul.mubr.msk.f32.vlgmr.msra.gmra.mrb[16].mxu1 %vm330_vm0, %v3905_v52 }
 0x538   : > { %3450 = vmatpush3.bf16.msra.mxu1 %v3664_v9  ;;  %3360 = vmatprep.mubr.msk.f32.mxu1 %vm3599_vm1, %v3600_v1  ;;  %v1879_v62 = vrot.slane %v1851_v58, %v3716_v48  ;;  %v1881_v63 = vcombine.high %v1865_v59, %v1865_v59  ;;  %v1882_v2 = vcombine.high %v1872_v60, %v1872_v60  ;;  %v3116_v58 = vld [vmem:[%s2950_s16 + $0x98] sm:$0xff] }
 0x539   : > { %1894 = vst.msk [vmem:[%s1892_s5 + $0x8] sm:$0x1] %vm666_vm2, %v1872_v60  ;;  %1895 = vst.msk [vmem:[%s1892_s5 + $0x10] sm:$0x1] %vm666_vm2, %v1880_v61  ;;  %3454 = vmatprep.subr.bf16.mxu1 %v3598_v0 }
 0x53a   : > { %1897 = vst.msk [vmem:[%s1892_s5 + $0x20] sm:$0x1] %vm666_vm2, %v1865_v59  ;;  %v1883_v3 = vcombine.high %v1879_v62, %v1879_v62  ;;  %1896 = vst.msk [vmem:[%s1892_s5 + $0x18] sm:$0x1] %vm666_vm2, %v1882_v2 }
 0x53b   : > { %1898 = vst.msk [vmem:[%s1892_s5 + $0x28] sm:$0x1] %vm666_vm2, %v1879_v62  ;;  %1899 = vst.msk [vmem:[%s1892_s5 + $0x30] sm:$0x1] %vm666_vm2, %v1881_v63 }
 0x53c   : > { %1900 = vst.msk [vmem:[%s1892_s5 + $0x38] sm:$0x1] %vm666_vm2, %v1883_v3 }
 0x605   : > { %v1976_v6 = vpop.f32.mrb[14].mxu1  ;;  %v2046_v7 = vpop.f32.mrb[16].mxu0 }
 0x606   : > { %v1977_v8 = vadd.f32 %v3705_v12, %v1976_v6  ;;  %v3334_v10 = vpop.f32.mrb[15].mxu1  ;;  %v3341_v14 = vpop.f32.mrb[17].mxu0  ;;  %v2047_v15 = vadd.f32 %v3707_v13, %v2046_v7 }
 0x607   : > { %v3117_v10 = vld [vmem:[%s2950_s16 + $0xa0] sm:$0xff] }
 0x608   : > { %v2120_v16 = vadd.f32 %v3098_v4, %v1977_v8  ;;  %v2127_v21 = vadd.f32 %v3099_v17, %v2047_v15 }
 0x60a   : > { %v2116_v18 = vpop.f32.mrb[16].mxu1  ;;  %v3104_v19 = vmul.f32 -1.442695, %v2120_v16  ;;  %v3105_v22 = vmul.f32 -1.442695, %v2127_v21 }
 0x60b   : > { %v3348_v20 = vpop.f32.mrb[17].mxu1  ;;  %v2117_v27 = vadd.f32 %v3711_v31, %v2116_v18 }
 0x60c   : > { %3544 = vpow2.f32 %v3104_v19 }
 0x60d   : > { %3546 = vpow2.f32 %v3105_v22 }
 0x616   : > { %v3545_v23 = vpop.eup %3544 }
 0x617   : > { %v2124_v24 = vadd.f32 1.0, %v3545_v23  ;;  %v3547_v25 = vpop.eup %3546 }
 0x618   : > { %v2131_v26 = vadd.f32 1.0, %v3547_v25 }
 0x619   : > { %3548 = vrcp.f32 %v2124_v24 }
 0x61a   : > { %3550 = vrcp.f32 %v2131_v26 }
 0x623   : > { %v3549_v28 = vpop.eup %3548 }
 0x624   : > { %v2134_v30 = vmul.f32 %v3549_v28, %v2117_v27  ;;  %v3551_v33 = vpop.eup %3550 }
 0x625   : > { %v2137_v34 = vsub.f32 1.0, %v3551_v33  ;;  %v2139_v36 = vmul.f32 %v3551_v33, %v3905_v52 }
 0x626   : > { %v2135_v32 = vadd.f32 %v3100_v29, %v2134_v30 }
 0x628   : > { %3552 = vtanh.f32 %v2135_v32 }
 0x632   : > { %v3553_v35 = vpop.eup %3552 }
 0x633   : > { %v2138_v37 = vmul.f32 %v3553_v35, %v2137_v34  ;;  %v3132_v34 = vld [vmem:[%s2957_s21 + $0xa8] sm:$0xff] }
 0x635   : > { %v3952_v38 = vadd.f32 %v2139_v36, %v2138_v37 }
 0x637   : > { %v2142_v39 = vcombine.high %v3952_v38, %v3952_v38  ;;  %v2149_v40 = vrot.slane %v3952_v38, %v3716_v48  ;;  %3354 = vmatmul.mubr.msk.f32.vlgmr.msra.gmra.mrb[18].mxu0 %vm330_vm0, %v3952_v38  ;;  %3361 = vmatmul.mubr.msk.f32.vlgmr.msra.gmra.mrb[18].mxu1 %vm330_vm0, %v3952_v38 }
 0x638   : > { %3453 = vmatpush3.bf16.msra.mxu0 %v3670_v11  ;;  %3367 = vmatprep.mubr.msk.f32.mxu0 %vm3599_vm1, %v3600_v1 }
 0x639   : > { %v2156_v41 = vrot.slane %v2142_v39, %v3716_v48  ;;  %v2157_v42 = vcombine.high %v2149_v40, %v2149_v40  ;;  %v2165_v43 = vrot.slane %v2149_v40, %v3716_v48  ;;  %3456 = vmatpush3.bf16.msra.mxu1 %v3662_v5  ;;  %3457 = vmatprep.subr.bf16.mxu0 %v3598_v0 }
 0x63a   : > { %3374 = vmatprep.mubr.msk.f32.mxu1 %vm3599_vm1, %v3600_v1  ;;  %3460 = vmatprep.subr.bf16.mxu1 %v3598_v0 }
 0x63b   : > { %v2158_v44 = vcombine.high %v2156_v41, %v2156_v41  ;;  %v2172_v45 = vrot.slane %v2156_v41, %v3716_v48  ;;  %v2179_v46 = vrot.slane %v2157_v42, %v3716_v48  ;;  %v2187_v47 = vcombine.high %v2165_v43, %v2165_v43  ;;  %3106 = vst.msk [vmem:[%s2946_s9 + $0x5] sm:$0x1] %vm666_vm2, %v2165_v43  ;;  %v3133_v42 = vld [vmem:[%s2957_s21 + $0xb0] sm:$0xff] }
 0x63c   : > { %3368 = vmatmul.mubr.msk.f32.vlgmr.msra.gmra.mrb[20].mxu0 %vm330_vm0, %v3952_v38 }
 0x63d   : > { %3459 = vmatpush3.bf16.msra.mxu0 %v3664_v9  ;;  %3381 = vmatprep.mubr.msk.f32.mxu0 %vm3599_vm1, %v3600_v1  ;;  %v2186_v0 = vrot.slane %v2158_v44, %v3716_v48  ;;  %v2188_v5 = vcombine.high %v2172_v45, %v2172_v45  ;;  %v2189_v49 = vcombine.high %v2179_v46, %v2179_v46  ;;  %v3115_v9 = vld [vmem:[%s2950_s16 + $0x90] sm:$0xff] }
 0x63e   : > { %3107 = vst.msk [vmem:[%s2946_s9 + $0xd] sm:$0x1] %vm666_vm2, %v2179_v46  ;;  %3108 = vst.msk [vmem:[%s2946_s9 + $0x15] sm:$0x1] %vm666_vm2, %v2187_v47 }
 0x63f   : > { %3110 = vst.msk [vmem:[%s2946_s9 + $0x25] sm:$0x1] %vm666_vm2, %v2172_v45  ;;  %v2190_v50 = vcombine.high %v2186_v0, %v2186_v0  ;;  %3109 = vst.msk [vmem:[%s2946_s9 + $0x1d] sm:$0x1] %vm666_vm2, %v2189_v49 }
 0x640   : > { %3111 = vst.msk [vmem:[%s2946_s9 + $0x2d] sm:$0x1] %vm666_vm2, %v2186_v0  ;;  %3112 = vst.msk [vmem:[%s2946_s9 + $0x35] sm:$0x1] %vm666_vm2, %v2188_v5 }
 0x641   : > { %3113 = vst.msk [vmem:[%s2946_s9 + $0x3d] sm:$0x1] %vm666_vm2, %v2190_v50 }
 0x70a   : > { %v2283_v51 = vpop.f32.mrb[18].mxu0  ;;  %v2353_v52 = vpop.f32.mrb[18].mxu1 }
 0x70b   : > { %v2284_v53 = vadd.f32 %v3705_v12, %v2283_v51  ;;  %v3355_v54 = vpop.f32.mrb[19].mxu0  ;;  %v3362_v55 = vpop.f32.mrb[19].mxu1  ;;  %v2354_v56 = vadd.f32 %v3707_v13, %v2353_v52 }
 0x70d   : > { %v2427_v57 = vadd.f32 %v3115_v9, %v2284_v53  ;;  %v2434_v62 = vadd.f32 %v3116_v58, %v2354_v56 }
 0x70f   : > { %v2423_v59 = vpop.f32.mrb[20].mxu0  ;;  %v3121_v60 = vmul.f32 -1.442695, %v2427_v57  ;;  %v3122_v63 = vmul.f32 -1.442695, %v2434_v62 }
 0x710   : > { %v3369_v61 = vpop.f32.mrb[21].mxu0  ;;  %v2424_v7 = vadd.f32 %v3711_v31, %v2423_v59 }
 0x711   : > { %3554 = vpow2.f32 %v3121_v60 }
 0x712   : > { %3556 = vpow2.f32 %v3122_v63 }
 0x71b   : > { %v3555_v2 = vpop.eup %3554 }
 0x71c   : > { %v2431_v3 = vadd.f32 1.0, %v3555_v2  ;;  %v3557_v4 = vpop.eup %3556 }
 0x71d   : > { %v2438_v6 = vadd.f32 1.0, %v3557_v4 }
 0x71e   : > { %3558 = vrcp.f32 %v2431_v3 }
 0x71f   : > { %3560 = vrcp.f32 %v2438_v6 }
 0x728   : > { %v3559_v8 = vpop.eup %3558 }
 0x729   : > { %v2441_v14 = vmul.f32 %v3559_v8, %v2424_v7  ;;  %v3561_v16 = vpop.eup %3560 }
 0x72a   : > { %v2444_v17 = vsub.f32 1.0, %v3561_v16  ;;  %v2446_v19 = vmul.f32 %v3561_v16, %v3952_v38 }
 0x72b   : > { %v2442_v15 = vadd.f32 %v3117_v10, %v2441_v14 }
 0x72d   : > { %3562 = vtanh.f32 %v2442_v15 }
 0x737   : > { %v3563_v18 = vpop.eup %3562 }
 0x738   : > { %v2445_v20 = vmul.f32 %v3563_v18, %v2444_v17 }
 0x73a   : > { %v2447_v21 = vadd.f32 %v2446_v19, %v2445_v20 }
 0x73c   : > { %v2449_v22 = vcombine.high %v2447_v21, %v2447_v21  ;;  %v2456_v23 = vrot.slane %v2447_v21, %v3716_v48  ;;  %3375 = vmatmul.mubr.msk.f32.vlgmr.msra.gmra.mrb[20].mxu1 %vm330_vm0, %v2447_v21  ;;  %3382 = vmatmul.mubr.msk.f32.vlgmr.msra.gmra.mrb[22].mxu0 %vm330_vm0, %v2447_v21 }
 0x73d   : > { %3462 = vmatpush3.bf16.msra.mxu1 %v3670_v11  ;;  %3388 = vmatprep.mubr.msk.f32.mxu1 %vm3599_vm1, %v3600_v1 }
 0x73e   : > { %v2463_v24 = vrot.slane %v2449_v22, %v3716_v48  ;;  %v2464_v25 = vcombine.high %v2456_v23, %v2456_v23  ;;  %v2472_v26 = vrot.slane %v2456_v23, %v3716_v48 }
 0x740   : > { %v2465_v27 = vcombine.high %v2463_v24, %v2463_v24  ;;  %v2479_v28 = vrot.slane %v2463_v24, %v3716_v48  ;;  %v2486_v29 = vrot.slane %v2464_v25, %v3716_v48  ;;  %v2494_v30 = vcombine.high %v2472_v26, %v2472_v26  ;;  %3123 = vst.msk [vmem:[%s2953_s19 + $0x6] sm:$0x1] %vm666_vm2, %v2472_v26 }
 0x741   : > { %3389 = vmatmul.mubr.msk.f32.vlgmr.msra.gmra.mrb[22].mxu1 %vm330_vm0, %v2447_v21 }
 0x742   : > { %v2493_v11 = vrot.slane %v2465_v27, %v3716_v48  ;;  %v2495_v1 = vcombine.high %v2479_v28, %v2479_v28  ;;  %v2496_v32 = vcombine.high %v2486_v29, %v2486_v29  ;;  %3124 = vst.msk [vmem:[%s2953_s19 + $0xe] sm:$0x1] %vm666_vm2, %v2486_v29  ;;  %3125 = vst.msk [vmem:[%s2953_s19 + $0x16] sm:$0x1] %vm666_vm2, %v2494_v30 }
 0x743   : > { %3127 = vst.msk [vmem:[%s2953_s19 + $0x26] sm:$0x1] %vm666_vm2, %v2479_v28 }
 0x744   : > { %v2497_v33 = vcombine.high %v2493_v11, %v2493_v11  ;;  %3126 = vst.msk [vmem:[%s2953_s19 + $0x1e] sm:$0x1] %vm666_vm2, %v2496_v32  ;;  %3128 = vst.msk [vmem:[%s2953_s19 + $0x2e] sm:$0x1] %vm666_vm2, %v2493_v11 }
 0x745   : > { %3129 = vst.msk [vmem:[%s2953_s19 + $0x36] sm:$0x1] %vm666_vm2, %v2495_v1 }
 0x746   : > { %3130 = vst.msk [vmem:[%s2953_s19 + $0x3e] sm:$0x1] %vm666_vm2, %v2497_v33 }
 0x80f   : > { %v2590_v35 = vpop.f32.mrb[20].mxu1  ;;  %v2660_v36 = vpop.f32.mrb[22].mxu0 }
 0x810   : > { %v2591_v37 = vadd.f32 %v3705_v12, %v2590_v35  ;;  %v3376_v38 = vpop.f32.mrb[21].mxu1  ;;  %v3383_v39 = vpop.f32.mrb[23].mxu0  ;;  %v2661_v40 = vadd.f32 %v3707_v13, %v2660_v36  ;;  %v3134_v13 = vld [vmem:[%s2957_s21 + $0xb8] sm:$0xff] }
 0x812   : > { %v2734_v41 = vadd.f32 %v3132_v34, %v2591_v37  ;;  %v2741_v46 = vadd.f32 %v3133_v42, %v2661_v40 }
 0x814   : > { %v2730_v43 = vpop.f32.mrb[22].mxu1  ;;  %v3138_v44 = vmul.f32 -1.442695, %v2734_v41  ;;  %v3139_v47 = vmul.f32 -1.442695, %v2741_v46 }
 0x815   : > { %v3390_v45 = vpop.f32.mrb[23].mxu1  ;;  %v2731_v12 = vadd.f32 %v3711_v31, %v2730_v43 }
 0x816   : > { %3564 = vpow2.f32 %v3138_v44 }
 0x817   : > { %3566 = vpow2.f32 %v3139_v47 }
 0x820   : > { %v3565_v0 = vpop.eup %3564 }
 0x821   : > { %v2738_v5 = vadd.f32 1.0, %v3565_v0  ;;  %v3567_v49 = vpop.eup %3566 }
 0x822   : > { %v2745_v50 = vadd.f32 1.0, %v3567_v49 }
 0x823   : > { %3568 = vrcp.f32 %v2738_v5 }
 0x824   : > { %3570 = vrcp.f32 %v2745_v50 }
 0x82d   : > { %v3569_v9 = vpop.eup %3568 }
 0x82e   : > { %v2748_v51 = vmul.f32 %v3569_v9, %v2731_v12  ;;  %v3571_v53 = vpop.eup %3570 }
 0x82f   : > { %v2751_v54 = vsub.f32 1.0, %v3571_v53  ;;  %v2753_v56 = vmul.f32 %v3571_v53, %v2447_v21 }
 0x830   : > { %v2749_v52 = vadd.f32 %v3134_v13, %v2748_v51 }
 0x832   : > { %3572 = vtanh.f32 %v2749_v52 }
 0x83c   : > { %v3573_v55 = vpop.eup %3572 }
 0x83d   : > { %v2752_v57 = vmul.f32 %v3573_v55, %v2751_v54 }
 0x83f   : > { %v2754_v58 = vadd.f32 %v2753_v56, %v2752_v57 }
 0x841   : > { %v2756_v59 = vcombine.high %v2754_v58, %v2754_v58  ;;  %v2763_v60 = vrot.slane %v2754_v58, %v3716_v48  ;;  %2822 = vst.msk [vmem:[%s3650_s18] sm:$0xff] %vm330_vm0, %v2754_v58 }
 0x843   : > { %v2770_v31 = vrot.slane %v2756_v59, %v3716_v48  ;;  %v2771_v61 = vcombine.high %v2763_v60, %v2763_v60  ;;  %v2779_v62 = vrot.slane %v2763_v60, %v3716_v48 }
 0x845   : > { %v2772_v63 = vcombine.high %v2770_v31, %v2770_v31  ;;  %v2786_v2 = vrot.slane %v2770_v31, %v3716_v48  ;;  %v2793_v3 = vrot.slane %v2771_v61, %v3716_v48  ;;  %v2801_v4 = vcombine.high %v2779_v62, %v2779_v62  ;;  %3140 = vst.msk [vmem:[%s2960_s22 + $0x7] sm:$0x1] %vm666_vm2, %v2779_v62 }
 0x847   : > { %v2800_v6 = vrot.slane %v2772_v63, %v3716_v48  ;;  %v2802_v7 = vcombine.high %v2786_v2, %v2786_v2  ;;  %v2803_v8 = vcombine.high %v2793_v3, %v2793_v3  ;;  %3141 = vst.msk [vmem:[%s2960_s22 + $0xf] sm:$0x1] %vm666_vm2, %v2793_v3  ;;  %3142 = vst.msk [vmem:[%s2960_s22 + $0x17] sm:$0x1] %vm666_vm2, %v2801_v4 }
 0x848   : > { %3144 = vst.msk [vmem:[%s2960_s22 + $0x27] sm:$0x1] %vm666_vm2, %v2786_v2 }
 0x849   : > { %v2804_v10 = vcombine.high %v2800_v6, %v2800_v6  ;;  %3143 = vst.msk [vmem:[%s2960_s22 + $0x1f] sm:$0x1] %vm666_vm2, %v2803_v8  ;;  %3145 = vst.msk [vmem:[%s2960_s22 + $0x2f] sm:$0x1] %vm666_vm2, %v2800_v6 }
 0x84a   : > { %3146 = vst.msk [vmem:[%s2960_s22 + $0x37] sm:$0x1] %vm666_vm2, %v2802_v7 }
 0x84b   : > { %3147 = vst.msk [vmem:[%s2960_s22 + $0x3f] sm:$0x1] %vm666_vm2, %v2804_v10 }
 0x84c PF: > { %s13_s14 = sadd.s32 1, %s3596_s14   ;;  %s4053_s12 = smov %s3592_s13 }
 0x84d   : > { %p10_p5 = scmp.ge.s32.totalorder %s13_s14, 4   ;;  %s4054_s13 = smov %s4056_s15 }
 0x84f   :  { %12 = sbr.rel (!%p10_p5) target bundleno = 2 (0x2), region = 94 }

// kernel: hgrulwan_forward.6
= control target key start
LH: loop header
LB: loop body
LE: loop exit
PB: predicated region body
PF: predicated region fallthrough
CT: control target
= control target key end

     0   :  { %s2102_s12 = smov 0   ;;  %s2104_s13 = smov 0   ;;  %s2349_s0 = inlined_call_operand.vmem [shape: f32[2,4,3,8,16], index: 0, kind: input, shape index: {}]   ;;  %s2350_s1 = inlined_call_operand.vmem [shape: f32[2,3,16,16], index: 1, kind: input, shape index: {}]   ;;  %s2351_s2 = inlined_call_operand.vmem [shape: f32[2,3,1,16], index: 2, kind: input, shape index: {}]   ;;  %s2352_s3 = inlined_call_operand.vmem [shape: f32[2,8,4,16], index: 3, kind: output, shape index: {}]  }
   0x1   :  { %s2106_s14 = smov 0  }
   0x2 LB: > { %s32_s15 = sadd.s32 1, %s2072_s13  ;;  %p1764_p0 = scmp.ge.s32.totalorder %s2076_s14, 1  ;;  %s2076_s14 = sphi %s2106_s14, %s13_s14   ;;  %s2072_s13 = sphi %s2104_s13, %s2354_s13   ;;  %s2068_s12 = sphi %s2102_s12, %s2353_s12  }
   0x3   : > { %p34_p1 = scmp.ge.s32.totalorder %s32_s15, 2  ;;  %p216_p2 = scmp.lt.s32.totalorder %s2076_s14, 3 }
   0x5   : > { %s2356_s15 = smov (%p34_p1, %s32_s15), 0  ;;  %p217_p3 = pnand %p1764_p0, %p216_p2 }
   0x6   : > { %p277_p4 = scmp.lt.s32.totalorder (!%p217_p3), %s2068_s12, 1  ;;  %s1769_s16 = sshll.u32 (!%p217_p3), %s2068_s12, 3  ;;  %vm330_vm0 = vcmask (!%p217_p3), 130048   ;;  %v2078_v0 = vmov (!%p217_p3), 0.0|0.0   ;;  %vm2079_vm1 = vmmov (!%p217_p3), 0   ;;  %v2080_v1 = vmov (!%p217_p3), 0.0  }
   0x7   : > { %220 = sbr.rel (%p217_p3) target bundleno = 1080 (0x438), region = 32  ;;  %1947 = vmatprep.subr.bf16.mxu0 (!%p217_p3), %v2078_v0  ;;  %1867 = vmatprep.mubr.msk.f32.mxu0 (!%p217_p3), %vm2079_vm1, %v2080_v1  ;;  %s2130_s18 = scalar_lea.vmem (!%p217_p3), [#allocation2], %s1769_s16  ;;  %v2081_v38 = vmov (!%p217_p3), 1966171168   ;;  %v612_v40 = vlaneseq (!%p217_p3)  ;;  %vm666_vm2 = vcmask (!%p217_p3), 122880  }
   0x8   : > { %331 = vst.msk [vmem:[%s2130_s18] sm:$0xff] (!%p217_p3), %vm330_vm0, %v2080_v1  ;;  %1950 = vmatprep.subr.bf16.mxu1 (!%p217_p3), %v2078_v0  ;;  %1874 = vmatprep.mubr.msk.f32.mxu1 (!%p217_p3), %vm2079_vm1, %v2080_v1  ;;  %s1777_s25 = smul.u32 (!%p217_p3), 72, %s2068_s12  ;;  %v610_v39 = vunpack.c.l.s4 (!%p217_p3), %v2081_v38  ;;  %s981_s20 = ssub.s32 (!%p217_p3), 2, %s2068_s12 }
   0x9   : > { %v613_v44 = vshrl.u32 (!%p217_p3), %v612_v40, 7  ;;  %s348_s7 = smul.u32 (!%p217_p3), 3, %s2068_s12 }
   0xa   : > { %v611_v43 = vunpack.c.0.s8 (!%p217_p3), %v610_v39  ;;  %s1691_s16 = smul.u32 (!%p217_p3), 24, %s2068_s12 }
   0xb   : > { %s982_s21 = smul.u32 (!%p217_p3), 24, %s981_s20 }
   0xc   : > { %v2196_v48 = vsub.s32 (!%p217_p3), %v611_v43, %v613_v44  ;;  %s1703_s26 = smul.u32 (!%p217_p3), 4294967293, %s2068_s12 }
   0xe   : > { %s2128_s17 = scalar_select %p277_p4, %s2068_s12, 1 }
   0xf   : > { %v2148_v10 = vld [vmem:[%s2130_s18] sm:$0xff] }
  0x10   : > { %s1984_s19 = smul.u32 48, %s2128_s17  ;;  %s1826_s6 = sshll.u32 %s2128_s17, 5 }
  0x11   : > { %s1983_s23 = smul.u32 96, %s2128_s17  ;;  %s2204_s10 = scalar_lea.vmem %s2352_s3, %s1826_s6 }
  0x12   : > { %s298_s22 = scalar_lea.vmem %s2350_s1, %s1984_s19  ;;  %s1985_s24 = smul.u32 3, %s2128_s17 }
  0x13   : > { %v332_v2 = vld [vmem:[%s298_s22] sm:$0xff]  ;;  %v333_v3 = vld [vmem:[%s298_s22 + $0x8] sm:$0xff]  ;;  %v1770_v4 = vld [vmem:[%s298_s22 + $0x10] sm:$0xff]  ;;  %s2179_s28 = scalar_lea.vmem %s2349_s0, %s1983_s23  ;;  %s665_s11 = scalar_lea.vmem %s2204_s10, %s348_s7 }
  0x14   : > { %v2142_v5 = vpack.c.bf16 %v333_v3, %v332_v2  ;;  %v1771_v6 = vld [vmem:[%s298_s22 + $0x18] sm:$0xff]  ;;  %v1772_v7 = vld [vmem:[%s298_s22 + $0x20] sm:$0xff]  ;;  %v1773_v8 = vld [vmem:[%s298_s22 + $0x28] sm:$0xff]  ;;  %s302_s4 = scalar_lea.vmem %s2351_s2, %s1985_s24  ;;  %s350_s5 = scalar_lea.vmem %s2179_s28, %s1777_s25 }
  0x15   : > { %v2144_v9 = vpack.c.bf16 %v1771_v6, %v1770_v4  ;;  %v2150_v11 = vpack.c.bf16 %v1773_v8, %v1772_v7  ;;  %v2185_v12 = vld [vmem:[%s302_s4] ss:$0 sm:$0xff]  ;;  %v2187_v13 = vld [vmem:[%s302_s4 + $0x1] ss:$0 sm:$0xff]  ;;  %v352_v18 = vld [vmem:[%s350_s5 + $0x8] sm:$0xff]  ;;  %s1692_s17 = scalar_lea.vmem %s2179_s28, %s1691_s16  ;;  %s1694_s19 = scalar_lea.vmem %s2204_s10, %s2068_s12 }
  0x16   : > { %1949 = vmatpush3.bf16.msra.mxu0 %v2142_v5  ;;  %v351_v14 = vld [vmem:[%s350_s5] sm:$0xff]  ;;  %v353_v35 = vld [vmem:[%s350_s5 + $0x10] sm:$0xff]  ;;  %v1786_v63 = vld [vmem:[%s1692_s17 + $0x18] sm:$0xff]  ;;  %s983_s22 = scalar_lea.vmem %s2179_s28, %s982_s21  ;;  %s1278_s23 = scalar_lea.vmem %s2204_s10, %s981_s20 }
  0x17   : > { %1952 = vmatpush3.bf16.msra.mxu1 %v2144_v9  ;;  %1953 = vmatprep.subr.bf16.mxu0 %v2078_v0  ;;  %v2191_v31 = vld [vmem:[%s302_s4 + $0x2] ss:$0 sm:$0xff]  ;;  %s1807_s24 = smul.u32 4294967224, %s2068_s12  ;;  %s1704_s27 = scalar_lea.vmem %s2204_s10, %s1703_s26 }
  0x18   : > { %1956 = vmatprep.subr.bf16.mxu1 %v2078_v0 }
  0x19   : > { %1868 = vmatmul.mubr.msk.f32.vlgmr.msra.gmra.mrb[0].mxu0 %vm330_vm0, %v2148_v10  ;;  %s1701_s25 = scalar_lea.vmem %s2179_s28, %s1807_s24 }
  0x1a   : > { %1875 = vmatmul.mubr.msk.f32.vlgmr.msra.gmra.mrb[0].mxu1 %vm330_vm0, %v2148_v10  ;;  %1955 = vmatpush3.bf16.msra.mxu0 %v2150_v11 }
  0x1b   : > { %1881 = vmatprep.mubr.msk.f32.mxu0 %vm2079_vm1, %v2080_v1  ;;  %1958 = vmatpush3.bf16.msra.mxu1 %v2142_v5 }
  0x1c   : > { %1959 = vmatprep.subr.bf16.mxu0 %v2078_v0  ;;  %1888 = vmatprep.mubr.msk.f32.mxu1 %vm2079_vm1, %v2080_v1 }
  0x1d   : > { %1882 = vmatmul.mubr.msk.f32.vlgmr.msra.gmra.mrb[2].mxu0 %vm330_vm0, %v2148_v10  ;;  %1962 = vmatprep.subr.bf16.mxu1 %v2078_v0 }
  0x1e   : > { %1961 = vmatpush3.bf16.msra.mxu0 %v2144_v9  ;;  %1895 = vmatprep.mubr.msk.f32.mxu0 %vm2079_vm1, %v2080_v1 }
  0x1f   : > { %1965 = vmatprep.subr.bf16.mxu0 %v2078_v0 }
  0xec   : > { %v430_v15 = vpop.f32.mrb[0].mxu0 }
  0xed   : > { %v431_v16 = vadd.f32 %v2185_v12, %v430_v15  ;;  %v1869_v17 = vpop.f32.mrb[1].mxu0  ;;  %v506_v19 = vpop.f32.mrb[0].mxu1 }
  0xee   : > { %v507_v20 = vadd.f32 %v2187_v13, %v506_v19  ;;  %v1876_v21 = vpop.f32.mrb[1].mxu1 }
  0xef   : > { %v586_v22 = vadd.f32 %v431_v16, %v351_v14  ;;  %v1787_v14 = vld [vmem:[%s1692_s17 + $0x20] sm:$0xff] }
  0xf0   : > { %v593_v23 = vadd.f32 %v507_v20, %v352_v18  ;;  %v582_v24 = vpop.f32.mrb[2].mxu0 }
  0xf1   : > { %v1784_v25 = vmul.f32 -1.442695, %v586_v22  ;;  %v1883_v26 = vpop.f32.mrb[3].mxu0  ;;  %v583_v33 = vadd.f32 %v2191_v31, %v582_v24 }
  0xf2   : > { %v1785_v27 = vmul.f32 -1.442695, %v593_v23  ;;  %v1788_v26 = vld [vmem:[%s1692_s17 + $0x28] sm:$0xff] }
  0xf3   : > { %2014 = vpow2.f32 %v1784_v25 }
  0xf4   : > { %2016 = vpow2.f32 %v1785_v27 }
  0xfd   : > { %v2015_v28 = vpop.eup %2014 }
  0xfe   : > { %v590_v29 = vadd.f32 1.0, %v2015_v28  ;;  %v2017_v30 = vpop.eup %2016 }
  0xff   : > { %v597_v32 = vadd.f32 1.0, %v2017_v30 }
 0x100   : > { %2018 = vrcp.f32 %v590_v29 }
 0x101   : > { %2020 = vrcp.f32 %v597_v32 }
 0x10a   : > { %v2019_v34 = vpop.eup %2018 }
 0x10b   : > { %v600_v36 = vmul.f32 %v2019_v34, %v583_v33  ;;  %v2021_v41 = vpop.eup %2020 }
 0x10c   : > { %v603_v42 = vsub.f32 1.0, %v2021_v41  ;;  %v605_v46 = vmul.f32 %v2021_v41, %v2148_v10 }
 0x10d   : > { %v601_v37 = vadd.f32 %v600_v36, %v353_v35 }
 0x10f   : > { %2022 = vtanh.f32 %v601_v37 }
 0x119   : > { %v2023_v45 = vpop.eup %2022 }
 0x11a   : > { %v604_v47 = vmul.f32 %v2023_v45, %v603_v42 }
 0x11c   : > { %v2199_v49 = vadd.f32 %v605_v46, %v604_v47 }
 0x11e   : > { %v608_v50 = vcombine.high %v2199_v49, %v2199_v49  ;;  %v615_v51 = vrot.slane %v2199_v49, %v2196_v48  ;;  %1889 = vmatmul.mubr.msk.f32.vlgmr.msra.gmra.mrb[2].mxu1 %vm330_vm0, %v2199_v49  ;;  %1896 = vmatmul.mubr.msk.f32.vlgmr.msra.gmra.mrb[4].mxu0 %vm330_vm0, %v2199_v49 }
 0x11f   : > { %1964 = vmatpush3.bf16.msra.mxu1 %v2150_v11  ;;  %1902 = vmatprep.mubr.msk.f32.mxu1 %vm2079_vm1, %v2080_v1 }
 0x120   : > { %v622_v52 = vrot.slane %v608_v50, %v2196_v48  ;;  %v623_v53 = vcombine.high %v615_v51, %v615_v51  ;;  %v631_v54 = vrot.slane %v615_v51, %v2196_v48  ;;  %1967 = vmatpush3.bf16.msra.mxu0 %v2142_v5  ;;  %1968 = vmatprep.subr.bf16.mxu1 %v2078_v0 }
 0x121   : > { %1909 = vmatprep.mubr.msk.f32.mxu0 %vm2079_vm1, %v2080_v1  ;;  %1971 = vmatprep.subr.bf16.mxu0 %v2078_v0 }
 0x122   : > { %v624_v55 = vcombine.high %v622_v52, %v622_v52  ;;  %1903 = vmatmul.mubr.msk.f32.vlgmr.msra.gmra.mrb[4].mxu1 %vm330_vm0, %v2199_v49  ;;  %v638_v56 = vrot.slane %v622_v52, %v2196_v48  ;;  %v645_v57 = vrot.slane %v623_v53, %v2196_v48  ;;  %v653_v58 = vcombine.high %v631_v54, %v631_v54 }
 0x123   : > { %667 = vst.msk [vmem:[%s665_s11] sm:$0x1] %vm666_vm2, %v631_v54  ;;  %1970 = vmatpush3.bf16.msra.mxu1 %v2144_v9  ;;  %1916 = vmatprep.mubr.msk.f32.mxu1 %vm2079_vm1, %v2080_v1 }
 0x124   : > { %v652_v59 = vrot.slane %v624_v55, %v2196_v48  ;;  %v654_v60 = vcombine.high %v638_v56, %v638_v56  ;;  %v655_v61 = vcombine.high %v645_v57, %v645_v57  ;;  %668 = vst.msk [vmem:[%s665_s11 + $0x4] sm:$0x1] %vm666_vm2, %v645_v57  ;;  %669 = vst.msk [vmem:[%s665_s11 + $0x8] sm:$0x1] %vm666_vm2, %v653_v58  ;;  %1974 = vmatprep.subr.bf16.mxu1 %v2078_v0  ;;  %v985_v55 = vld [vmem:[%s983_s22 + $0x8] sm:$0xff] }
 0x125   : > { %671 = vst.msk [vmem:[%s665_s11 + $0x10] sm:$0x1] %vm666_vm2, %v638_v56 }
 0x126   : > { %v656_v62 = vcombine.high %v652_v59, %v652_v59  ;;  %670 = vst.msk [vmem:[%s665_s11 + $0xc] sm:$0x1] %vm666_vm2, %v655_v61  ;;  %672 = vst.msk [vmem:[%s665_s11 + $0x14] sm:$0x1] %vm666_vm2, %v652_v59 }
 0x127   : > { %673 = vst.msk [vmem:[%s665_s11 + $0x18] sm:$0x1] %vm666_vm2, %v654_v60 }
 0x128   : > { %674 = vst.msk [vmem:[%s665_s11 + $0x1c] sm:$0x1] %vm666_vm2, %v656_v62 }
 0x1f1   : > { %v749_v2 = vpop.f32.mrb[2].mxu1  ;;  %v819_v3 = vpop.f32.mrb[4].mxu0 }
 0x1f2   : > { %v750_v4 = vadd.f32 %v2185_v12, %v749_v2  ;;  %v1890_v6 = vpop.f32.mrb[3].mxu1  ;;  %v1897_v7 = vpop.f32.mrb[5].mxu0  ;;  %v820_v8 = vadd.f32 %v2187_v13, %v819_v3 }
 0x1f3   : > { %v986_v6 = vld [vmem:[%s983_s22 + $0x10] sm:$0xff] }
 0x1f4   : > { %v893_v10 = vadd.f32 %v1786_v63, %v750_v4  ;;  %v900_v18 = vadd.f32 %v1787_v14, %v820_v8 }
 0x1f5   : > { %v889_v15 = vpop.f32.mrb[4].mxu1 }
 0x1f6   : > { %v1792_v16 = vmul.f32 -1.442695, %v893_v10  ;;  %v1904_v17 = vpop.f32.mrb[5].mxu1  ;;  %v1793_v19 = vmul.f32 -1.442695, %v900_v18  ;;  %v890_v24 = vadd.f32 %v2191_v31, %v889_v15 }
 0x1f8   : > { %2024 = vpow2.f32 %v1792_v16 }
 0x1f9   : > { %2026 = vpow2.f32 %v1793_v19 }
 0x202   : > { %v2025_v20 = vpop.eup %2024 }
 0x203   : > { %v897_v21 = vadd.f32 1.0, %v2025_v20  ;;  %v2027_v22 = vpop.eup %2026 }
 0x204   : > { %v904_v23 = vadd.f32 1.0, %v2027_v22 }
 0x205   : > { %2028 = vrcp.f32 %v897_v21 }
 0x206   : > { %2030 = vrcp.f32 %v904_v23 }
 0x20f   : > { %v2029_v25 = vpop.eup %2028 }
 0x210   : > { %v907_v27 = vmul.f32 %v2029_v25, %v890_v24  ;;  %v2031_v29 = vpop.eup %2030 }
 0x211   : > { %v910_v30 = vsub.f32 1.0, %v2031_v29  ;;  %v912_v33 = vmul.f32 %v2031_v29, %v2199_v49 }
 0x212   : > { %v908_v28 = vadd.f32 %v1788_v26, %v907_v27 }
 0x214   : > { %2032 = vtanh.f32 %v908_v28 }
 0x21e   : > { %v2033_v32 = vpop.eup %2032 }
 0x21f   : > { %v911_v34 = vmul.f32 %v2033_v32, %v910_v30  ;;  %v1808_v30 = vld [vmem:[%s1701_s25 + $0x48] sm:$0xff] }
 0x221   : > { %v2248_v35 = vadd.f32 %v912_v33, %v911_v34 }
 0x223   : > { %v915_v36 = vcombine.high %v2248_v35, %v2248_v35  ;;  %v922_v37 = vrot.slane %v2248_v35, %v2196_v48  ;;  %1910 = vmatmul.mubr.msk.f32.vlgmr.msra.gmra.mrb[6].mxu0 %vm330_vm0, %v2248_v35  ;;  %1917 = vmatmul.mubr.msk.f32.vlgmr.msra.gmra.mrb[6].mxu1 %vm330_vm0, %v2248_v35 }
 0x224   : > { %1973 = vmatpush3.bf16.msra.mxu0 %v2150_v11  ;;  %1923 = vmatprep.mubr.msk.f32.mxu0 %vm2079_vm1, %v2080_v1 }
 0x225   : > { %v929_v38 = vrot.slane %v915_v36, %v2196_v48  ;;  %v930_v39 = vcombine.high %v922_v37, %v922_v37  ;;  %v938_v40 = vrot.slane %v922_v37, %v2196_v48  ;;  %1976 = vmatpush3.bf16.msra.mxu1 %v2142_v5  ;;  %1977 = vmatprep.subr.bf16.mxu0 %v2078_v0 }
 0x226   : > { %1930 = vmatprep.mubr.msk.f32.mxu1 %vm2079_vm1, %v2080_v1  ;;  %1980 = vmatprep.subr.bf16.mxu1 %v2078_v0 }
 0x227   : > { %v931_v41 = vcombine.high %v929_v38, %v929_v38  ;;  %v945_v42 = vrot.slane %v929_v38, %v2196_v48  ;;  %v952_v43 = vrot.slane %v930_v39, %v2196_v48  ;;  %v960_v44 = vcombine.high %v938_v40, %v938_v40  ;;  %1924 = vmatmul.mubr.msk.f32.vlgmr.msra.gmra.mrb[8].mxu0 %vm330_vm0, %v2248_v35  ;;  %v1809_v39 = vld [vmem:[%s1701_s25 + $0x50] sm:$0xff] }
 0x228   : > { %1794 = vst.msk [vmem:[%s1694_s19 + $0x1] sm:$0x1] %vm666_vm2, %v938_v40  ;;  %1979 = vmatpush3.bf16.msra.mxu0 %v2144_v9  ;;  %1937 = vmatprep.mubr.msk.f32.mxu0 %vm2079_vm1, %v2080_v1  ;;  %v984_v9 = vld [vmem:[%s983_s22] sm:$0xff] }
 0x229   : > { %v959_v0 = vrot.slane %v931_v41, %v2196_v48  ;;  %v961_v5 = vcombine.high %v945_v42, %v945_v42  ;;  %v962_v45 = vcombine.high %v952_v43, %v952_v43  ;;  %1795 = vst.msk [vmem:[%s1694_s19 + $0x5] sm:$0x1] %vm666_vm2, %v952_v43  ;;  %1796 = vst.msk [vmem:[%s1694_s19 + $0x9] sm:$0x1] %vm666_vm2, %v960_v44 }
 0x22a   : > { %1798 = vst.msk [vmem:[%s1694_s19 + $0x11] sm:$0x1] %vm666_vm2, %v945_v42 }
 0x22b   : > { %v963_v46 = vcombine.high %v959_v0, %v959_v0  ;;  %1797 = vst.msk [vmem:[%s1694_s19 + $0xd] sm:$0x1] %vm666_vm2, %v962_v45  ;;  %1799 = vst.msk [vmem:[%s1694_s19 + $0x15] sm:$0x1] %vm666_vm2, %v959_v0 }
 0x22c   : > { %1800 = vst.msk [vmem:[%s1694_s19 + $0x19] sm:$0x1] %vm666_vm2, %v961_v5 }
 0x22d   : > { %1801 = vst.msk [vmem:[%s1694_s19 + $0x1d] sm:$0x1] %vm666_vm2, %v963_v46 }
 0x2f6   : > { %v1055_v47 = vpop.f32.mrb[6].mxu0  ;;  %v1125_v49 = vpop.f32.mrb[6].mxu1 }
 0x2f7   : > { %v1056_v50 = vadd.f32 %v2185_v12, %v1055_v47  ;;  %v1911_v51 = vpop.f32.mrb[7].mxu0  ;;  %v1918_v52 = vpop.f32.mrb[7].mxu1  ;;  %v1126_v53 = vadd.f32 %v2187_v13, %v1125_v49 }
 0x2f9   : > { %v1199_v54 = vadd.f32 %v1056_v50, %v984_v9  ;;  %v1206_v59 = vadd.f32 %v1126_v53, %v985_v55 }
 0x2fa   : > { %v1195_v56 = vpop.f32.mrb[8].mxu0 }
 0x2fb   : > { %v1805_v57 = vmul.f32 -1.442695, %v1199_v54  ;;  %v1925_v58 = vpop.f32.mrb[9].mxu0  ;;  %v1806_v60 = vmul.f32 -1.442695, %v1206_v59  ;;  %v1196_v3 = vadd.f32 %v2191_v31, %v1195_v56 }
 0x2fd   : > { %2034 = vpow2.f32 %v1805_v57 }
 0x2fe   : > { %2036 = vpow2.f32 %v1806_v60 }
 0x307   : > { %v2035_v61 = vpop.eup %2034 }
 0x308   : > { %v1203_v62 = vadd.f32 1.0, %v2035_v61  ;;  %v2037_v63 = vpop.eup %2036 }
 0x309   : > { %v1210_v2 = vadd.f32 1.0, %v2037_v63 }
 0x30a   : > { %2038 = vrcp.f32 %v1203_v62 }
 0x30b   : > { %2040 = vrcp.f32 %v1210_v2 }
 0x314   : > { %v2039_v4 = vpop.eup %2038 }
 0x315   : > { %v1213_v7 = vmul.f32 %v2039_v4, %v1196_v3  ;;  %v2041_v10 = vpop.eup %2040 }
 0x316   : > { %v1216_v14 = vsub.f32 1.0, %v2041_v10  ;;  %v1218_v16 = vmul.f32 %v2041_v10, %v2248_v35 }
 0x317   : > { %v1214_v8 = vadd.f32 %v1213_v7, %v986_v6 }
 0x319   : > { %2042 = vtanh.f32 %v1214_v8 }
 0x323   : > { %v2043_v15 = vpop.eup %2042 }
 0x324   : > { %v1217_v17 = vmul.f32 %v2043_v15, %v1216_v14 }
 0x326   : > { %v1219_v18 = vadd.f32 %v1218_v16, %v1217_v17 }
 0x328   : > { %v1221_v19 = vcombine.high %v1219_v18, %v1219_v18  ;;  %v1228_v20 = vrot.slane %v1219_v18, %v2196_v48  ;;  %1931 = vmatmul.mubr.msk.f32.vlgmr.msra.gmra.mrb[8].mxu1 %vm330_vm0, %v1219_v18  ;;  %1938 = vmatmul.mubr.msk.f32.vlgmr.msra.gmra.mrb[10].mxu0 %vm330_vm0, %v1219_v18 }
 0x329   : > { %1982 = vmatpush3.bf16.msra.mxu1 %v2150_v11  ;;  %1944 = vmatprep.mubr.msk.f32.mxu1 %vm2079_vm1, %v2080_v1 }
 0x32a   : > { %v1235_v21 = vrot.slane %v1221_v19, %v2196_v48  ;;  %v1236_v22 = vcombine.high %v1228_v20, %v1228_v20  ;;  %v1244_v23 = vrot.slane %v1228_v20, %v2196_v48 }
 0x32c   : > { %v1237_v24 = vcombine.high %v1235_v21, %v1235_v21  ;;  %v1251_v25 = vrot.slane %v1235_v21, %v2196_v48  ;;  %v1258_v26 = vrot.slane %v1236_v22, %v2196_v48  ;;  %v1266_v27 = vcombine.high %v1244_v23, %v1244_v23  ;;  %1279 = vst.msk [vmem:[%s1278_s23] sm:$0x1] %vm666_vm2, %v1244_v23 }
 0x32d   : > { %1945 = vmatmul.mubr.msk.f32.vlgmr.msra.gmra.mrb[10].mxu1 %vm330_vm0, %v1219_v18 }
 0x32e   : > { %v1265_v11 = vrot.slane %v1237_v24, %v2196_v48  ;;  %v1267_v1 = vcombine.high %v1251_v25, %v1251_v25  ;;  %v1268_v28 = vcombine.high %v1258_v26, %v1258_v26  ;;  %1280 = vst.msk [vmem:[%s1278_s23 + $0x4] sm:$0x1] %vm666_vm2, %v1258_v26  ;;  %1281 = vst.msk [vmem:[%s1278_s23 + $0x8] sm:$0x1] %vm666_vm2, %v1266_v27 }
 0x32f   : > { %1283 = vst.msk [vmem:[%s1278_s23 + $0x10] sm:$0x1] %vm666_vm2, %v1251_v25 }
 0x330   : > { %v1269_v29 = vcombine.high %v1265_v11, %v1265_v11  ;;  %1282 = vst.msk [vmem:[%s1278_s23 + $0xc] sm:$0x1] %vm666_vm2, %v1268_v28  ;;  %1284 = vst.msk [vmem:[%s1278_s23 + $0x14] sm:$0x1] %vm666_vm2, %v1265_v11 }
 0x331   : > { %1285 = vst.msk [vmem:[%s1278_s23 + $0x18] sm:$0x1] %vm666_vm2, %v1267_v1 }
 0x332   : > { %1286 = vst.msk [vmem:[%s1278_s23 + $0x1c] sm:$0x1] %vm666_vm2, %v1269_v29 }
 0x3fb   : > { %v1362_v32 = vpop.f32.mrb[8].mxu1  ;;  %v1432_v33 = vpop.f32.mrb[10].mxu0 }
 0x3fc   : > { %v1363_v34 = vadd.f32 %v2185_v12, %v1362_v32  ;;  %v1932_v35 = vpop.f32.mrb[9].mxu1  ;;  %v1939_v36 = vpop.f32.mrb[11].mxu0  ;;  %v1433_v37 = vadd.f32 %v2187_v13, %v1432_v33  ;;  %v1810_v13 = vld [vmem:[%s1701_s25 + $0x58] sm:$0xff] }
 0x3fe   : > { %v1506_v38 = vadd.f32 %v1808_v30, %v1363_v34  ;;  %v1513_v43 = vadd.f32 %v1809_v39, %v1433_v37 }
 0x400   : > { %v1502_v40 = vpop.f32.mrb[10].mxu1  ;;  %v1814_v41 = vmul.f32 -1.442695, %v1506_v38  ;;  %v1815_v44 = vmul.f32 -1.442695, %v1513_v43 }
 0x401   : > { %v1946_v42 = vpop.f32.mrb[11].mxu1  ;;  %v1503_v12 = vadd.f32 %v2191_v31, %v1502_v40 }
 0x402   : > { %2044 = vpow2.f32 %v1814_v41 }
 0x403   : > { %2046 = vpow2.f32 %v1815_v44 }
 0x40c   : > { %v2045_v0 = vpop.eup %2044 }
 0x40d   : > { %v1510_v5 = vadd.f32 1.0, %v2045_v0  ;;  %v2047_v45 = vpop.eup %2046 }
 0x40e   : > { %v1517_v46 = vadd.f32 1.0, %v2047_v45 }
 0x40f   : > { %2048 = vrcp.f32 %v1510_v5 }
 0x410   : > { %2050 = vrcp.f32 %v1517_v46 }
 0x419   : > { %v2049_v9 = vpop.eup %2048 }
 0x41a   : > { %v1520_v47 = vmul.f32 %v2049_v9, %v1503_v12  ;;  %v2051_v50 = vpop.eup %2050 }
 0x41b   : > { %v1523_v51 = vsub.f32 1.0, %v2051_v50  ;;  %v1525_v53 = vmul.f32 %v2051_v50, %v1219_v18 }
 0x41c   : > { %v1521_v49 = vadd.f32 %v1810_v13, %v1520_v47 }
 0x41e   : > { %2052 = vtanh.f32 %v1521_v49 }
 0x428   : > { %v2053_v52 = vpop.eup %2052 }
 0x429   : > { %v1524_v54 = vmul.f32 %v2053_v52, %v1523_v51 }
 0x42b   : > { %v1526_v55 = vadd.f32 %v1525_v53, %v1524_v54 }
 0x42d   : > { %v1528_v56 = vcombine.high %v1526_v55, %v1526_v55  ;;  %v1535_v57 = vrot.slane %v1526_v55, %v2196_v48  ;;  %1594 = vst.msk [vmem:[%s2130_s18] sm:$0xff] %vm330_vm0, %v1526_v55 }
 0x42f   : > { %v1542_v31 = vrot.slane %v1528_v56, %v2196_v48  ;;  %v1543_v58 = vcombine.high %v1535_v57, %v1535_v57  ;;  %v1551_v59 = vrot.slane %v1535_v57, %v2196_v48 }
 0x431   : > { %v1544_v60 = vcombine.high %v1542_v31, %v1542_v31  ;;  %v1558_v61 = vrot.slane %v1542_v31, %v2196_v48  ;;  %v1565_v62 = vrot.slane %v1543_v58, %v2196_v48  ;;  %v1573_v63 = vcombine.high %v1551_v59, %v1551_v59  ;;  %1816 = vst.msk [vmem:[%s1704_s27 + $0x3] sm:$0x1] %vm666_vm2, %v1551_v59 }
 0x433   : > { %v1572_v2 = vrot.slane %v1544_v60, %v2196_v48  ;;  %v1574_v3 = vcombine.high %v1558_v61, %v1558_v61  ;;  %v1575_v4 = vcombine.high %v1565_v62, %v1565_v62  ;;  %1817 = vst.msk [vmem:[%s1704_s27 + $0x7] sm:$0x1] %vm666_vm2, %v1565_v62  ;;  %1818 = vst.msk [vmem:[%s1704_s27 + $0xb] sm:$0x1] %vm666_vm2, %v1573_v63 }
 0x434   : > { %1820 = vst.msk [vmem:[%s1704_s27 + $0x13] sm:$0x1] %vm666_vm2, %v1558_v61 }
 0x435   : > { %v1576_v6 = vcombine.high %v1572_v2, %v1572_v2  ;;  %1819 = vst.msk [vmem:[%s1704_s27 + $0xf] sm:$0x1] %vm666_vm2, %v1575_v4  ;;  %1821 = vst.msk [vmem:[%s1704_s27 + $0x17] sm:$0x1] %vm666_vm2, %v1572_v2 }
 0x436   : > { %1822 = vst.msk [vmem:[%s1704_s27 + $0x1b] sm:$0x1] %vm666_vm2, %v1574_v3 }
 0x437   : > { %1823 = vst.msk [vmem:[%s1704_s27 + $0x1f] sm:$0x1] %vm666_vm2, %v1576_v6 }
 0x438 PF: > { %s13_s14 = sadd.s32 1, %s2076_s14   ;;  %s2353_s12 = smov %s2072_s13 }
 0x439   : > { %p10_p5 = scmp.ge.s32.totalorder %s13_s14, 4   ;;  %s2354_s13 = smov %s2356_s15 }
 0x43b   :  { %12 = sbr.rel (!%p10_p5) target bundleno = 2 (0x2), region = 86 }

</bundles_post_ra>
